<compile_context>
chip_gen: v5e
topology: v5e:2x2
jax: 0.10.0
libtpu: 0.0.40
codegen_flags: <defaults>
</compile_context>

<pallas_src>
import functools
import math

import jax
import jax.numpy as jnp
from jax.experimental import pallas as pl
from jax.experimental.pallas import tpu as pltpu


def _level_params(h, w, level):
    """Replicates PFSPPLayer's per-level static arithmetic exactly."""
    kH0 = math.ceil(h / level)
    kW0 = math.ceil(w / level)
    ph = (kH0 * level - h + 1) // 2
    pw = (kW0 * level - w + 1) // 2
    hn = 2 * ph + h
    wn = 2 * pw + w
    kH = math.ceil(hn / level)
    kW = math.ceil(wn / level)
    sH = hn // level
    sW = wn // level
    oH = (hn - kH) // sH + 1
    oW = (wn - kW) // sW + 1
    return kH, kW, sH, sW, ph, pw, oH, oW


def _spp_fused_kernel(x_ref, o_ref, *, bt, nc, h, w, levels):
    """All pyramid levels for `bt` batch elements.

    x_ref: (bt, nc, h, w)   NCHW input tile (W on the lane dim)
    o_ref: (bt, 1, F)       final flatten layout, F = nc * sum_l(oH_l*oW_l)
    """
    for b in range(bt):
        x = x_ref[b]                                   # (nc, h, w)
        for (kH, kW, sH, sW, ph, pw, oH, oW, off) in levels:
            S = oH * oW
            row_slabs = []
            for oh in range(oH):
                r0 = oh * sH - ph                      # window start, unpadded coords
                rs, re = max(r0, 0), min(r0 + kH, h)
                row_pad = (r0 < 0) or (r0 + kH > h)
                if rs < re:
                    # max over the window's valid rows -> (nc, w)
                    rowmax = jnp.max(x[:, rs:re, :], axis=1)
                    if row_pad:
                        # zero rows of the padding participate in the max
                        rowmax = jnp.maximum(rowmax, jnp.zeros_like(rowmax))
                else:
                    # window rows lie entirely in the zero padding
                    rowmax = jnp.zeros((nc, w), x.dtype)
                vals = []
                for ow in range(oW):
                    c0 = ow * sW - pw
                    cs, ce = max(c0, 0), min(c0 + kW, w)
                    col_pad = (c0 < 0) or (c0 + kW > w)
                    if cs < ce:
                        v = jnp.max(rowmax[:, cs:ce], axis=1, keepdims=True)  # (nc, 1)
                        if col_pad:
                            v = jnp.maximum(v, jnp.zeros_like(v))
                    else:
                        v = jnp.zeros((nc, 1), x.dtype)
                    vals.append(v)
                row_slabs.append(vals[0] if oW == 1 else jnp.concatenate(vals, axis=1))
            # (nc, S), lane index = oh*oW + ow (spatial row-major)
            pooled = row_slabs[0] if oH == 1 else jnp.concatenate(row_slabs, axis=1)
            # Final flatten order is [level][channel][oh][ow]: one contiguous
            # lane run of length S per (level, channel) -> coalesced stores.
            for ch in range(nc):
                o_ref[b, :, pl.ds(off + ch * S, S)] = pooled[ch:ch + 1, :]


def _pick_batch_tile(n, nc, h, w, itemsize):
    """Largest batch tile that keeps blocks small and >= 2 parallel grid steps."""
    budget = 4 << 20  # bytes per input block; conservative even for v7x (64 MiB VMEM)
    cands = [bt for bt in range(1, min(n, 8) + 1)
             if n % bt == 0 and bt * nc * h * w * itemsize <= budget]
    if not cands:
        return 1
    multi = [bt for bt in cands if n // bt >= 2]   # keep both v7x TCs busy when n >= 2
    return max(multi) if multi else max(cands)


def pf_spp_layer_pallas(x, num_levels=6):
    """x: (N, C, H, W) float array (NCHW, PyTorch convention)."""
    n, nc, h, w = x.shape

    levels = []
    off = 0
    for i in range(num_levels):
        kH, kW, sH, sW, ph, pw, oH, oW = _level_params(h, w, i + 1)
        levels.append((kH, kW, sH, sW, ph, pw, oH, oW, off))
        off += nc * oH * oW
    f_total = off

    bt = _pick_batch_tile(n, nc, h, w, x.dtype.itemsize)

    kernel = functools.partial(
        _spp_fused_kernel, bt=bt, nc=nc, h=h, w=w, levels=tuple(levels))

    out = pl.pallas_call(
        kernel,
        out_shape=jax.ShapeDtypeStruct((n, 1, f_total), x.dtype),
        grid=(n // bt,),
        in_specs=[pl.BlockSpec((bt, nc, h, w), lambda b: (b, 0, 0, 0))],
        out_specs=pl.BlockSpec((bt, 1, f_total), lambda b: (b, 0, 0)),
        compiler_params=pltpu.CompilerParams(
            dimension_semantics=("parallel",),
        ),
    )(x)

    return out.reshape(n, f_total)


def pf_spp_layer_ref(x, num_levels=6):
    """Pure-JAX reference replicating the PyTorch forward (pad -> max_pool2d)."""
    n, c, h, w = x.shape
    feats = []
    for i in range(num_levels):
        kH, kW, sH, sW, ph, pw, _, _ = _level_params(h, w, i + 1)
        xp = jnp.pad(x, ((0, 0), (0, 0), (ph, ph), (pw, pw)))
        pooled = jax.lax.reduce_window(
            xp, -jnp.inf, jax.lax.max,
            window_dimensions=(1, 1, kH, kW),
            window_strides=(1, 1, sH, sW),
            padding="VALID",
        )
        feats.append(pooled.reshape(n, -1))
    return jnp.concatenate(feats, axis=1)


if __name__ == "__main__":
    key = jax.random.PRNGKey(0)
    x = jax.random.normal(key, (2, 4, 16, 16), dtype=jnp.float32)  # NCHW

    out = jax.block_until_ready(pf_spp_layer_pallas(x, num_levels=6))
    ref = pf_spp_layer_ref(x, num_levels=6)

    # total features = C * sum(l^2 for l in 1..6) = 4 * 91 = 364
    assert out.shape == (2, 4 * 91), out.shape
    assert jnp.allclose(out, ref, atol=1e-6, rtol=1e-6), "mismatch vs reference"

    print("KERNEL_OK")
</pallas_src>

<mosaic_0001>
module attributes {stable_mosaic.version = 11 : i64} {
  func.func @_spp_fused_kernel(%arg0: i32, %arg1: memref<1x4x16x16xf32, #tpu.memory_space<vmem>>, %arg2: memref<1x1x364xf32, #tpu.memory_space<vmem>>) attributes {dimension_semantics = [#tpu.dimension_semantics<parallel>], iteration_bounds = array<i64: 2>, scalar_prefetch = 0 : i64, scratch_operands = 0 : i64, tpu.core_type = #tpu.core_type<tc>, window_params = [{transform_indices = @transform_0, window_bounds = array<i64: 1, 4, 16, 16>}, {transform_indices = @transform_1, window_bounds = array<i64: 1, 1, 364>}]} {
    %c0 = arith.constant 0 : index
    %c0_0 = arith.constant 0 : index
    %c0_1 = arith.constant 0 : index
    %c0_2 = arith.constant 0 : index
    %0 = vector.load %arg1[%c0, %c0_0, %c0_1, %c0_2] : memref<1x4x16x16xf32, #tpu.memory_space<vmem>>, vector<1x4x16x16xf32>
    %1 = vector.shape_cast %0 : vector<1x4x16x16xf32> to vector<4x16x16xf32>
    %cst = arith.constant dense<0xFF800000> : vector<4x16xf32>
    %2 = vector.multi_reduction <maximumf>, %1, %cst [1] : vector<4x16x16xf32> to vector<4x16xf32>
    %cst_3 = arith.constant dense<0xFF800000> : vector<4xf32>
    %3 = vector.multi_reduction <maximumf>, %2, %cst_3 [1] : vector<4x16xf32> to vector<4xf32>
    %4 = vector.shape_cast %3 : vector<4xf32> to vector<4x1xf32>
    %5 = vector.extract_strided_slice %4 {offsets = [0, 0], sizes = [1, 1], strides = [1, 1]} : vector<4x1xf32> to vector<1x1xf32>
    %c0_4 = arith.constant 0 : index
    %c0_5 = arith.constant 0 : index
    %c0_6 = arith.constant 0 : index
    %6 = vector.load %arg2[%c0_4, %c0_5, %c0_6] : memref<1x1x364xf32, #tpu.memory_space<vmem>>, vector<1x1x1xf32>
    %7 = vector.shape_cast %6 : vector<1x1x1xf32> to vector<1x1xf32>
    %8 = vector.shape_cast %5 : vector<1x1xf32> to vector<1x1x1xf32>
    tpu.vector_store %arg2[%c0_4, %c0_5, %c0_6], %8 {strides = array<i32>} : memref<1x1x364xf32, #tpu.memory_space<vmem>>, vector<1x1x1xf32>,
    %9 = vector.extract_strided_slice %4 {offsets = [1, 0], sizes = [1, 1], strides = [1, 1]} : vector<4x1xf32> to vector<1x1xf32>
    %c0_7 = arith.constant 0 : index
    %c0_8 = arith.constant 0 : index
    %c1 = arith.constant 1 : index
    %10 = vector.load %arg2[%c0_7, %c0_8, %c1] : memref<1x1x364xf32, #tpu.memory_space<vmem>>, vector<1x1x1xf32>
    %11 = vector.shape_cast %10 : vector<1x1x1xf32> to vector<1x1xf32>
    %12 = vector.shape_cast %9 : vector<1x1xf32> to vector<1x1x1xf32>
    tpu.vector_store %arg2[%c0_7, %c0_8, %c1], %12 {strides = array<i32>} : memref<1x1x364xf32, #tpu.memory_space<vmem>>, vector<1x1x1xf32>,
    %13 = vector.extract_strided_slice %4 {offsets = [2, 0], sizes = [1, 1], strides = [1, 1]} : vector<4x1xf32> to vector<1x1xf32>
    %c0_9 = arith.constant 0 : index
    %c0_10 = arith.constant 0 : index
    %c2 = arith.constant 2 : index
    %14 = vector.load %arg2[%c0_9, %c0_10, %c2] : memref<1x1x364xf32, #tpu.memory_space<vmem>>, vector<1x1x1xf32>
    %15 = vector.shape_cast %14 : vector<1x1x1xf32> to vector<1x1xf32>
    %16 = vector.shape_cast %13 : vector<1x1xf32> to vector<1x1x1xf32>
    tpu.vector_store %arg2[%c0_9, %c0_10, %c2], %16 {strides = array<i32>} : memref<1x1x364xf32, #tpu.memory_space<vmem>>, vector<1x1x1xf32>,
    %17 = vector.extract_strided_slice %4 {offsets = [3, 0], sizes = [1, 1], strides = [1, 1]} : vector<4x1xf32> to vector<1x1xf32>
    %c0_11 = arith.constant 0 : index
    %c0_12 = arith.constant 0 : index
    %c3 = arith.constant 3 : index
    %18 = vector.load %arg2[%c0_11, %c0_12, %c3] : memref<1x1x364xf32, #tpu.memory_space<vmem>>, vector<1x1x1xf32>
    %19 = vector.shape_cast %18 : vector<1x1x1xf32> to vector<1x1xf32>
    %20 = vector.shape_cast %17 : vector<1x1xf32> to vector<1x1x1xf32>
    tpu.vector_store %arg2[%c0_11, %c0_12, %c3], %20 {strides = array<i32>} : memref<1x1x364xf32, #tpu.memory_space<vmem>>, vector<1x1x1xf32>,
    %21 = vector.extract_strided_slice %1 {offsets = [0, 0, 0], sizes = [4, 8, 16], strides = [1, 1, 1]} : vector<4x16x16xf32> to vector<4x8x16xf32>
    %cst_13 = arith.constant dense<0xFF800000> : vector<4x16xf32>
    %22 = vector.multi_reduction <maximumf>, %21, %cst_13 [1] : vector<4x8x16xf32> to vector<4x16xf32>
    %23 = vector.extract_strided_slice %22 {offsets = [0, 0], sizes = [4, 8], strides = [1, 1]} : vector<4x16xf32> to vector<4x8xf32>
    %cst_14 = arith.constant dense<0xFF800000> : vector<4xf32>
    %24 = vector.multi_reduction <maximumf>, %23, %cst_14 [1] : vector<4x8xf32> to vector<4xf32>
    %25 = vector.shape_cast %24 : vector<4xf32> to vector<4x1xf32>
    %26 = vector.extract_strided_slice %22 {offsets = [0, 8], sizes = [4, 8], strides = [1, 1]} : vector<4x16xf32> to vector<4x8xf32>
    %cst_15 = arith.constant dense<0xFF800000> : vector<4xf32>
    %27 = vector.multi_reduction <maximumf>, %26, %cst_15 [1] : vector<4x8xf32> to vector<4xf32>
    %28 = vector.shape_cast %27 : vector<4xf32> to vector<4x1xf32>
    %29 = tpu.concatenate %25, %28 in 1 : vector<4x1xf32>, vector<4x1xf32> -> vector<4x2xf32>
    %30 = vector.extract_strided_slice %1 {offsets = [0, 8, 0], sizes = [4, 8, 16], strides = [1, 1, 1]} : vector<4x16x16xf32> to vector<4x8x16xf32>
    %cst_16 = arith.constant dense<0xFF800000> : vector<4x16xf32>
    %31 = vector.multi_reduction <maximumf>, %30, %cst_16 [1] : vector<4x8x16xf32> to vector<4x16xf32>
    %32 = vector.extract_strided_slice %31 {offsets = [0, 0], sizes = [4, 8], strides = [1, 1]} : vector<4x16xf32> to vector<4x8xf32>
    %cst_17 = arith.constant dense<0xFF800000> : vector<4xf32>
    %33 = vector.multi_reduction <maximumf>, %32, %cst_17 [1] : vector<4x8xf32> to vector<4xf32>
    %34 = vector.shape_cast %33 : vector<4xf32> to vector<4x1xf32>
    %35 = vector.extract_strided_slice %31 {offsets = [0, 8], sizes = [4, 8], strides = [1, 1]} : vector<4x16xf32> to vector<4x8xf32>
    %cst_18 = arith.constant dense<0xFF800000> : vector<4xf32>
    %36 = vector.multi_reduction <maximumf>, %35, %cst_18 [1] : vector<4x8xf32> to vector<4xf32>
    %37 = vector.shape_cast %36 : vector<4xf32> to vector<4x1xf32>
    %38 = tpu.concatenate %34, %37 in 1 : vector<4x1xf32>, vector<4x1xf32> -> vector<4x2xf32>
    %39 = tpu.concatenate %29, %38 in 1 : vector<4x2xf32>, vector<4x2xf32> -> vector<4x4xf32>
    %40 = vector.extract_strided_slice %39 {offsets = [0, 0], sizes = [1, 4], strides = [1, 1]} : vector<4x4xf32> to vector<1x4xf32>
    %c0_19 = arith.constant 0 : index
    %c0_20 = arith.constant 0 : index
    %c4 = arith.constant 4 : index
    %41 = vector.load %arg2[%c0_19, %c0_20, %c4] : memref<1x1x364xf32, #tpu.memory_space<vmem>>, vector<1x1x4xf32>
    %42 = vector.shape_cast %41 : vector<1x1x4xf32> to vector<1x4xf32>
    %43 = vector.shape_cast %40 : vector<1x4xf32> to vector<1x1x4xf32>
    tpu.vector_store %arg2[%c0_19, %c0_20, %c4], %43 {strides = array<i32>} : memref<1x1x364xf32, #tpu.memory_space<vmem>>, vector<1x1x4xf32>,
    %44 = vector.extract_strided_slice %39 {offsets = [1, 0], sizes = [1, 4], strides = [1, 1]} : vector<4x4xf32> to vector<1x4xf32>
    %c0_21 = arith.constant 0 : index
    %c0_22 = arith.constant 0 : index
    %c8 = arith.constant 8 : index
    %45 = vector.load %arg2[%c0_21, %c0_22, %c8] : memref<1x1x364xf32, #tpu.memory_space<vmem>>, vector<1x1x4xf32>
    %46 = vector.shape_cast %45 : vector<1x1x4xf32> to vector<1x4xf32>
    %47 = vector.shape_cast %44 : vector<1x4xf32> to vector<1x1x4xf32>
    tpu.vector_store %arg2[%c0_21, %c0_22, %c8], %47 {strides = array<i32>} : memref<1x1x364xf32, #tpu.memory_space<vmem>>, vector<1x1x4xf32>,
    %48 = vector.extract_strided_slice %39 {offsets = [2, 0], sizes = [1, 4], strides = [1, 1]} : vector<4x4xf32> to vector<1x4xf32>
    %c0_23 = arith.constant 0 : index
    %c0_24 = arith.constant 0 : index
    %c12 = arith.constant 12 : index
    %49 = vector.load %arg2[%c0_23, %c0_24, %c12] : memref<1x1x364xf32, #tpu.memory_space<vmem>>, vector<1x1x4xf32>
    %50 = vector.shape_cast %49 : vector<1x1x4xf32> to vector<1x4xf32>
    %51 = vector.shape_cast %48 : vector<1x4xf32> to vector<1x1x4xf32>
    tpu.vector_store %arg2[%c0_23, %c0_24, %c12], %51 {strides = array<i32>} : memref<1x1x364xf32, #tpu.memory_space<vmem>>, vector<1x1x4xf32>,
    %52 = vector.extract_strided_slice %39 {offsets = [3, 0], sizes = [1, 4], strides = [1, 1]} : vector<4x4xf32> to vector<1x4xf32>
    %c0_25 = arith.constant 0 : index
    %c0_26 = arith.constant 0 : index
    %c16 = arith.constant 16 : index
    %53 = vector.load %arg2[%c0_25, %c0_26, %c16] : memref<1x1x364xf32, #tpu.memory_space<vmem>>, vector<1x1x4xf32>
    %54 = vector.shape_cast %53 : vector<1x1x4xf32> to vector<1x4xf32>
    %55 = vector.shape_cast %52 : vector<1x4xf32> to vector<1x1x4xf32>
    tpu.vector_store %arg2[%c0_25, %c0_26, %c16], %55 {strides = array<i32>} : memref<1x1x364xf32, #tpu.memory_space<vmem>>, vector<1x1x4xf32>,
    %56 = vector.extract_strided_slice %1 {offsets = [0, 0, 0], sizes = [4, 5, 16], strides = [1, 1, 1]} : vector<4x16x16xf32> to vector<4x5x16xf32>
    %cst_27 = arith.constant dense<0xFF800000> : vector<4x16xf32>
    %57 = vector.multi_reduction <maximumf>, %56, %cst_27 [1] : vector<4x5x16xf32> to vector<4x16xf32>
    %cst_28 = arith.constant 0.000000e+00 : f32
    %58 = vector.broadcast %cst_28 : f32 to vector<4x16xf32>
    %59 = arith.maximumf %57, %58 : vector<4x16xf32>
    %60 = vector.extract_strided_slice %59 {offsets = [0, 0], sizes = [4, 5], strides = [1, 1]} : vector<4x16xf32> to vector<4x5xf32>
    %cst_29 = arith.constant dense<0xFF800000> : vector<4xf32>
    %61 = vector.multi_reduction <maximumf>, %60, %cst_29 [1] : vector<4x5xf32> to vector<4xf32>
    %62 = vector.shape_cast %61 : vector<4xf32> to vector<4x1xf32>
    %cst_30 = arith.constant 0.000000e+00 : f32
    %63 = vector.broadcast %cst_30 : f32 to vector<4x1xf32>
    %64 = arith.maximumf %62, %63 : vector<4x1xf32>
    %65 = vector.extract_strided_slice %59 {offsets = [0, 5], sizes = [4, 6], strides = [1, 1]} : vector<4x16xf32> to vector<4x6xf32>
    %cst_31 = arith.constant dense<0xFF800000> : vector<4xf32>
    %66 = vector.multi_reduction <maximumf>, %65, %cst_31 [1] : vector<4x6xf32> to vector<4xf32>
    %67 = vector.shape_cast %66 : vector<4xf32> to vector<4x1xf32>
    %68 = vector.extract_strided_slice %59 {offsets = [0, 11], sizes = [4, 5], strides = [1, 1]} : vector<4x16xf32> to vector<4x5xf32>
    %cst_32 = arith.constant dense<0xFF800000> : vector<4xf32>
    %69 = vector.multi_reduction <maximumf>, %68, %cst_32 [1] : vector<4x5xf32> to vector<4xf32>
    %70 = vector.shape_cast %69 : vector<4xf32> to vector<4x1xf32>
    %cst_33 = arith.constant 0.000000e+00 : f32
    %71 = vector.broadcast %cst_33 : f32 to vector<4x1xf32>
    %72 = arith.maximumf %70, %71 : vector<4x1xf32>
    %73 = tpu.concatenate %64, %67, %72 in 1 : vector<4x1xf32>, vector<4x1xf32>, vector<4x1xf32> -> vector<4x3xf32>
    %74 = vector.extract_strided_slice %1 {offsets = [0, 5, 0], sizes = [4, 6, 16], strides = [1, 1, 1]} : vector<4x16x16xf32> to vector<4x6x16xf32>
    %cst_34 = arith.constant dense<0xFF800000> : vector<4x16xf32>
    %75 = vector.multi_reduction <maximumf>, %74, %cst_34 [1] : vector<4x6x16xf32> to vector<4x16xf32>
    %76 = vector.extract_strided_slice %75 {offsets = [0, 0], sizes = [4, 5], strides = [1, 1]} : vector<4x16xf32> to vector<4x5xf32>
    %cst_35 = arith.constant dense<0xFF800000> : vector<4xf32>
    %77 = vector.multi_reduction <maximumf>, %76, %cst_35 [1] : vector<4x5xf32> to vector<4xf32>
    %78 = vector.shape_cast %77 : vector<4xf32> to vector<4x1xf32>
    %cst_36 = arith.constant 0.000000e+00 : f32
    %79 = vector.broadcast %cst_36 : f32 to vector<4x1xf32>
    %80 = arith.maximumf %78, %79 : vector<4x1xf32>
    %81 = vector.extract_strided_slice %75 {offsets = [0, 5], sizes = [4, 6], strides = [1, 1]} : vector<4x16xf32> to vector<4x6xf32>
    %cst_37 = arith.constant dense<0xFF800000> : vector<4xf32>
    %82 = vector.multi_reduction <maximumf>, %81, %cst_37 [1] : vector<4x6xf32> to vector<4xf32>
    %83 = vector.shape_cast %82 : vector<4xf32> to vector<4x1xf32>
    %84 = vector.extract_strided_slice %75 {offsets = [0, 11], sizes = [4, 5], strides = [1, 1]} : vector<4x16xf32> to vector<4x5xf32>
    %cst_38 = arith.constant dense<0xFF800000> : vector<4xf32>
    %85 = vector.multi_reduction <maximumf>, %84, %cst_38 [1] : vector<4x5xf32> to vector<4xf32>
    %86 = vector.shape_cast %85 : vector<4xf32> to vector<4x1xf32>
    %cst_39 = arith.constant 0.000000e+00 : f32
    %87 = vector.broadcast %cst_39 : f32 to vector<4x1xf32>
    %88 = arith.maximumf %86, %87 : vector<4x1xf32>
    %89 = tpu.concatenate %80, %83, %88 in 1 : vector<4x1xf32>, vector<4x1xf32>, vector<4x1xf32> -> vector<4x3xf32>
    %90 = vector.extract_strided_slice %1 {offsets = [0, 11, 0], sizes = [4, 5, 16], strides = [1, 1, 1]} : vector<4x16x16xf32> to vector<4x5x16xf32>
    %cst_40 = arith.constant dense<0xFF800000> : vector<4x16xf32>
    %91 = vector.multi_reduction <maximumf>, %90, %cst_40 [1] : vector<4x5x16xf32> to vector<4x16xf32>
    %cst_41 = arith.constant 0.000000e+00 : f32
    %92 = vector.broadcast %cst_41 : f32 to vector<4x16xf32>
    %93 = arith.maximumf %91, %92 : vector<4x16xf32>
    %94 = vector.extract_strided_slice %93 {offsets = [0, 0], sizes = [4, 5], strides = [1, 1]} : vector<4x16xf32> to vector<4x5xf32>
    %cst_42 = arith.constant dense<0xFF800000> : vector<4xf32>
    %95 = vector.multi_reduction <maximumf>, %94, %cst_42 [1] : vector<4x5xf32> to vector<4xf32>
    %96 = vector.shape_cast %95 : vector<4xf32> to vector<4x1xf32>
    %cst_43 = arith.constant 0.000000e+00 : f32
    %97 = vector.broadcast %cst_43 : f32 to vector<4x1xf32>
    %98 = arith.maximumf %96, %97 : vector<4x1xf32>
    %99 = vector.extract_strided_slice %93 {offsets = [0, 5], sizes = [4, 6], strides = [1, 1]} : vector<4x16xf32> to vector<4x6xf32>
    %cst_44 = arith.constant dense<0xFF800000> : vector<4xf32>
    %100 = vector.multi_reduction <maximumf>, %99, %cst_44 [1] : vector<4x6xf32> to vector<4xf32>
    %101 = vector.shape_cast %100 : vector<4xf32> to vector<4x1xf32>
    %102 = vector.extract_strided_slice %93 {offsets = [0, 11], sizes = [4, 5], strides = [1, 1]} : vector<4x16xf32> to vector<4x5xf32>
    %cst_45 = arith.constant dense<0xFF800000> : vector<4xf32>
    %103 = vector.multi_reduction <maximumf>, %102, %cst_45 [1] : vector<4x5xf32> to vector<4xf32>
    %104 = vector.shape_cast %103 : vector<4xf32> to vector<4x1xf32>
    %cst_46 = arith.constant 0.000000e+00 : f32
    %105 = vector.broadcast %cst_46 : f32 to vector<4x1xf32>
    %106 = arith.maximumf %104, %105 : vector<4x1xf32>
    %107 = tpu.concatenate %98, %101, %106 in 1 : vector<4x1xf32>, vector<4x1xf32>, vector<4x1xf32> -> vector<4x3xf32>
    %108 = tpu.concatenate %73, %89, %107 in 1 : vector<4x3xf32>, vector<4x3xf32>, vector<4x3xf32> -> vector<4x9xf32>
    %109 = vector.extract_strided_slice %108 {offsets = [0, 0], sizes = [1, 9], strides = [1, 1]} : vector<4x9xf32> to vector<1x9xf32>
    %c0_47 = arith.constant 0 : index
    %c0_48 = arith.constant 0 : index
    %c20 = arith.constant 20 : index
    %110 = vector.load %arg2[%c0_47, %c0_48, %c20] : memref<1x1x364xf32, #tpu.memory_space<vmem>>, vector<1x1x9xf32>
    %111 = vector.shape_cast %110 : vector<1x1x9xf32> to vector<1x9xf32>
    %112 = vector.shape_cast %109 : vector<1x9xf32> to vector<1x1x9xf32>
    tpu.vector_store %arg2[%c0_47, %c0_48, %c20], %112 {strides = array<i32>} : memref<1x1x364xf32, #tpu.memory_space<vmem>>, vector<1x1x9xf32>,
    %113 = vector.extract_strided_slice %108 {offsets = [1, 0], sizes = [1, 9], strides = [1, 1]} : vector<4x9xf32> to vector<1x9xf32>
    %c0_49 = arith.constant 0 : index
    %c0_50 = arith.constant 0 : index
    %c29 = arith.constant 29 : index
    %114 = vector.load %arg2[%c0_49, %c0_50, %c29] : memref<1x1x364xf32, #tpu.memory_space<vmem>>, vector<1x1x9xf32>
    %115 = vector.shape_cast %114 : vector<1x1x9xf32> to vector<1x9xf32>
    %116 = vector.shape_cast %113 : vector<1x9xf32> to vector<1x1x9xf32>
    tpu.vector_store %arg2[%c0_49, %c0_50, %c29], %116 {strides = array<i32>} : memref<1x1x364xf32, #tpu.memory_space<vmem>>, vector<1x1x9xf32>,
    %117 = vector.extract_strided_slice %108 {offsets = [2, 0], sizes = [1, 9], strides = [1, 1]} : vector<4x9xf32> to vector<1x9xf32>
    %c0_51 = arith.constant 0 : index
    %c0_52 = arith.constant 0 : index
    %c38 = arith.constant 38 : index
    %118 = vector.load %arg2[%c0_51, %c0_52, %c38] : memref<1x1x364xf32, #tpu.memory_space<vmem>>, vector<1x1x9xf32>
    %119 = vector.shape_cast %118 : vector<1x1x9xf32> to vector<1x9xf32>
    %120 = vector.shape_cast %117 : vector<1x9xf32> to vector<1x1x9xf32>
    tpu.vector_store %arg2[%c0_51, %c0_52, %c38], %120 {strides = array<i32>} : memref<1x1x364xf32, #tpu.memory_space<vmem>>, vector<1x1x9xf32>,
    %121 = vector.extract_strided_slice %108 {offsets = [3, 0], sizes = [1, 9], strides = [1, 1]} : vector<4x9xf32> to vector<1x9xf32>
    %c0_53 = arith.constant 0 : index
    %c0_54 = arith.constant 0 : index
    %c47 = arith.constant 47 : index
    %122 = vector.load %arg2[%c0_53, %c0_54, %c47] : memref<1x1x364xf32, #tpu.memory_space<vmem>>, vector<1x1x9xf32>
    %123 = vector.shape_cast %122 : vector<1x1x9xf32> to vector<1x9xf32>
    %124 = vector.shape_cast %121 : vector<1x9xf32> to vector<1x1x9xf32>
    tpu.vector_store %arg2[%c0_53, %c0_54, %c47], %124 {strides = array<i32>} : memref<1x1x364xf32, #tpu.memory_space<vmem>>, vector<1x1x9xf32>,
    %125 = vector.extract_strided_slice %1 {offsets = [0, 0, 0], sizes = [4, 4, 16], strides = [1, 1, 1]} : vector<4x16x16xf32> to vector<4x4x16xf32>
    %cst_55 = arith.constant dense<0xFF800000> : vector<4x16xf32>
    %126 = vector.multi_reduction <maximumf>, %125, %cst_55 [1] : vector<4x4x16xf32> to vector<4x16xf32>
    %127 = vector.extract_strided_slice %126 {offsets = [0, 0], sizes = [4, 4], strides = [1, 1]} : vector<4x16xf32> to vector<4x4xf32>
    %cst_56 = arith.constant dense<0xFF800000> : vector<4xf32>
    %128 = vector.multi_reduction <maximumf>, %127, %cst_56 [1] : vector<4x4xf32> to vector<4xf32>
    %129 = vector.shape_cast %128 : vector<4xf32> to vector<4x1xf32>
    %130 = vector.extract_strided_slice %126 {offsets = [0, 4], sizes = [4, 4], strides = [1, 1]} : vector<4x16xf32> to vector<4x4xf32>
    %cst_57 = arith.constant dense<0xFF800000> : vector<4xf32>
    %131 = vector.multi_reduction <maximumf>, %130, %cst_57 [1] : vector<4x4xf32> to vector<4xf32>
    %132 = vector.shape_cast %131 : vector<4xf32> to vector<4x1xf32>
    %133 = vector.extract_strided_slice %126 {offsets = [0, 8], sizes = [4, 4], strides = [1, 1]} : vector<4x16xf32> to vector<4x4xf32>
    %cst_58 = arith.constant dense<0xFF800000> : vector<4xf32>
    %134 = vector.multi_reduction <maximumf>, %133, %cst_58 [1] : vector<4x4xf32> to vector<4xf32>
    %135 = vector.shape_cast %134 : vector<4xf32> to vector<4x1xf32>
    %136 = vector.extract_strided_slice %126 {offsets = [0, 12], sizes = [4, 4], strides = [1, 1]} : vector<4x16xf32> to vector<4x4xf32>
    %cst_59 = arith.constant dense<0xFF800000> : vector<4xf32>
    %137 = vector.multi_reduction <maximumf>, %136, %cst_59 [1] : vector<4x4xf32> to vector<4xf32>
    %138 = vector.shape_cast %137 : vector<4xf32> to vector<4x1xf32>
    %139 = tpu.concatenate %129, %132, %135, %138 in 1 : vector<4x1xf32>, vector<4x1xf32>, vector<4x1xf32>, vector<4x1xf32> -> vector<4x4xf32>
    %140 = vector.extract_strided_slice %1 {offsets = [0, 4, 0], sizes = [4, 4, 16], strides = [1, 1, 1]} : vector<4x16x16xf32> to vector<4x4x16xf32>
    %cst_60 = arith.constant dense<0xFF800000> : vector<4x16xf32>
    %141 = vector.multi_reduction <maximumf>, %140, %cst_60 [1] : vector<4x4x16xf32> to vector<4x16xf32>
    %142 = vector.extract_strided_slice %141 {offsets = [0, 0], sizes = [4, 4], strides = [1, 1]} : vector<4x16xf32> to vector<4x4xf32>
    %cst_61 = arith.constant dense<0xFF800000> : vector<4xf32>
    %143 = vector.multi_reduction <maximumf>, %142, %cst_61 [1] : vector<4x4xf32> to vector<4xf32>
    %144 = vector.shape_cast %143 : vector<4xf32> to vector<4x1xf32>
    %145 = vector.extract_strided_slice %141 {offsets = [0, 4], sizes = [4, 4], strides = [1, 1]} : vector<4x16xf32> to vector<4x4xf32>
    %cst_62 = arith.constant dense<0xFF800000> : vector<4xf32>
    %146 = vector.multi_reduction <maximumf>, %145, %cst_62 [1] : vector<4x4xf32> to vector<4xf32>
    %147 = vector.shape_cast %146 : vector<4xf32> to vector<4x1xf32>
    %148 = vector.extract_strided_slice %141 {offsets = [0, 8], sizes = [4, 4], strides = [1, 1]} : vector<4x16xf32> to vector<4x4xf32>
    %cst_63 = arith.constant dense<0xFF800000> : vector<4xf32>
    %149 = vector.multi_reduction <maximumf>, %148, %cst_63 [1] : vector<4x4xf32> to vector<4xf32>
    %150 = vector.shape_cast %149 : vector<4xf32> to vector<4x1xf32>
    %151 = vector.extract_strided_slice %141 {offsets = [0, 12], sizes = [4, 4], strides = [1, 1]} : vector<4x16xf32> to vector<4x4xf32>
    %cst_64 = arith.constant dense<0xFF800000> : vector<4xf32>
    %152 = vector.multi_reduction <maximumf>, %151, %cst_64 [1] : vector<4x4xf32> to vector<4xf32>
    %153 = vector.shape_cast %152 : vector<4xf32> to vector<4x1xf32>
    %154 = tpu.concatenate %144, %147, %150, %153 in 1 : vector<4x1xf32>, vector<4x1xf32>, vector<4x1xf32>, vector<4x1xf32> -> vector<4x4xf32>
    %155 = vector.extract_strided_slice %1 {offsets = [0, 8, 0], sizes = [4, 4, 16], strides = [1, 1, 1]} : vector<4x16x16xf32> to vector<4x4x16xf32>
    %cst_65 = arith.constant dense<0xFF800000> : vector<4x16xf32>
    %156 = vector.multi_reduction <maximumf>, %155, %cst_65 [1] : vector<4x4x16xf32> to vector<4x16xf32>
    %157 = vector.extract_strided_slice %156 {offsets = [0, 0], sizes = [4, 4], strides = [1, 1]} : vector<4x16xf32> to vector<4x4xf32>
    %cst_66 = arith.constant dense<0xFF800000> : vector<4xf32>
    %158 = vector.multi_reduction <maximumf>, %157, %cst_66 [1] : vector<4x4xf32> to vector<4xf32>
    %159 = vector.shape_cast %158 : vector<4xf32> to vector<4x1xf32>
    %160 = vector.extract_strided_slice %156 {offsets = [0, 4], sizes = [4, 4], strides = [1, 1]} : vector<4x16xf32> to vector<4x4xf32>
    %cst_67 = arith.constant dense<0xFF800000> : vector<4xf32>
    %161 = vector.multi_reduction <maximumf>, %160, %cst_67 [1] : vector<4x4xf32> to vector<4xf32>
    %162 = vector.shape_cast %161 : vector<4xf32> to vector<4x1xf32>
    %163 = vector.extract_strided_slice %156 {offsets = [0, 8], sizes = [4, 4], strides = [1, 1]} : vector<4x16xf32> to vector<4x4xf32>
    %cst_68 = arith.constant dense<0xFF800000> : vector<4xf32>
    %164 = vector.multi_reduction <maximumf>, %163, %cst_68 [1] : vector<4x4xf32> to vector<4xf32>
    %165 = vector.shape_cast %164 : vector<4xf32> to vector<4x1xf32>
    %166 = vector.extract_strided_slice %156 {offsets = [0, 12], sizes = [4, 4], strides = [1, 1]} : vector<4x16xf32> to vector<4x4xf32>
    %cst_69 = arith.constant dense<0xFF800000> : vector<4xf32>
    %167 = vector.multi_reduction <maximumf>, %166, %cst_69 [1] : vector<4x4xf32> to vector<4xf32>
    %168 = vector.shape_cast %167 : vector<4xf32> to vector<4x1xf32>
    %169 = tpu.concatenate %159, %162, %165, %168 in 1 : vector<4x1xf32>, vector<4x1xf32>, vector<4x1xf32>, vector<4x1xf32> -> vector<4x4xf32>
    %170 = vector.extract_strided_slice %1 {offsets = [0, 12, 0], sizes = [4, 4, 16], strides = [1, 1, 1]} : vector<4x16x16xf32> to vector<4x4x16xf32>
    %cst_70 = arith.constant dense<0xFF800000> : vector<4x16xf32>
    %171 = vector.multi_reduction <maximumf>, %170, %cst_70 [1] : vector<4x4x16xf32> to vector<4x16xf32>
    %172 = vector.extract_strided_slice %171 {offsets = [0, 0], sizes = [4, 4], strides = [1, 1]} : vector<4x16xf32> to vector<4x4xf32>
    %cst_71 = arith.constant dense<0xFF800000> : vector<4xf32>
    %173 = vector.multi_reduction <maximumf>, %172, %cst_71 [1] : vector<4x4xf32> to vector<4xf32>
    %174 = vector.shape_cast %173 : vector<4xf32> to vector<4x1xf32>
    %175 = vector.extract_strided_slice %171 {offsets = [0, 4], sizes = [4, 4], strides = [1, 1]} : vector<4x16xf32> to vector<4x4xf32>
    %cst_72 = arith.constant dense<0xFF800000> : vector<4xf32>
    %176 = vector.multi_reduction <maximumf>, %175, %cst_72 [1] : vector<4x4xf32> to vector<4xf32>
    %177 = vector.shape_cast %176 : vector<4xf32> to vector<4x1xf32>
    %178 = vector.extract_strided_slice %171 {offsets = [0, 8], sizes = [4, 4], strides = [1, 1]} : vector<4x16xf32> to vector<4x4xf32>
    %cst_73 = arith.constant dense<0xFF800000> : vector<4xf32>
    %179 = vector.multi_reduction <maximumf>, %178, %cst_73 [1] : vector<4x4xf32> to vector<4xf32>
    %180 = vector.shape_cast %179 : vector<4xf32> to vector<4x1xf32>
    %181 = vector.extract_strided_slice %171 {offsets = [0, 12], sizes = [4, 4], strides = [1, 1]} : vector<4x16xf32> to vector<4x4xf32>
    %cst_74 = arith.constant dense<0xFF800000> : vector<4xf32>
    %182 = vector.multi_reduction <maximumf>, %181, %cst_74 [1] : vector<4x4xf32> to vector<4xf32>
    %183 = vector.shape_cast %182 : vector<4xf32> to vector<4x1xf32>
    %184 = tpu.concatenate %174, %177, %180, %183 in 1 : vector<4x1xf32>, vector<4x1xf32>, vector<4x1xf32>, vector<4x1xf32> -> vector<4x4xf32>
    %185 = tpu.concatenate %139, %154, %169, %184 in 1 : vector<4x4xf32>, vector<4x4xf32>, vector<4x4xf32>, vector<4x4xf32> -> vector<4x16xf32>
    %186 = vector.extract_strided_slice %185 {offsets = [0, 0], sizes = [1, 16], strides = [1, 1]} : vector<4x16xf32> to vector<1x16xf32>
    %c0_75 = arith.constant 0 : index
    %c0_76 = arith.constant 0 : index
    %c56 = arith.constant 56 : index
    %187 = vector.load %arg2[%c0_75, %c0_76, %c56] : memref<1x1x364xf32, #tpu.memory_space<vmem>>, vector<1x1x16xf32>
    %188 = vector.shape_cast %187 : vector<1x1x16xf32> to vector<1x16xf32>
    %189 = vector.shape_cast %186 : vector<1x16xf32> to vector<1x1x16xf32>
    tpu.vector_store %arg2[%c0_75, %c0_76, %c56], %189 {strides = array<i32>} : memref<1x1x364xf32, #tpu.memory_space<vmem>>, vector<1x1x16xf32>,
    %190 = vector.extract_strided_slice %185 {offsets = [1, 0], sizes = [1, 16], strides = [1, 1]} : vector<4x16xf32> to vector<1x16xf32>
    %c0_77 = arith.constant 0 : index
    %c0_78 = arith.constant 0 : index
    %c72 = arith.constant 72 : index
    %191 = vector.load %arg2[%c0_77, %c0_78, %c72] : memref<1x1x364xf32, #tpu.memory_space<vmem>>, vector<1x1x16xf32>
    %192 = vector.shape_cast %191 : vector<1x1x16xf32> to vector<1x16xf32>
    %193 = vector.shape_cast %190 : vector<1x16xf32> to vector<1x1x16xf32>
    tpu.vector_store %arg2[%c0_77, %c0_78, %c72], %193 {strides = array<i32>} : memref<1x1x364xf32, #tpu.memory_space<vmem>>, vector<1x1x16xf32>,
    %194 = vector.extract_strided_slice %185 {offsets = [2, 0], sizes = [1, 16], strides = [1, 1]} : vector<4x16xf32> to vector<1x16xf32>
    %c0_79 = arith.constant 0 : index
    %c0_80 = arith.constant 0 : index
    %c88 = arith.constant 88 : index
    %195 = vector.load %arg2[%c0_79, %c0_80, %c88] : memref<1x1x364xf32, #tpu.memory_space<vmem>>, vector<1x1x16xf32>
    %196 = vector.shape_cast %195 : vector<1x1x16xf32> to vector<1x16xf32>
    %197 = vector.shape_cast %194 : vector<1x16xf32> to vector<1x1x16xf32>
    tpu.vector_store %arg2[%c0_79, %c0_80, %c88], %197 {strides = array<i32>} : memref<1x1x364xf32, #tpu.memory_space<vmem>>, vector<1x1x16xf32>,
    %198 = vector.extract_strided_slice %185 {offsets = [3, 0], sizes = [1, 16], strides = [1, 1]} : vector<4x16xf32> to vector<1x16xf32>
    %c0_81 = arith.constant 0 : index
    %c0_82 = arith.constant 0 : index
    %c104 = arith.constant 104 : index
    %199 = vector.load %arg2[%c0_81, %c0_82, %c104] : memref<1x1x364xf32, #tpu.memory_space<vmem>>, vector<1x1x16xf32>
    %200 = vector.shape_cast %199 : vector<1x1x16xf32> to vector<1x16xf32>
    %201 = vector.shape_cast %198 : vector<1x16xf32> to vector<1x1x16xf32>
    tpu.vector_store %arg2[%c0_81, %c0_82, %c104], %201 {strides = array<i32>} : memref<1x1x364xf32, #tpu.memory_space<vmem>>, vector<1x1x16xf32>,
    %202 = vector.extract_strided_slice %1 {offsets = [0, 0, 0], sizes = [4, 2, 16], strides = [1, 1, 1]} : vector<4x16x16xf32> to vector<4x2x16xf32>
    %cst_83 = arith.constant dense<0xFF800000> : vector<4x16xf32>
    %203 = vector.multi_reduction <maximumf>, %202, %cst_83 [1] : vector<4x2x16xf32> to vector<4x16xf32>
    %cst_84 = arith.constant 0.000000e+00 : f32
    %204 = vector.broadcast %cst_84 : f32 to vector<4x16xf32>
    %205 = arith.maximumf %203, %204 : vector<4x16xf32>
    %206 = vector.extract_strided_slice %205 {offsets = [0, 0], sizes = [4, 2], strides = [1, 1]} : vector<4x16xf32> to vector<4x2xf32>
    %cst_85 = arith.constant dense<0xFF800000> : vector<4xf32>
    %207 = vector.multi_reduction <maximumf>, %206, %cst_85 [1] : vector<4x2xf32> to vector<4xf32>
    %208 = vector.shape_cast %207 : vector<4xf32> to vector<4x1xf32>
    %cst_86 = arith.constant 0.000000e+00 : f32
    %209 = vector.broadcast %cst_86 : f32 to vector<4x1xf32>
    %210 = arith.maximumf %208, %209 : vector<4x1xf32>
    %211 = vector.extract_strided_slice %205 {offsets = [0, 2], sizes = [4, 4], strides = [1, 1]} : vector<4x16xf32> to vector<4x4xf32>
    %cst_87 = arith.constant dense<0xFF800000> : vector<4xf32>
    %212 = vector.multi_reduction <maximumf>, %211, %cst_87 [1] : vector<4x4xf32> to vector<4xf32>
    %213 = vector.shape_cast %212 : vector<4xf32> to vector<4x1xf32>
    %214 = vector.extract_strided_slice %205 {offsets = [0, 6], sizes = [4, 4], strides = [1, 1]} : vector<4x16xf32> to vector<4x4xf32>
    %cst_88 = arith.constant dense<0xFF800000> : vector<4xf32>
    %215 = vector.multi_reduction <maximumf>, %214, %cst_88 [1] : vector<4x4xf32> to vector<4xf32>
    %216 = vector.shape_cast %215 : vector<4xf32> to vector<4x1xf32>
    %217 = vector.extract_strided_slice %205 {offsets = [0, 10], sizes = [4, 4], strides = [1, 1]} : vector<4x16xf32> to vector<4x4xf32>
    %cst_89 = arith.constant dense<0xFF800000> : vector<4xf32>
    %218 = vector.multi_reduction <maximumf>, %217, %cst_89 [1] : vector<4x4xf32> to vector<4xf32>
    %219 = vector.shape_cast %218 : vector<4xf32> to vector<4x1xf32>
    %220 = vector.extract_strided_slice %205 {offsets = [0, 14], sizes = [4, 2], strides = [1, 1]} : vector<4x16xf32> to vector<4x2xf32>
    %cst_90 = arith.constant dense<0xFF800000> : vector<4xf32>
    %221 = vector.multi_reduction <maximumf>, %220, %cst_90 [1] : vector<4x2xf32> to vector<4xf32>
    %222 = vector.shape_cast %221 : vector<4xf32> to vector<4x1xf32>
    %cst_91 = arith.constant 0.000000e+00 : f32
    %223 = vector.broadcast %cst_91 : f32 to vector<4x1xf32>
    %224 = arith.maximumf %222, %223 : vector<4x1xf32>
    %225 = tpu.concatenate %210, %213, %216, %219, %224 in 1 : vector<4x1xf32>, vector<4x1xf32>, vector<4x1xf32>, vector<4x1xf32>, vector<4x1xf32> -> vector<4x5xf32>
    %226 = vector.extract_strided_slice %1 {offsets = [0, 2, 0], sizes = [4, 4, 16], strides = [1, 1, 1]} : vector<4x16x16xf32> to vector<4x4x16xf32>
    %cst_92 = arith.constant dense<0xFF800000> : vector<4x16xf32>
    %227 = vector.multi_reduction <maximumf>, %226, %cst_92 [1] : vector<4x4x16xf32> to vector<4x16xf32>
    %228 = vector.extract_strided_slice %227 {offsets = [0, 0], sizes = [4, 2], strides = [1, 1]} : vector<4x16xf32> to vector<4x2xf32>
    %cst_93 = arith.constant dense<0xFF800000> : vector<4xf32>
    %229 = vector.multi_reduction <maximumf>, %228, %cst_93 [1] : vector<4x2xf32> to vector<4xf32>
    %230 = vector.shape_cast %229 : vector<4xf32> to vector<4x1xf32>
    %cst_94 = arith.constant 0.000000e+00 : f32
    %231 = vector.broadcast %cst_94 : f32 to vector<4x1xf32>
    %232 = arith.maximumf %230, %231 : vector<4x1xf32>
    %233 = vector.extract_strided_slice %227 {offsets = [0, 2], sizes = [4, 4], strides = [1, 1]} : vector<4x16xf32> to vector<4x4xf32>
    %cst_95 = arith.constant dense<0xFF800000> : vector<4xf32>
    %234 = vector.multi_reduction <maximumf>, %233, %cst_95 [1] : vector<4x4xf32> to vector<4xf32>
    %235 = vector.shape_cast %234 : vector<4xf32> to vector<4x1xf32>
    %236 = vector.extract_strided_slice %227 {offsets = [0, 6], sizes = [4, 4], strides = [1, 1]} : vector<4x16xf32> to vector<4x4xf32>
    %cst_96 = arith.constant dense<0xFF800000> : vector<4xf32>
    %237 = vector.multi_reduction <maximumf>, %236, %cst_96 [1] : vector<4x4xf32> to vector<4xf32>
    %238 = vector.shape_cast %237 : vector<4xf32> to vector<4x1xf32>
    %239 = vector.extract_strided_slice %227 {offsets = [0, 10], sizes = [4, 4], strides = [1, 1]} : vector<4x16xf32> to vector<4x4xf32>
    %cst_97 = arith.constant dense<0xFF800000> : vector<4xf32>
    %240 = vector.multi_reduction <maximumf>, %239, %cst_97 [1] : vector<4x4xf32> to vector<4xf32>
    %241 = vector.shape_cast %240 : vector<4xf32> to vector<4x1xf32>
    %242 = vector.extract_strided_slice %227 {offsets = [0, 14], sizes = [4, 2], strides = [1, 1]} : vector<4x16xf32> to vector<4x2xf32>
    %cst_98 = arith.constant dense<0xFF800000> : vector<4xf32>
    %243 = vector.multi_reduction <maximumf>, %242, %cst_98 [1] : vector<4x2xf32> to vector<4xf32>
    %244 = vector.shape_cast %243 : vector<4xf32> to vector<4x1xf32>
    %cst_99 = arith.constant 0.000000e+00 : f32
    %245 = vector.broadcast %cst_99 : f32 to vector<4x1xf32>
    %246 = arith.maximumf %244, %245 : vector<4x1xf32>
    %247 = tpu.concatenate %232, %235, %238, %241, %246 in 1 : vector<4x1xf32>, vector<4x1xf32>, vector<4x1xf32>, vector<4x1xf32>, vector<4x1xf32> -> vector<4x5xf32>
    %248 = vector.extract_strided_slice %1 {offsets = [0, 6, 0], sizes = [4, 4, 16], strides = [1, 1, 1]} : vector<4x16x16xf32> to vector<4x4x16xf32>
    %cst_100 = arith.constant dense<0xFF800000> : vector<4x16xf32>
    %249 = vector.multi_reduction <maximumf>, %248, %cst_100 [1] : vector<4x4x16xf32> to vector<4x16xf32>
    %250 = vector.extract_strided_slice %249 {offsets = [0, 0], sizes = [4, 2], strides = [1, 1]} : vector<4x16xf32> to vector<4x2xf32>
    %cst_101 = arith.constant dense<0xFF800000> : vector<4xf32>
    %251 = vector.multi_reduction <maximumf>, %250, %cst_101 [1] : vector<4x2xf32> to vector<4xf32>
    %252 = vector.shape_cast %251 : vector<4xf32> to vector<4x1xf32>
    %cst_102 = arith.constant 0.000000e+00 : f32
    %253 = vector.broadcast %cst_102 : f32 to vector<4x1xf32>
    %254 = arith.maximumf %252, %253 : vector<4x1xf32>
    %255 = vector.extract_strided_slice %249 {offsets = [0, 2], sizes = [4, 4], strides = [1, 1]} : vector<4x16xf32> to vector<4x4xf32>
    %cst_103 = arith.constant dense<0xFF800000> : vector<4xf32>
    %256 = vector.multi_reduction <maximumf>, %255, %cst_103 [1] : vector<4x4xf32> to vector<4xf32>
    %257 = vector.shape_cast %256 : vector<4xf32> to vector<4x1xf32>
    %258 = vector.extract_strided_slice %249 {offsets = [0, 6], sizes = [4, 4], strides = [1, 1]} : vector<4x16xf32> to vector<4x4xf32>
    %cst_104 = arith.constant dense<0xFF800000> : vector<4xf32>
    %259 = vector.multi_reduction <maximumf>, %258, %cst_104 [1] : vector<4x4xf32> to vector<4xf32>
    %260 = vector.shape_cast %259 : vector<4xf32> to vector<4x1xf32>
    %261 = vector.extract_strided_slice %249 {offsets = [0, 10], sizes = [4, 4], strides = [1, 1]} : vector<4x16xf32> to vector<4x4xf32>
    %cst_105 = arith.constant dense<0xFF800000> : vector<4xf32>
    %262 = vector.multi_reduction <maximumf>, %261, %cst_105 [1] : vector<4x4xf32> to vector<4xf32>
    %263 = vector.shape_cast %262 : vector<4xf32> to vector<4x1xf32>
    %264 = vector.extract_strided_slice %249 {offsets = [0, 14], sizes = [4, 2], strides = [1, 1]} : vector<4x16xf32> to vector<4x2xf32>
    %cst_106 = arith.constant dense<0xFF800000> : vector<4xf32>
    %265 = vector.multi_reduction <maximumf>, %264, %cst_106 [1] : vector<4x2xf32> to vector<4xf32>
    %266 = vector.shape_cast %265 : vector<4xf32> to vector<4x1xf32>
    %cst_107 = arith.constant 0.000000e+00 : f32
    %267 = vector.broadcast %cst_107 : f32 to vector<4x1xf32>
    %268 = arith.maximumf %266, %267 : vector<4x1xf32>
    %269 = tpu.concatenate %254, %257, %260, %263, %268 in 1 : vector<4x1xf32>, vector<4x1xf32>, vector<4x1xf32>, vector<4x1xf32>, vector<4x1xf32> -> vector<4x5xf32>
    %270 = vector.extract_strided_slice %1 {offsets = [0, 10, 0], sizes = [4, 4, 16], strides = [1, 1, 1]} : vector<4x16x16xf32> to vector<4x4x16xf32>
    %cst_108 = arith.constant dense<0xFF800000> : vector<4x16xf32>
    %271 = vector.multi_reduction <maximumf>, %270, %cst_108 [1] : vector<4x4x16xf32> to vector<4x16xf32>
    %272 = vector.extract_strided_slice %271 {offsets = [0, 0], sizes = [4, 2], strides = [1, 1]} : vector<4x16xf32> to vector<4x2xf32>
    %cst_109 = arith.constant dense<0xFF800000> : vector<4xf32>
    %273 = vector.multi_reduction <maximumf>, %272, %cst_109 [1] : vector<4x2xf32> to vector<4xf32>
    %274 = vector.shape_cast %273 : vector<4xf32> to vector<4x1xf32>
    %cst_110 = arith.constant 0.000000e+00 : f32
    %275 = vector.broadcast %cst_110 : f32 to vector<4x1xf32>
    %276 = arith.maximumf %274, %275 : vector<4x1xf32>
    %277 = vector.extract_strided_slice %271 {offsets = [0, 2], sizes = [4, 4], strides = [1, 1]} : vector<4x16xf32> to vector<4x4xf32>
    %cst_111 = arith.constant dense<0xFF800000> : vector<4xf32>
    %278 = vector.multi_reduction <maximumf>, %277, %cst_111 [1] : vector<4x4xf32> to vector<4xf32>
    %279 = vector.shape_cast %278 : vector<4xf32> to vector<4x1xf32>
    %280 = vector.extract_strided_slice %271 {offsets = [0, 6], sizes = [4, 4], strides = [1, 1]} : vector<4x16xf32> to vector<4x4xf32>
    %cst_112 = arith.constant dense<0xFF800000> : vector<4xf32>
    %281 = vector.multi_reduction <maximumf>, %280, %cst_112 [1] : vector<4x4xf32> to vector<4xf32>
    %282 = vector.shape_cast %281 : vector<4xf32> to vector<4x1xf32>
    %283 = vector.extract_strided_slice %271 {offsets = [0, 10], sizes = [4, 4], strides = [1, 1]} : vector<4x16xf32> to vector<4x4xf32>
    %cst_113 = arith.constant dense<0xFF800000> : vector<4xf32>
    %284 = vector.multi_reduction <maximumf>, %283, %cst_113 [1] : vector<4x4xf32> to vector<4xf32>
    %285 = vector.shape_cast %284 : vector<4xf32> to vector<4x1xf32>
    %286 = vector.extract_strided_slice %271 {offsets = [0, 14], sizes = [4, 2], strides = [1, 1]} : vector<4x16xf32> to vector<4x2xf32>
    %cst_114 = arith.constant dense<0xFF800000> : vector<4xf32>
    %287 = vector.multi_reduction <maximumf>, %286, %cst_114 [1] : vector<4x2xf32> to vector<4xf32>
    %288 = vector.shape_cast %287 : vector<4xf32> to vector<4x1xf32>
    %cst_115 = arith.constant 0.000000e+00 : f32
    %289 = vector.broadcast %cst_115 : f32 to vector<4x1xf32>
    %290 = arith.maximumf %288, %289 : vector<4x1xf32>
    %291 = tpu.concatenate %276, %279, %282, %285, %290 in 1 : vector<4x1xf32>, vector<4x1xf32>, vector<4x1xf32>, vector<4x1xf32>, vector<4x1xf32> -> vector<4x5xf32>
    %292 = vector.extract_strided_slice %1 {offsets = [0, 14, 0], sizes = [4, 2, 16], strides = [1, 1, 1]} : vector<4x16x16xf32> to vector<4x2x16xf32>
    %cst_116 = arith.constant dense<0xFF800000> : vector<4x16xf32>
    %293 = vector.multi_reduction <maximumf>, %292, %cst_116 [1] : vector<4x2x16xf32> to vector<4x16xf32>
    %cst_117 = arith.constant 0.000000e+00 : f32
    %294 = vector.broadcast %cst_117 : f32 to vector<4x16xf32>
    %295 = arith.maximumf %293, %294 : vector<4x16xf32>
    %296 = vector.extract_strided_slice %295 {offsets = [0, 0], sizes = [4, 2], strides = [1, 1]} : vector<4x16xf32> to vector<4x2xf32>
    %cst_118 = arith.constant dense<0xFF800000> : vector<4xf32>
    %297 = vector.multi_reduction <maximumf>, %296, %cst_118 [1] : vector<4x2xf32> to vector<4xf32>
    %298 = vector.shape_cast %297 : vector<4xf32> to vector<4x1xf32>
    %cst_119 = arith.constant 0.000000e+00 : f32
    %299 = vector.broadcast %cst_119 : f32 to vector<4x1xf32>
    %300 = arith.maximumf %298, %299 : vector<4x1xf32>
    %301 = vector.extract_strided_slice %295 {offsets = [0, 2], sizes = [4, 4], strides = [1, 1]} : vector<4x16xf32> to vector<4x4xf32>
    %cst_120 = arith.constant dense<0xFF800000> : vector<4xf32>
    %302 = vector.multi_reduction <maximumf>, %301, %cst_120 [1] : vector<4x4xf32> to vector<4xf32>
    %303 = vector.shape_cast %302 : vector<4xf32> to vector<4x1xf32>
    %304 = vector.extract_strided_slice %295 {offsets = [0, 6], sizes = [4, 4], strides = [1, 1]} : vector<4x16xf32> to vector<4x4xf32>
    %cst_121 = arith.constant dense<0xFF800000> : vector<4xf32>
    %305 = vector.multi_reduction <maximumf>, %304, %cst_121 [1] : vector<4x4xf32> to vector<4xf32>
    %306 = vector.shape_cast %305 : vector<4xf32> to vector<4x1xf32>
    %307 = vector.extract_strided_slice %295 {offsets = [0, 10], sizes = [4, 4], strides = [1, 1]} : vector<4x16xf32> to vector<4x4xf32>
    %cst_122 = arith.constant dense<0xFF800000> : vector<4xf32>
    %308 = vector.multi_reduction <maximumf>, %307, %cst_122 [1] : vector<4x4xf32> to vector<4xf32>
    %309 = vector.shape_cast %308 : vector<4xf32> to vector<4x1xf32>
    %310 = vector.extract_strided_slice %295 {offsets = [0, 14], sizes = [4, 2], strides = [1, 1]} : vector<4x16xf32> to vector<4x2xf32>
    %cst_123 = arith.constant dense<0xFF800000> : vector<4xf32>
    %311 = vector.multi_reduction <maximumf>, %310, %cst_123 [1] : vector<4x2xf32> to vector<4xf32>
    %312 = vector.shape_cast %311 : vector<4xf32> to vector<4x1xf32>
    %cst_124 = arith.constant 0.000000e+00 : f32
    %313 = vector.broadcast %cst_124 : f32 to vector<4x1xf32>
    %314 = arith.maximumf %312, %313 : vector<4x1xf32>
    %315 = tpu.concatenate %300, %303, %306, %309, %314 in 1 : vector<4x1xf32>, vector<4x1xf32>, vector<4x1xf32>, vector<4x1xf32>, vector<4x1xf32> -> vector<4x5xf32>
    %316 = tpu.concatenate %225, %247, %269, %291, %315 in 1 : vector<4x5xf32>, vector<4x5xf32>, vector<4x5xf32>, vector<4x5xf32>, vector<4x5xf32> -> vector<4x25xf32>
    %317 = vector.extract_strided_slice %316 {offsets = [0, 0], sizes = [1, 25], strides = [1, 1]} : vector<4x25xf32> to vector<1x25xf32>
    %c0_125 = arith.constant 0 : index
    %c0_126 = arith.constant 0 : index
    %c120 = arith.constant 120 : index
    %318 = vector.load %arg2[%c0_125, %c0_126, %c120] : memref<1x1x364xf32, #tpu.memory_space<vmem>>, vector<1x1x25xf32>
    %319 = vector.shape_cast %318 : vector<1x1x25xf32> to vector<1x25xf32>
    %320 = vector.shape_cast %317 : vector<1x25xf32> to vector<1x1x25xf32>
    tpu.vector_store %arg2[%c0_125, %c0_126, %c120], %320 {strides = array<i32>} : memref<1x1x364xf32, #tpu.memory_space<vmem>>, vector<1x1x25xf32>,
    %321 = vector.extract_strided_slice %316 {offsets = [1, 0], sizes = [1, 25], strides = [1, 1]} : vector<4x25xf32> to vector<1x25xf32>
    %c0_127 = arith.constant 0 : index
    %c0_128 = arith.constant 0 : index
    %c145 = arith.constant 145 : index
    %322 = vector.load %arg2[%c0_127, %c0_128, %c145] : memref<1x1x364xf32, #tpu.memory_space<vmem>>, vector<1x1x25xf32>
    %323 = vector.shape_cast %322 : vector<1x1x25xf32> to vector<1x25xf32>
    %324 = vector.shape_cast %321 : vector<1x25xf32> to vector<1x1x25xf32>
    tpu.vector_store %arg2[%c0_127, %c0_128, %c145], %324 {strides = array<i32>} : memref<1x1x364xf32, #tpu.memory_space<vmem>>, vector<1x1x25xf32>,
    %325 = vector.extract_strided_slice %316 {offsets = [2, 0], sizes = [1, 25], strides = [1, 1]} : vector<4x25xf32> to vector<1x25xf32>
    %c0_129 = arith.constant 0 : index
    %c0_130 = arith.constant 0 : index
    %c170 = arith.constant 170 : index
    %326 = vector.load %arg2[%c0_129, %c0_130, %c170] : memref<1x1x364xf32, #tpu.memory_space<vmem>>, vector<1x1x25xf32>
    %327 = vector.shape_cast %326 : vector<1x1x25xf32> to vector<1x25xf32>
    %328 = vector.shape_cast %325 : vector<1x25xf32> to vector<1x1x25xf32>
    tpu.vector_store %arg2[%c0_129, %c0_130, %c170], %328 {strides = array<i32>} : memref<1x1x364xf32, #tpu.memory_space<vmem>>, vector<1x1x25xf32>,
    %329 = vector.extract_strided_slice %316 {offsets = [3, 0], sizes = [1, 25], strides = [1, 1]} : vector<4x25xf32> to vector<1x25xf32>
    %c0_131 = arith.constant 0 : index
    %c0_132 = arith.constant 0 : index
    %c195 = arith.constant 195 : index
    %330 = vector.load %arg2[%c0_131, %c0_132, %c195] : memref<1x1x364xf32, #tpu.memory_space<vmem>>, vector<1x1x25xf32>
    %331 = vector.shape_cast %330 : vector<1x1x25xf32> to vector<1x25xf32>
    %332 = vector.shape_cast %329 : vector<1x25xf32> to vector<1x1x25xf32>
    tpu.vector_store %arg2[%c0_131, %c0_132, %c195], %332 {strides = array<i32>} : memref<1x1x364xf32, #tpu.memory_space<vmem>>, vector<1x1x25xf32>,
    %333 = vector.extract_strided_slice %1 {offsets = [0, 0, 0], sizes = [4, 2, 16], strides = [1, 1, 1]} : vector<4x16x16xf32> to vector<4x2x16xf32>
    %cst_133 = arith.constant dense<0xFF800000> : vector<4x16xf32>
    %334 = vector.multi_reduction <maximumf>, %333, %cst_133 [1] : vector<4x2x16xf32> to vector<4x16xf32>
    %cst_134 = arith.constant 0.000000e+00 : f32
    %335 = vector.broadcast %cst_134 : f32 to vector<4x16xf32>
    %336 = arith.maximumf %334, %335 : vector<4x16xf32>
    %337 = vector.extract_strided_slice %336 {offsets = [0, 0], sizes = [4, 2], strides = [1, 1]} : vector<4x16xf32> to vector<4x2xf32>
    %cst_135 = arith.constant dense<0xFF800000> : vector<4xf32>
    %338 = vector.multi_reduction <maximumf>, %337, %cst_135 [1] : vector<4x2xf32> to vector<4xf32>
    %339 = vector.shape_cast %338 : vector<4xf32> to vector<4x1xf32>
    %cst_136 = arith.constant 0.000000e+00 : f32
    %340 = vector.broadcast %cst_136 : f32 to vector<4x1xf32>
    %341 = arith.maximumf %339, %340 : vector<4x1xf32>
    %342 = vector.extract_strided_slice %336 {offsets = [0, 2], sizes = [4, 3], strides = [1, 1]} : vector<4x16xf32> to vector<4x3xf32>
    %cst_137 = arith.constant dense<0xFF800000> : vector<4xf32>
    %343 = vector.multi_reduction <maximumf>, %342, %cst_137 [1] : vector<4x3xf32> to vector<4xf32>
    %344 = vector.shape_cast %343 : vector<4xf32> to vector<4x1xf32>
    %345 = vector.extract_strided_slice %336 {offsets = [0, 5], sizes = [4, 3], strides = [1, 1]} : vector<4x16xf32> to vector<4x3xf32>
    %cst_138 = arith.constant dense<0xFF800000> : vector<4xf32>
    %346 = vector.multi_reduction <maximumf>, %345, %cst_138 [1] : vector<4x3xf32> to vector<4xf32>
    %347 = vector.shape_cast %346 : vector<4xf32> to vector<4x1xf32>
    %348 = vector.extract_strided_slice %336 {offsets = [0, 8], sizes = [4, 3], strides = [1, 1]} : vector<4x16xf32> to vector<4x3xf32>
    %cst_139 = arith.constant dense<0xFF800000> : vector<4xf32>
    %349 = vector.multi_reduction <maximumf>, %348, %cst_139 [1] : vector<4x3xf32> to vector<4xf32>
    %350 = vector.shape_cast %349 : vector<4xf32> to vector<4x1xf32>
    %351 = vector.extract_strided_slice %336 {offsets = [0, 11], sizes = [4, 3], strides = [1, 1]} : vector<4x16xf32> to vector<4x3xf32>
    %cst_140 = arith.constant dense<0xFF800000> : vector<4xf32>
    %352 = vector.multi_reduction <maximumf>, %351, %cst_140 [1] : vector<4x3xf32> to vector<4xf32>
    %353 = vector.shape_cast %352 : vector<4xf32> to vector<4x1xf32>
    %354 = vector.extract_strided_slice %336 {offsets = [0, 14], sizes = [4, 2], strides = [1, 1]} : vector<4x16xf32> to vector<4x2xf32>
    %cst_141 = arith.constant dense<0xFF800000> : vector<4xf32>
    %355 = vector.multi_reduction <maximumf>, %354, %cst_141 [1] : vector<4x2xf32> to vector<4xf32>
    %356 = vector.shape_cast %355 : vector<4xf32> to vector<4x1xf32>
    %cst_142 = arith.constant 0.000000e+00 : f32
    %357 = vector.broadcast %cst_142 : f32 to vector<4x1xf32>
    %358 = arith.maximumf %356, %357 : vector<4x1xf32>
    %359 = tpu.concatenate %341, %344, %347, %350, %353, %358 in 1 : vector<4x1xf32>, vector<4x1xf32>, vector<4x1xf32>, vector<4x1xf32>, vector<4x1xf32>, vector<4x1xf32> -> vector<4x6xf32>
    %360 = vector.extract_strided_slice %1 {offsets = [0, 2, 0], sizes = [4, 3, 16], strides = [1, 1, 1]} : vector<4x16x16xf32> to vector<4x3x16xf32>
    %cst_143 = arith.constant dense<0xFF800000> : vector<4x16xf32>
    %361 = vector.multi_reduction <maximumf>, %360, %cst_143 [1] : vector<4x3x16xf32> to vector<4x16xf32>
    %362 = vector.extract_strided_slice %361 {offsets = [0, 0], sizes = [4, 2], strides = [1, 1]} : vector<4x16xf32> to vector<4x2xf32>
    %cst_144 = arith.constant dense<0xFF800000> : vector<4xf32>
    %363 = vector.multi_reduction <maximumf>, %362, %cst_144 [1] : vector<4x2xf32> to vector<4xf32>
    %364 = vector.shape_cast %363 : vector<4xf32> to vector<4x1xf32>
    %cst_145 = arith.constant 0.000000e+00 : f32
    %365 = vector.broadcast %cst_145 : f32 to vector<4x1xf32>
    %366 = arith.maximumf %364, %365 : vector<4x1xf32>
    %367 = vector.extract_strided_slice %361 {offsets = [0, 2], sizes = [4, 3], strides = [1, 1]} : vector<4x16xf32> to vector<4x3xf32>
    %cst_146 = arith.constant dense<0xFF800000> : vector<4xf32>
    %368 = vector.multi_reduction <maximumf>, %367, %cst_146 [1] : vector<4x3xf32> to vector<4xf32>
    %369 = vector.shape_cast %368 : vector<4xf32> to vector<4x1xf32>
    %370 = vector.extract_strided_slice %361 {offsets = [0, 5], sizes = [4, 3], strides = [1, 1]} : vector<4x16xf32> to vector<4x3xf32>
    %cst_147 = arith.constant dense<0xFF800000> : vector<4xf32>
    %371 = vector.multi_reduction <maximumf>, %370, %cst_147 [1] : vector<4x3xf32> to vector<4xf32>
    %372 = vector.shape_cast %371 : vector<4xf32> to vector<4x1xf32>
    %373 = vector.extract_strided_slice %361 {offsets = [0, 8], sizes = [4, 3], strides = [1, 1]} : vector<4x16xf32> to vector<4x3xf32>
    %cst_148 = arith.constant dense<0xFF800000> : vector<4xf32>
    %374 = vector.multi_reduction <maximumf>, %373, %cst_148 [1] : vector<4x3xf32> to vector<4xf32>
    %375 = vector.shape_cast %374 : vector<4xf32> to vector<4x1xf32>
    %376 = vector.extract_strided_slice %361 {offsets = [0, 11], sizes = [4, 3], strides = [1, 1]} : vector<4x16xf32> to vector<4x3xf32>
    %cst_149 = arith.constant dense<0xFF800000> : vector<4xf32>
    %377 = vector.multi_reduction <maximumf>, %376, %cst_149 [1] : vector<4x3xf32> to vector<4xf32>
    %378 = vector.shape_cast %377 : vector<4xf32> to vector<4x1xf32>
    %379 = vector.extract_strided_slice %361 {offsets = [0, 14], sizes = [4, 2], strides = [1, 1]} : vector<4x16xf32> to vector<4x2xf32>
    %cst_150 = arith.constant dense<0xFF800000> : vector<4xf32>
    %380 = vector.multi_reduction <maximumf>, %379, %cst_150 [1] : vector<4x2xf32> to vector<4xf32>
    %381 = vector.shape_cast %380 : vector<4xf32> to vector<4x1xf32>
    %cst_151 = arith.constant 0.000000e+00 : f32
    %382 = vector.broadcast %cst_151 : f32 to vector<4x1xf32>
    %383 = arith.maximumf %381, %382 : vector<4x1xf32>
    %384 = tpu.concatenate %366, %369, %372, %375, %378, %383 in 1 : vector<4x1xf32>, vector<4x1xf32>, vector<4x1xf32>, vector<4x1xf32>, vector<4x1xf32>, vector<4x1xf32> -> vector<4x6xf32>
    %385 = vector.extract_strided_slice %1 {offsets = [0, 5, 0], sizes = [4, 3, 16], strides = [1, 1, 1]} : vector<4x16x16xf32> to vector<4x3x16xf32>
    %cst_152 = arith.constant dense<0xFF800000> : vector<4x16xf32>
    %386 = vector.multi_reduction <maximumf>, %385, %cst_152 [1] : vector<4x3x16xf32> to vector<4x16xf32>
    %387 = vector.extract_strided_slice %386 {offsets = [0, 0], sizes = [4, 2], strides = [1, 1]} : vector<4x16xf32> to vector<4x2xf32>
    %cst_153 = arith.constant dense<0xFF800000> : vector<4xf32>
    %388 = vector.multi_reduction <maximumf>, %387, %cst_153 [1] : vector<4x2xf32> to vector<4xf32>
    %389 = vector.shape_cast %388 : vector<4xf32> to vector<4x1xf32>
    %cst_154 = arith.constant 0.000000e+00 : f32
    %390 = vector.broadcast %cst_154 : f32 to vector<4x1xf32>
    %391 = arith.maximumf %389, %390 : vector<4x1xf32>
    %392 = vector.extract_strided_slice %386 {offsets = [0, 2], sizes = [4, 3], strides = [1, 1]} : vector<4x16xf32> to vector<4x3xf32>
    %cst_155 = arith.constant dense<0xFF800000> : vector<4xf32>
    %393 = vector.multi_reduction <maximumf>, %392, %cst_155 [1] : vector<4x3xf32> to vector<4xf32>
    %394 = vector.shape_cast %393 : vector<4xf32> to vector<4x1xf32>
    %395 = vector.extract_strided_slice %386 {offsets = [0, 5], sizes = [4, 3], strides = [1, 1]} : vector<4x16xf32> to vector<4x3xf32>
    %cst_156 = arith.constant dense<0xFF800000> : vector<4xf32>
    %396 = vector.multi_reduction <maximumf>, %395, %cst_156 [1] : vector<4x3xf32> to vector<4xf32>
    %397 = vector.shape_cast %396 : vector<4xf32> to vector<4x1xf32>
    %398 = vector.extract_strided_slice %386 {offsets = [0, 8], sizes = [4, 3], strides = [1, 1]} : vector<4x16xf32> to vector<4x3xf32>
    %cst_157 = arith.constant dense<0xFF800000> : vector<4xf32>
    %399 = vector.multi_reduction <maximumf>, %398, %cst_157 [1] : vector<4x3xf32> to vector<4xf32>
    %400 = vector.shape_cast %399 : vector<4xf32> to vector<4x1xf32>
    %401 = vector.extract_strided_slice %386 {offsets = [0, 11], sizes = [4, 3], strides = [1, 1]} : vector<4x16xf32> to vector<4x3xf32>
    %cst_158 = arith.constant dense<0xFF800000> : vector<4xf32>
    %402 = vector.multi_reduction <maximumf>, %401, %cst_158 [1] : vector<4x3xf32> to vector<4xf32>
    %403 = vector.shape_cast %402 : vector<4xf32> to vector<4x1xf32>
    %404 = vector.extract_strided_slice %386 {offsets = [0, 14], sizes = [4, 2], strides = [1, 1]} : vector<4x16xf32> to vector<4x2xf32>
    %cst_159 = arith.constant dense<0xFF800000> : vector<4xf32>
    %405 = vector.multi_reduction <maximumf>, %404, %cst_159 [1] : vector<4x2xf32> to vector<4xf32>
    %406 = vector.shape_cast %405 : vector<4xf32> to vector<4x1xf32>
    %cst_160 = arith.constant 0.000000e+00 : f32
    %407 = vector.broadcast %cst_160 : f32 to vector<4x1xf32>
    %408 = arith.maximumf %406, %407 : vector<4x1xf32>
    %409 = tpu.concatenate %391, %394, %397, %400, %403, %408 in 1 : vector<4x1xf32>, vector<4x1xf32>, vector<4x1xf32>, vector<4x1xf32>, vector<4x1xf32>, vector<4x1xf32> -> vector<4x6xf32>
    %410 = vector.extract_strided_slice %1 {offsets = [0, 8, 0], sizes = [4, 3, 16], strides = [1, 1, 1]} : vector<4x16x16xf32> to vector<4x3x16xf32>
    %cst_161 = arith.constant dense<0xFF800000> : vector<4x16xf32>
    %411 = vector.multi_reduction <maximumf>, %410, %cst_161 [1] : vector<4x3x16xf32> to vector<4x16xf32>
    %412 = vector.extract_strided_slice %411 {offsets = [0, 0], sizes = [4, 2], strides = [1, 1]} : vector<4x16xf32> to vector<4x2xf32>
    %cst_162 = arith.constant dense<0xFF800000> : vector<4xf32>
    %413 = vector.multi_reduction <maximumf>, %412, %cst_162 [1] : vector<4x2xf32> to vector<4xf32>
    %414 = vector.shape_cast %413 : vector<4xf32> to vector<4x1xf32>
    %cst_163 = arith.constant 0.000000e+00 : f32
    %415 = vector.broadcast %cst_163 : f32 to vector<4x1xf32>
    %416 = arith.maximumf %414, %415 : vector<4x1xf32>
    %417 = vector.extract_strided_slice %411 {offsets = [0, 2], sizes = [4, 3], strides = [1, 1]} : vector<4x16xf32> to vector<4x3xf32>
    %cst_164 = arith.constant dense<0xFF800000> : vector<4xf32>
    %418 = vector.multi_reduction <maximumf>, %417, %cst_164 [1] : vector<4x3xf32> to vector<4xf32>
    %419 = vector.shape_cast %418 : vector<4xf32> to vector<4x1xf32>
    %420 = vector.extract_strided_slice %411 {offsets = [0, 5], sizes = [4, 3], strides = [1, 1]} : vector<4x16xf32> to vector<4x3xf32>
    %cst_165 = arith.constant dense<0xFF800000> : vector<4xf32>
    %421 = vector.multi_reduction <maximumf>, %420, %cst_165 [1] : vector<4x3xf32> to vector<4xf32>
    %422 = vector.shape_cast %421 : vector<4xf32> to vector<4x1xf32>
    %423 = vector.extract_strided_slice %411 {offsets = [0, 8], sizes = [4, 3], strides = [1, 1]} : vector<4x16xf32> to vector<4x3xf32>
    %cst_166 = arith.constant dense<0xFF800000> : vector<4xf32>
    %424 = vector.multi_reduction <maximumf>, %423, %cst_166 [1] : vector<4x3xf32> to vector<4xf32>
    %425 = vector.shape_cast %424 : vector<4xf32> to vector<4x1xf32>
    %426 = vector.extract_strided_slice %411 {offsets = [0, 11], sizes = [4, 3], strides = [1, 1]} : vector<4x16xf32> to vector<4x3xf32>
    %cst_167 = arith.constant dense<0xFF800000> : vector<4xf32>
    %427 = vector.multi_reduction <maximumf>, %426, %cst_167 [1] : vector<4x3xf32> to vector<4xf32>
    %428 = vector.shape_cast %427 : vector<4xf32> to vector<4x1xf32>
    %429 = vector.extract_strided_slice %411 {offsets = [0, 14], sizes = [4, 2], strides = [1, 1]} : vector<4x16xf32> to vector<4x2xf32>
    %cst_168 = arith.constant dense<0xFF800000> : vector<4xf32>
    %430 = vector.multi_reduction <maximumf>, %429, %cst_168 [1] : vector<4x2xf32> to vector<4xf32>
    %431 = vector.shape_cast %430 : vector<4xf32> to vector<4x1xf32>
    %cst_169 = arith.constant 0.000000e+00 : f32
    %432 = vector.broadcast %cst_169 : f32 to vector<4x1xf32>
    %433 = arith.maximumf %431, %432 : vector<4x1xf32>
    %434 = tpu.concatenate %416, %419, %422, %425, %428, %433 in 1 : vector<4x1xf32>, vector<4x1xf32>, vector<4x1xf32>, vector<4x1xf32>, vector<4x1xf32>, vector<4x1xf32> -> vector<4x6xf32>
    %435 = vector.extract_strided_slice %1 {offsets = [0, 11, 0], sizes = [4, 3, 16], strides = [1, 1, 1]} : vector<4x16x16xf32> to vector<4x3x16xf32>
    %cst_170 = arith.constant dense<0xFF800000> : vector<4x16xf32>
    %436 = vector.multi_reduction <maximumf>, %435, %cst_170 [1] : vector<4x3x16xf32> to vector<4x16xf32>
    %437 = vector.extract_strided_slice %436 {offsets = [0, 0], sizes = [4, 2], strides = [1, 1]} : vector<4x16xf32> to vector<4x2xf32>
    %cst_171 = arith.constant dense<0xFF800000> : vector<4xf32>
    %438 = vector.multi_reduction <maximumf>, %437, %cst_171 [1] : vector<4x2xf32> to vector<4xf32>
    %439 = vector.shape_cast %438 : vector<4xf32> to vector<4x1xf32>
    %cst_172 = arith.constant 0.000000e+00 : f32
    %440 = vector.broadcast %cst_172 : f32 to vector<4x1xf32>
    %441 = arith.maximumf %439, %440 : vector<4x1xf32>
    %442 = vector.extract_strided_slice %436 {offsets = [0, 2], sizes = [4, 3], strides = [1, 1]} : vector<4x16xf32> to vector<4x3xf32>
    %cst_173 = arith.constant dense<0xFF800000> : vector<4xf32>
    %443 = vector.multi_reduction <maximumf>, %442, %cst_173 [1] : vector<4x3xf32> to vector<4xf32>
    %444 = vector.shape_cast %443 : vector<4xf32> to vector<4x1xf32>
    %445 = vector.extract_strided_slice %436 {offsets = [0, 5], sizes = [4, 3], strides = [1, 1]} : vector<4x16xf32> to vector<4x3xf32>
    %cst_174 = arith.constant dense<0xFF800000> : vector<4xf32>
    %446 = vector.multi_reduction <maximumf>, %445, %cst_174 [1] : vector<4x3xf32> to vector<4xf32>
    %447 = vector.shape_cast %446 : vector<4xf32> to vector<4x1xf32>
    %448 = vector.extract_strided_slice %436 {offsets = [0, 8], sizes = [4, 3], strides = [1, 1]} : vector<4x16xf32> to vector<4x3xf32>
    %cst_175 = arith.constant dense<0xFF800000> : vector<4xf32>
    %449 = vector.multi_reduction <maximumf>, %448, %cst_175 [1] : vector<4x3xf32> to vector<4xf32>
    %450 = vector.shape_cast %449 : vector<4xf32> to vector<4x1xf32>
    %451 = vector.extract_strided_slice %436 {offsets = [0, 11], sizes = [4, 3], strides = [1, 1]} : vector<4x16xf32> to vector<4x3xf32>
    %cst_176 = arith.constant dense<0xFF800000> : vector<4xf32>
    %452 = vector.multi_reduction <maximumf>, %451, %cst_176 [1] : vector<4x3xf32> to vector<4xf32>
    %453 = vector.shape_cast %452 : vector<4xf32> to vector<4x1xf32>
    %454 = vector.extract_strided_slice %436 {offsets = [0, 14], sizes = [4, 2], strides = [1, 1]} : vector<4x16xf32> to vector<4x2xf32>
    %cst_177 = arith.constant dense<0xFF800000> : vector<4xf32>
    %455 = vector.multi_reduction <maximumf>, %454, %cst_177 [1] : vector<4x2xf32> to vector<4xf32>
    %456 = vector.shape_cast %455 : vector<4xf32> to vector<4x1xf32>
    %cst_178 = arith.constant 0.000000e+00 : f32
    %457 = vector.broadcast %cst_178 : f32 to vector<4x1xf32>
    %458 = arith.maximumf %456, %457 : vector<4x1xf32>
    %459 = tpu.concatenate %441, %444, %447, %450, %453, %458 in 1 : vector<4x1xf32>, vector<4x1xf32>, vector<4x1xf32>, vector<4x1xf32>, vector<4x1xf32>, vector<4x1xf32> -> vector<4x6xf32>
    %460 = vector.extract_strided_slice %1 {offsets = [0, 14, 0], sizes = [4, 2, 16], strides = [1, 1, 1]} : vector<4x16x16xf32> to vector<4x2x16xf32>
    %cst_179 = arith.constant dense<0xFF800000> : vector<4x16xf32>
    %461 = vector.multi_reduction <maximumf>, %460, %cst_179 [1] : vector<4x2x16xf32> to vector<4x16xf32>
    %cst_180 = arith.constant 0.000000e+00 : f32
    %462 = vector.broadcast %cst_180 : f32 to vector<4x16xf32>
    %463 = arith.maximumf %461, %462 : vector<4x16xf32>
    %464 = vector.extract_strided_slice %463 {offsets = [0, 0], sizes = [4, 2], strides = [1, 1]} : vector<4x16xf32> to vector<4x2xf32>
    %cst_181 = arith.constant dense<0xFF800000> : vector<4xf32>
    %465 = vector.multi_reduction <maximumf>, %464, %cst_181 [1] : vector<4x2xf32> to vector<4xf32>
    %466 = vector.shape_cast %465 : vector<4xf32> to vector<4x1xf32>
    %cst_182 = arith.constant 0.000000e+00 : f32
    %467 = vector.broadcast %cst_182 : f32 to vector<4x1xf32>
    %468 = arith.maximumf %466, %467 : vector<4x1xf32>
    %469 = vector.extract_strided_slice %463 {offsets = [0, 2], sizes = [4, 3], strides = [1, 1]} : vector<4x16xf32> to vector<4x3xf32>
    %cst_183 = arith.constant dense<0xFF800000> : vector<4xf32>
    %470 = vector.multi_reduction <maximumf>, %469, %cst_183 [1] : vector<4x3xf32> to vector<4xf32>
    %471 = vector.shape_cast %470 : vector<4xf32> to vector<4x1xf32>
    %472 = vector.extract_strided_slice %463 {offsets = [0, 5], sizes = [4, 3], strides = [1, 1]} : vector<4x16xf32> to vector<4x3xf32>
    %cst_184 = arith.constant dense<0xFF800000> : vector<4xf32>
    %473 = vector.multi_reduction <maximumf>, %472, %cst_184 [1] : vector<4x3xf32> to vector<4xf32>
    %474 = vector.shape_cast %473 : vector<4xf32> to vector<4x1xf32>
    %475 = vector.extract_strided_slice %463 {offsets = [0, 8], sizes = [4, 3], strides = [1, 1]} : vector<4x16xf32> to vector<4x3xf32>
    %cst_185 = arith.constant dense<0xFF800000> : vector<4xf32>
    %476 = vector.multi_reduction <maximumf>, %475, %cst_185 [1] : vector<4x3xf32> to vector<4xf32>
    %477 = vector.shape_cast %476 : vector<4xf32> to vector<4x1xf32>
    %478 = vector.extract_strided_slice %463 {offsets = [0, 11], sizes = [4, 3], strides = [1, 1]} : vector<4x16xf32> to vector<4x3xf32>
    %cst_186 = arith.constant dense<0xFF800000> : vector<4xf32>
    %479 = vector.multi_reduction <maximumf>, %478, %cst_186 [1] : vector<4x3xf32> to vector<4xf32>
    %480 = vector.shape_cast %479 : vector<4xf32> to vector<4x1xf32>
    %481 = vector.extract_strided_slice %463 {offsets = [0, 14], sizes = [4, 2], strides = [1, 1]} : vector<4x16xf32> to vector<4x2xf32>
    %cst_187 = arith.constant dense<0xFF800000> : vector<4xf32>
    %482 = vector.multi_reduction <maximumf>, %481, %cst_187 [1] : vector<4x2xf32> to vector<4xf32>
    %483 = vector.shape_cast %482 : vector<4xf32> to vector<4x1xf32>
    %cst_188 = arith.constant 0.000000e+00 : f32
    %484 = vector.broadcast %cst_188 : f32 to vector<4x1xf32>
    %485 = arith.maximumf %483, %484 : vector<4x1xf32>
    %486 = tpu.concatenate %468, %471, %474, %477, %480, %485 in 1 : vector<4x1xf32>, vector<4x1xf32>, vector<4x1xf32>, vector<4x1xf32>, vector<4x1xf32>, vector<4x1xf32> -> vector<4x6xf32>
    %487 = tpu.concatenate %359, %384, %409, %434, %459, %486 in 1 : vector<4x6xf32>, vector<4x6xf32>, vector<4x6xf32>, vector<4x6xf32>, vector<4x6xf32>, vector<4x6xf32> -> vector<4x36xf32>
    %488 = vector.extract_strided_slice %487 {offsets = [0, 0], sizes = [1, 36], strides = [1, 1]} : vector<4x36xf32> to vector<1x36xf32>
    %c0_189 = arith.constant 0 : index
    %c0_190 = arith.constant 0 : index
    %c220 = arith.constant 220 : index
    %489 = vector.load %arg2[%c0_189, %c0_190, %c220] : memref<1x1x364xf32, #tpu.memory_space<vmem>>, vector<1x1x36xf32>
    %490 = vector.shape_cast %489 : vector<1x1x36xf32> to vector<1x36xf32>
    %491 = vector.shape_cast %488 : vector<1x36xf32> to vector<1x1x36xf32>
    tpu.vector_store %arg2[%c0_189, %c0_190, %c220], %491 {strides = array<i32>} : memref<1x1x364xf32, #tpu.memory_space<vmem>>, vector<1x1x36xf32>,
    %492 = vector.extract_strided_slice %487 {offsets = [1, 0], sizes = [1, 36], strides = [1, 1]} : vector<4x36xf32> to vector<1x36xf32>
    %c0_191 = arith.constant 0 : index
    %c0_192 = arith.constant 0 : index
    %c256 = arith.constant 256 : index
    %493 = vector.load %arg2[%c0_191, %c0_192, %c256] : memref<1x1x364xf32, #tpu.memory_space<vmem>>, vector<1x1x36xf32>
    %494 = vector.shape_cast %493 : vector<1x1x36xf32> to vector<1x36xf32>
    %495 = vector.shape_cast %492 : vector<1x36xf32> to vector<1x1x36xf32>
    tpu.vector_store %arg2[%c0_191, %c0_192, %c256], %495 {strides = array<i32>} : memref<1x1x364xf32, #tpu.memory_space<vmem>>, vector<1x1x36xf32>,
    %496 = vector.extract_strided_slice %487 {offsets = [2, 0], sizes = [1, 36], strides = [1, 1]} : vector<4x36xf32> to vector<1x36xf32>
    %c0_193 = arith.constant 0 : index
    %c0_194 = arith.constant 0 : index
    %c292 = arith.constant 292 : index
    %497 = vector.load %arg2[%c0_193, %c0_194, %c292] : memref<1x1x364xf32, #tpu.memory_space<vmem>>, vector<1x1x36xf32>
    %498 = vector.shape_cast %497 : vector<1x1x36xf32> to vector<1x36xf32>
    %499 = vector.shape_cast %496 : vector<1x36xf32> to vector<1x1x36xf32>
    tpu.vector_store %arg2[%c0_193, %c0_194, %c292], %499 {strides = array<i32>} : memref<1x1x364xf32, #tpu.memory_space<vmem>>, vector<1x1x36xf32>,
    %500 = vector.extract_strided_slice %487 {offsets = [3, 0], sizes = [1, 36], strides = [1, 1]} : vector<4x36xf32> to vector<1x36xf32>
    %c0_195 = arith.constant 0 : index
    %c0_196 = arith.constant 0 : index
    %c328 = arith.constant 328 : index
    %501 = vector.load %arg2[%c0_195, %c0_196, %c328] : memref<1x1x364xf32, #tpu.memory_space<vmem>>, vector<1x1x36xf32>
    %502 = vector.shape_cast %501 : vector<1x1x36xf32> to vector<1x36xf32>
    %503 = vector.shape_cast %500 : vector<1x36xf32> to vector<1x1x36xf32>
    tpu.vector_store %arg2[%c0_195, %c0_196, %c328], %503 {strides = array<i32>} : memref<1x1x364xf32, #tpu.memory_space<vmem>>, vector<1x1x36xf32>,
    return
  }
  func.func @transform_0(%arg0: i32) -> (i32, i32, i32, i32) {
    %c0_i32 = arith.constant 0 : i32
    %c0_i32_0 = arith.constant 0 : i32
    %c0_i32_1 = arith.constant 0 : i32
    %c0_i32_2 = arith.constant 0 : i32
    return %arg0, %c0_i32, %c0_i32_0, %c0_i32_1 : i32, i32, i32, i32
  }
  func.func @transform_1(%arg0: i32) -> (i32, i32, i32) {
    %c0_i32 = arith.constant 0 : i32
    %c0_i32_0 = arith.constant 0 : i32
    %c0_i32_1 = arith.constant 0 : i32
    return %arg0, %c0_i32, %c0_i32_0 : i32, i32, i32
  }
}

</mosaic_0001>

<bundles_post_ra>
// kernel: tpu_custom_call.1
= control target key start
LH: loop header
LB: loop body
LE: loop exit
PB: predicated region body
PF: predicated region fallthrough
CT: control target
= control target key end

     0   :  { %6 = vsyncpa [#allocation3], 0  ;;  %s2769_s0 = inlined_call_operand.hbm [shape: f32[2,4,16,16], index: 0, kind: input, shape index: {}]   ;;  %s2770_s1 = inlined_call_operand.hbm [shape: f32[2,1,364], index: 1, kind: output, shape index: {}]  }
   0x1   :  { %8 = vsyncpa [#allocation3 + $0x1], 0 }
   0x2   :  { %9 = vsyncpa [#allocation4], 0 }
   0x3   :  { %11 = vsyncpa [#allocation4 + $0x1], 0  ;;  %s1861_s6 = smov 0   ;;  %s1863_s7 = smov 0  }
   0x4   :  { %s1865_s8 = smov 0   ;;  %s1867_s9 = smov 0  }
   0x5 LB: > { %s1882_s10 = sadd.s32 4294967295, %s1820_s9   ;;  %s1628_s11 = sadd.s32 4294967294, %s1820_s9   ;;  %s1820_s9 = sphi %s1867_s9, %s2849_s9   ;;  %s1816_s8 = sphi %s1865_s8, %s2848_s8   ;;  %s1812_s7 = sphi %s1863_s7, %s2847_s7   ;;  %s1808_s6 = sphi %s1861_s6, %s2846_s6  }
   0x6   : > { %s1886_s12 = sadd.s32 1, %s1820_s9   ;;  %s24_s13 = sadd.s32 1, %s1816_s8 }
   0x7   : > { %s21_s14 = ssub.s32 %s1820_s9, %s1886_s12  ;;  %p31_p0 = scmp.ne.s32.totalorder %s1816_s8, %s1812_s7 }
   0x8   : > { %p22_p1 = scmp.eq.s32.totalorder %s21_s14, 0  ;;  %p32_p2 = scmp.eq.s32.totalorder %s1820_s9, 0 }
   0x9   : > { %p37_p3 = scmp.ne.s32.totalorder %s1812_s7, %s1808_s6  ;;  %p38_p4 = scmp.eq.s32.totalorder %s1882_s10, 0 }
   0xa   : > { %s1898_s15 = scalar_select %p22_p1, %s1816_s8, %s24_s13  }
   0xb   : > { %p1900_p5 = por %p32_p2, %p31_p0  ;;  %p1904_p6 = por %p38_p4, %p37_p3 }
   0xc   : > { %p61_p7 = scmp.eq.s32.totalorder %s1882_s10, 1  ;;  %p67_p8 = scmp.eq.s32.totalorder %s1628_s11, 1 }
   0xd   : > { %p1653_p10 = scmp.lt.s32.totalorder %s1820_s9, 2  ;;  %s87_s20 = sand.u32 1, %s1816_s8  }
   0xe   : > { %p1911_p11 = por %p61_p7, %p31_p0  ;;  %p1915_p12 = por %p67_p8, %p37_p3 }
   0xf   : > { %s1638_s21 = sshll.u32 %s1820_s9, 6  ;;  %s1631_s22 = sshll.u32 %s87_s20, 6 }
  0x10   : > { %s96_s25 = scalar_lea.hbm %s2769_s0, %s1638_s21  ;;  %s91_s27 = scalar_lea.vmem [#allocation2], %s1631_s22 }
  0x11   : > { %s97_s26 = sshll.u32 %s96_s25, 4  ;;  %s99_s28 = sshll.u32 %s91_s27, 4  ;;  %s98_s26 = int_to_ptr.hbm [resolvable:$true] %s97_s26  ;;  %s100_s28 = int_to_ptr.vmem [resolvable:$true] %s99_s28 }
  0x12   : > { %p1926_p13 = pnand %p1653_p10, %p1900_p5  ;;  %p1634_p0 = scmp.ge.s32.totalorder %s1820_s9, 1 }
  0x13   : > { %p107_p1 = scmp.lt.s32.totalorder %s1820_s9, 3  ;;  %s88_s30 = scalar_lea.sflag [#allocation3], %s87_s20 }
  0x14   : > { %s1724_s2 = sshra.s32 %s98_s26, 4  ;;  %p1728_p3 = pneg %p1926_p13  ;;  %s1725_s2 = int_to_ptr.hbm [resolvable:$true] %s1724_s2 }
  0x15   : > { %s1726_s3 = scalar_lea.hbm %s1725_s2, 64  ;;  %s1731_s11 = scalar_lea.hbm %s2769_s0, 128 }
  0x16   : > { %p1727_p2 = scmp.ne.s32.totalorder %s1725_s2, %s1726_s3  ;;  %p1732_p5 = scmp.lt.s32.totalorder %s1725_s2, %s2769_s0 }
  0x17   : > { %p1733_p8 = scmp.lt.s32.totalorder %s1731_s11, %s1726_s3 }
  0x18   : > { %p1729_p4 = pnand %p1728_p3, %p1727_p2 }
  0x19   : > { %p1734_p10 = por %p1733_p8, %p1732_p5 }
  0x1a   : > { %p1730_p7 = pneg %p1729_p4 }
  0x1c   : > { %p1735_p9 = pnand %p1734_p10, %p1730_p7 }
  0x1e   : > { %1738 = shalt.err (!%p1735_p9)
}
  0x1f   : > { %s1822_s16 = smov 128   ;;  %s1823_s20 = smov 8  }
  0x20   : > { %1648 = dma.hbm_to_vmem [thread:$0]  (!%p1926_p13), %s98_s26, 1024, %s100_s28, %s88_s30, %s1822_s16, %s1822_s16, %s1823_s20  }
  0x21   : > { %p108_p2 = pnand %p1634_p0, %p107_p1 }
  0x22   : > { %s1947_s21 = sand.u32 (!%p108_p2), 1, %s1812_s7  }
  0x23   : > { %111 = sbr.rel (%p108_p2) target bundleno = 1258 (0x4ea), region = 24  ;;  %s1635_s22 = sshll.u32 (!%p108_p2), %s1947_s21, 6 }
  0x24   : > { %s114_s23 = scalar_lea.sflag (!%p108_p2), [#allocation3], %s1947_s21  ;;  %s1951_s24 = scalar_lea.vmem (!%p108_p2), [#allocation2], %s1635_s22 }
  0x28   : > { %1799 = dma.done.wait (%p1904_p6), %s114_s23, 1024  }
  0x29   : > { %1801 = vsyncadd (%p1904_p6), %s114_s23, 4294966272  ;;  %vm145_vm0 = vcmask 130048   ;;  %v1958_v0 = vld [vmem:[%s1951_s24] sm:$0xff]  ;;  %v1961_v1 = vld [vmem:[%s1951_s24 + $0x10] sm:$0xff]  ;;  %vm186_vm1 = vcmask 1041409   ;;  %vm188_vm2 = vcmask 1042434  }
  0x2a   : > { %v1964_v2 = vld [vmem:[%s1951_s24 + $0x20] sm:$0xff]  ;;  %v1967_v3 = vld [vmem:[%s1951_s24 + $0x30] sm:$0xff]  ;;  %v1971_v4 = vsel %vm145_vm0, %v1958_v0, -inf  ;;  %v1975_v5 = vsel %vm145_vm0, %v1961_v1, -inf  ;;  %v1982_v7 = vld [vmem:[%s1951_s24 + $0x8] sm:$0xff]  ;;  %vm190_vm3 = vcmask 1043459  }
  0x2b   : > { %v1979_v6 = vsel %vm145_vm0, %v1964_v2, -inf  ;;  %v1985_v8 = vld [vmem:[%s1951_s24 + $0x18] sm:$0xff]  ;;  %v1989_v9 = vsel %vm145_vm0, %v1967_v3, -inf  ;;  %v221_v10 = vrot.slane %v1971_v4, 4  ;;  %v227_v11 = vrot.slane %v1975_v5, 4  ;;  %v1995_v13 = vld [vmem:[%s1951_s24 + $0x28] sm:$0xff] }
  0x2c   : > { %v233_v12 = vrot.slane %v1979_v6, 4  ;;  %v1998_v14 = vld [vmem:[%s1951_s24 + $0x38] sm:$0xff]  ;;  %v239_v15 = vrot.slane %v1989_v9, 4  ;;  %v147_v16 = vsel %vm145_vm0, %v1982_v7, -inf  ;;  %v156_v17 = vsel %vm145_vm0, %v1985_v8, -inf  ;;  %s1824_s17 = smov 2  }
  0x2d   : > { %v165_v18 = vsel %vm145_vm0, %v1995_v13, -inf  ;;  %v222_v19 = vmax.f32 %v1971_v4, %v221_v10  ;;  %v228_v20 = vmax.f32 %v1975_v5, %v227_v11  ;;  %v2012_v22 = vsel %vm145_vm0, %v1998_v14, -inf  ;;  %s1639_s25 = smul.u32 3, %s1947_s21  ;;  %s1825_s27 = smov 3  }
  0x2e   : > { %v234_v21 = vmax.f32 %v1979_v6, %v233_v12  ;;  %v240_v23 = vmax.f32 %v1989_v9, %v239_v15  ;;  %v263_v24 = vrot.slane %v147_v16, 4  ;;  %v269_v25 = vrot.slane %v156_v17, 4  ;;  %s1826_s28 = smov 6   ;;  %s1827_s29 = smov 4  }
  0x2f   : > { %v275_v26 = vrot.slane %v165_v18, 4  ;;  %v223_v27 = vrot.slane %v222_v19, 2  ;;  %v229_v28 = vrot.slane %v228_v20, 2  ;;  %vm257_vm4 = vcmask 126016   ;;  %s2160_s26 = scalar_lea.vmem [#allocation5], %s1639_s25  ;;  %s1828_s30 = smov 8  }
  0x30   : > { %v235_v29 = vrot.slane %v234_v21, 2  ;;  %vm253_vm5 = vcmask 60416   ;;  %v281_v30 = vrot.slane %v2012_v22, 4  ;;  %v241_v31 = vrot.slane %v240_v23, 2  ;;  %s1829_s2 = smov 12   ;;  %s1830_s3 = smov 56  }
  0x31   : > { %v264_v32 = vmax.f32 %v147_v16, %v263_v24  ;;  %v270_v33 = vmax.f32 %v156_v17, %v269_v25  ;;  %v276_v34 = vmax.f32 %v165_v18, %v275_v26  ;;  %v224_v35 = vmax.f32 %v222_v19, %v223_v27  ;;  %s1831_s4 = smov 20   ;;  %s1832_s5 = smov 29  }
  0x32   : > { %v230_v36 = vmax.f32 %v228_v20, %v229_v28  ;;  %v236_v37 = vmax.f32 %v234_v21, %v235_v29  ;;  %v282_v38 = vmax.f32 %v2012_v22, %v281_v30  ;;  %vm346_vm6 = vcmask 126976   ;;  %s1833_s11 = smov 47   ;;  %s1834_s13 = smov 72  }
  0x33   : > { %v242_v39 = vmax.f32 %v240_v23, %v241_v31  ;;  %v265_v40 = vrot.slane %v264_v32, 2  ;;  %v271_v41 = vrot.slane %v270_v33, 2  ;;  %v277_v42 = vrot.slane %v276_v34, 2  ;;  %s1835_s14 = smov 16   ;;  %s1836_s16 = smov 104  }
  0x34   : > { %v225_v43 = vrot.slane %v224_v35, 1  ;;  %v231_v44 = vrot.slane %v230_v36, 1  ;;  %v237_v45 = vrot.slane %v236_v37, 1  ;;  %v283_v46 = vrot.slane %v282_v38, 2  ;;  %s1837_s20 = smov 38   ;;  %s1838_s22 = smov 88  }
  0x35   : > { %v243_v47 = vrot.slane %v242_v39, 1  ;;  %v266_v48 = vmax.f32 %v264_v32, %v265_v40  ;;  %v272_v49 = vmax.f32 %v270_v33, %v271_v41  ;;  %v278_v50 = vmax.f32 %v276_v34, %v277_v42  ;;  %s1839_s23 = smov 10   ;;  %s1842_s25 = smov 18  }
  0x36   : > { %v226_v51 = vmax.f32 %v224_v35, %v225_v43  ;;  %v232_v52 = vmax.f32 %v230_v36, %v231_v44  ;;  %v238_v53 = vmax.f32 %v236_v37, %v237_v45  ;;  %v284_v54 = vmax.f32 %v282_v38, %v283_v46 }
  0x37   : > { %v244_v55 = vmax.f32 %v242_v39, %v243_v47  ;;  %v267_v56 = vrot.slane %v266_v48, 1  ;;  %v273_v57 = vrot.slane %v272_v49, 1  ;;  %v279_v58 = vrot.slane %v278_v50, 1 }
  0x38   : > { %v249_v59 = vsel %vm186_vm1, %v232_v52, %v226_v51  ;;  %v285_v60 = vrot.slane %v284_v54, 1  ;;  %v148_v61 = vmax.f32 %v1971_v4, %v147_v16  ;;  %v157_v62 = vmax.f32 %v1975_v5, %v156_v17 }
  0x39   : > { %v250_v63 = vsel %vm188_vm2, %v238_v53, %v249_v59  ;;  %v268_v10 = vmax.f32 %v266_v48, %v267_v56  ;;  %v274_v11 = vmax.f32 %v272_v49, %v273_v57  ;;  %v280_v12 = vmax.f32 %v278_v50, %v279_v58 }
  0x3a   : > { %v251_v15 = vsel %vm190_vm3, %v244_v55, %v250_v63  ;;  %v286_v19 = vmax.f32 %v284_v54, %v285_v60  ;;  %v149_v20 = vrot.slane %v148_v61, 4  ;;  %v158_v21 = vrot.slane %v157_v62, 4 }
  0x3b   : > { %v258_v23 = vsel %vm257_vm4, %v251_v15, -inf  ;;  %v254_v24 = vsel %vm253_vm5, %v251_v15, -inf  ;;  %v291_v25 = vsel %vm186_vm1, %v274_v11, %v268_v10  ;;  %v166_v4 = vmax.f32 %v1979_v6, %v165_v18 }
  0x3c   : > { %259 = vmax.xlane.f32.xlu1 %v258_v23  ;;  %255 = vmax.xlane.f32.xlu0 %v254_v24  ;;  %v292_v5 = vsel %vm188_vm2, %v280_v12, %v291_v25  ;;  %v150_v16 = vmax.f32 %v148_v61, %v149_v20  ;;  %v159_v17 = vmax.f32 %v157_v62, %v158_v21  ;;  %v347_v29 = vsel %vm346_vm6, %v1958_v0, -inf }
  0x3d   : > { %v293_v26 = vsel %vm190_vm3, %v286_v19, %v292_v5  ;;  %v167_v27 = vrot.slane %v166_v4, 4  ;;  %v175_v28 = vmax.f32 %v1989_v9, %v2012_v22  ;;  %v348_v34 = vrot.slane %v347_v29, 4 }
  0x3e   : > { %v298_v30 = vsel %vm257_vm4, %v293_v26, -inf  ;;  %v295_v31 = vsel %vm253_vm5, %v293_v26, -inf  ;;  %v151_v6 = vrot.slane %v150_v16, 2  ;;  %v160_v18 = vrot.slane %v159_v17, 2 }
  0x3f   : > { %299 = vmax.xlane.f32.xlu2 %v298_v30  ;;  %v168_v32 = vmax.f32 %v166_v4, %v167_v27  ;;  %v176_v33 = vrot.slane %v175_v28, 4  ;;  %v354_v35 = vsel %vm346_vm6, %v1961_v1, -inf  ;;  %vm403_vm7 = vcmask 130053  }
  0x40   : > { %vm405_vm8 = vcmask 124928   ;;  %v152_v36 = vmax.f32 %v150_v16, %v151_v6  ;;  %v161_v9 = vmax.f32 %v159_v17, %v160_v18  ;;  %v355_v22 = vrot.slane %v354_v35, 4 }
  0x41   : > { %v361_v37 = vsel %vm346_vm6, %v1964_v2, -inf  ;;  %v169_v38 = vrot.slane %v168_v32, 2  ;;  %v177_v39 = vmax.f32 %v175_v28, %v176_v33  ;;  %v349_v40 = vmax.f32 %v347_v29, %v348_v34 }
  0x42   : > { %v362_v41 = vrot.slane %v361_v37, 4  ;;  %v153_v42 = vrot.slane %v152_v36, 1  ;;  %v162_v43 = vrot.slane %v161_v9, 1  ;;  %v356_v44 = vmax.f32 %v354_v35, %v355_v22 }
  0x43   : > { %v368_v45 = vsel %vm346_vm6, %v1967_v3, -inf  ;;  %v170_v46 = vmax.f32 %v168_v32, %v169_v38  ;;  %v178_v47 = vrot.slane %v177_v39, 2  ;;  %v350_v48 = vrot.slane %v349_v40, 2 }
  0x44   : > { %v363_v49 = vmax.f32 %v361_v37, %v362_v41  ;;  %296 = vmax.xlane.f32.xlu1 %v295_v31  ;;  %v154_v50 = vmax.f32 %v152_v36, %v153_v42  ;;  %v163_v51 = vmax.f32 %v161_v9, %v162_v43  ;;  %v357_v52 = vrot.slane %v356_v44, 2 }
  0x45   : > { %v369_v53 = vrot.slane %v368_v45, 4  ;;  %v171_v54 = vrot.slane %v170_v46, 1  ;;  %v179_v55 = vmax.f32 %v177_v39, %v178_v47  ;;  %v351_v56 = vmax.f32 %v349_v40, %v350_v48 }
  0x46   : > { %v364_v57 = vrot.slane %v363_v49, 2  ;;  %v187_v58 = vsel %vm186_vm1, %v163_v51, %v154_v50  ;;  %vm193_vm9 = vcmask 125952   ;;  %v358_v59 = vmax.f32 %v356_v44, %v357_v52 }
  0x47   : > { %v370_v60 = vmax.f32 %v368_v45, %v369_v53  ;;  %v172_v61 = vmax.f32 %v170_v46, %v171_v54  ;;  %v180_v62 = vrot.slane %v179_v55, 1  ;;  %v352_v63 = vrot.slane %v351_v56, 1 }
  0x48   : > { %v365_v10 = vmax.f32 %v363_v49, %v364_v57  ;;  %v359_v11 = vrot.slane %v358_v59, 1  ;;  %vm387_vm10 = vcmask 35840   ;;  %vm396_vm11 = vcmask 126040  }
  0x49   : > { %v371_v12 = vrot.slane %v370_v60, 2  ;;  %v181_v15 = vmax.f32 %v179_v55, %v180_v62  ;;  %v189_v19 = vsel %vm188_vm2, %v172_v61, %v187_v58  ;;  %v353_v20 = vmax.f32 %v351_v56, %v352_v63 }
  0x4a   : > { %v366_v21 = vrot.slane %v365_v10, 1  ;;  %v360_v23 = vmax.f32 %v358_v59, %v359_v11  ;;  %v2044_v25 = vsel %vm403_vm7, %v1958_v0, -inf  ;;  %v2048_v4 = vsel %vm405_vm8, %v1982_v7, -inf }
  0x4b   : > { %v372_v24 = vmax.f32 %v370_v60, %v371_v12  ;;  %v191_v5 = vsel %vm190_vm3, %v181_v15, %v189_v19  ;;  %v375_v17 = vmax.f32 %v353_v20, 0.0  ;;  %v407_v26 = vmax.f32 %v2044_v25, %v2048_v4 }
  0x4c   : > { %v367_v16 = vmax.f32 %v365_v10, %v366_v21  ;;  %v194_v27 = vsel %vm193_vm9, %v191_v5, -inf  ;;  %v376_v29 = vmax.f32 %v360_v23, 0.0  ;;  %v2056_v30 = vsel %vm403_vm7, %v1961_v1, -inf }
  0x4d   : > { %v373_v28 = vrot.slane %v372_v24, 1  ;;  %195 = vmax.xlane.f32.xlu0 %v194_v27  ;;  %v408_v6 = vrot.slane %v407_v26, 4  ;;  %v2060_v18 = vsel %vm405_vm8, %v1985_v8, -inf  ;;  %v2064_v32 = vsel %vm403_vm7, %v1964_v2, -inf }
  0x4e   : > { %v377_v31 = vmax.f32 %v367_v16, 0.0  ;;  %v383_v34 = vsel %vm186_vm1, %v376_v29, %v375_v17  ;;  %v416_v35 = vmax.f32 %v2056_v30, %v2060_v18  ;;  %v2071_v36 = vsel %vm405_vm8, %v1995_v13, -inf }
  0x4f   : > { %v374_v33 = vmax.f32 %v372_v24, %v373_v28  ;;  %v409_v22 = vmax.f32 %v407_v26, %v408_v6  ;;  %v425_v37 = vmax.f32 %v2064_v32, %v2071_v36  ;;  %v2078_v38 = vsel %vm403_vm7, %v1967_v3, -inf }
  0x50   : > { %v384_v9 = vsel %vm188_vm2, %v377_v31, %v383_v34  ;;  %vm392_vm12 = vcmask 85032   ;;  %v417_v40 = vrot.slane %v416_v35, 4  ;;  %v2082_v41 = vsel %vm405_vm8, %v1998_v14, -inf }
  0x51   : > { %v378_v39 = vmax.f32 %v374_v33, 0.0  ;;  %v410_v42 = vrot.slane %v409_v22, 2  ;;  %v426_v43 = vrot.slane %v425_v37, 4  ;;  %v434_v44 = vmax.f32 %v2078_v38, %v2082_v41 }
  0x52   : > { %v418_v46 = vmax.f32 %v416_v35, %v417_v40  ;;  %vm462_vm13 = vcmask 130051   ;;  %v566_v62 = vsel %vm193_vm9, %v1958_v0, -inf  ;;  %vm2771_vm14 = vcmask 27648  }
  0x53   : > { %v385_v45 = vsel %vm190_vm3, %v378_v39, %v384_v9  ;;  %v411_v50 = vmax.f32 %v409_v22, %v410_v42  ;;  %v427_v52 = vmax.f32 %v425_v37, %v426_v43  ;;  %v435_v53 = vrot.slane %v434_v44, 4 }
  0x54   : > { %v388_v47 = vsel %vm387_vm10, %v385_v45, -inf  ;;  %v397_v48 = vsel %vm396_vm11, %v385_v45, -inf  ;;  %v393_v49 = vsel %vm392_vm12, %v385_v45, -inf  ;;  %v419_v51 = vrot.slane %v418_v46, 2 }
  0x55   : > { %389 = vmax.xlane.f32.xlu2 %v388_v47  ;;  %394 = vmax.xlane.f32.xlu1 %v393_v49  ;;  %v412_v54 = vrot.slane %v411_v50, 1  ;;  %v428_v56 = vrot.slane %v427_v52, 2  ;;  %v436_v57 = vmax.f32 %v434_v44, %v435_v53  ;;  %v463_v12 = vsel %vm462_vm13, %v1982_v7, -inf }
  0x56   : > { %398 = vmax.xlane.f32.xlu0 %v397_v48  ;;  %v420_v55 = vmax.f32 %v418_v46, %v419_v51  ;;  %v464_v15 = vrot.slane %v463_v12, 4  ;;  %v470_v19 = vsel %vm462_vm13, %v1985_v8, -inf  ;;  %v477_v20 = vsel %vm462_vm13, %v1995_v13, -inf }
  0x57   : > { %v413_v58 = vmax.f32 %v411_v50, %v412_v54  ;;  %v429_v60 = vmax.f32 %v427_v52, %v428_v56  ;;  %v437_v61 = vrot.slane %v436_v57, 2  ;;  %v471_v5 = vrot.slane %v470_v19, 4 }
  0x58   : > { %v421_v59 = vrot.slane %v420_v55, 1  ;;  %v465_v16 = vmax.f32 %v463_v12, %v464_v15  ;;  %v478_v17 = vrot.slane %v477_v20, 4  ;;  %v484_v26 = vsel %vm462_vm13, %v1998_v14, -inf }
  0x59   : > { %v430_v10 = vrot.slane %v429_v60, 1  ;;  %v438_v11 = vmax.f32 %v436_v57, %v437_v61  ;;  %v567_v27 = vrot.slane %v566_v62, 4  ;;  %v472_v31 = vmax.f32 %v470_v19, %v471_v5 }
  0x5a   : > { %v422_v63 = vmax.f32 %v420_v55, %v421_v59  ;;  %v485_v6 = vrot.slane %v484_v26, 4  ;;  %v466_v33 = vrot.slane %v465_v16, 2  ;;  %v479_v34 = vmax.f32 %v477_v20, %v478_v17 }
  0x5b   : > { %v431_v21 = vmax.f32 %v429_v60, %v430_v10  ;;  %v439_v23 = vrot.slane %v438_v11, 1  ;;  %v568_v35 = vmax.f32 %v566_v62, %v567_v27  ;;  %v573_v9 = vsel %vm193_vm9, %v1961_v1, -inf }
  0x5c   : > { %v445_v24 = vsel %vm186_vm1, %v422_v63, %v413_v58  ;;  %v473_v37 = vrot.slane %v472_v31, 2  ;;  %v486_v39 = vmax.f32 %v484_v26, %v485_v6  ;;  %v574_v40 = vrot.slane %v573_v9, 4 }
  0x5d   : > { %v440_v28 = vmax.f32 %v438_v11, %v439_v23  ;;  %v446_v29 = vsel %vm188_vm2, %v431_v21, %v445_v24  ;;  %v467_v45 = vmax.f32 %v465_v16, %v466_v33  ;;  %v480_v47 = vrot.slane %v479_v34, 2 }
  0x5e   : > { %v474_v46 = vmax.f32 %v472_v31, %v473_v37  ;;  %v487_v48 = vrot.slane %v486_v39, 2  ;;  %v569_v49 = vrot.slane %v568_v35, 2  ;;  %v575_v51 = vmax.f32 %v573_v9, %v574_v40 }
  0x5f   : > { %v447_v22 = vsel %vm190_vm3, %v440_v28, %v446_v29  ;;  %v468_v50 = vrot.slane %v467_v45, 1  ;;  %v580_v52 = vsel %vm193_vm9, %v1964_v2, -inf  ;;  %v587_v53 = vsel %vm193_vm9, %v1967_v3, -inf }
  0x60   : > { %v449_v42 = vsel %vm387_vm10, %v447_v22, -inf  ;;  %v456_v43 = vsel %vm396_vm11, %v447_v22, -inf  ;;  %v453_v44 = vsel %vm392_vm12, %v447_v22, -inf  ;;  %v475_v54 = vrot.slane %v474_v46, 1 }
  0x61   : > { %450 = vmax.xlane.f32.xlu2 %v449_v42  ;;  %457 = vmax.xlane.f32.xlu0 %v456_v43  ;;  %v481_v55 = vmax.f32 %v479_v34, %v480_v47  ;;  %v488_v56 = vmax.f32 %v486_v39, %v487_v48  ;;  %v570_v57 = vmax.f32 %v568_v35, %v569_v49  ;;  %v576_v59 = vrot.slane %v575_v51, 2 }
  0x62   : > { %454 = vmax.xlane.f32.xlu1 %v453_v44  ;;  %v469_v58 = vmax.f32 %v467_v45, %v468_v50  ;;  %v581_v60 = vrot.slane %v580_v52, 4  ;;  %v588_v61 = vrot.slane %v587_v53, 4  ;;  %v476_v62 = vmax.f32 %v474_v46, %v475_v54 }
  0x63   : > { %v482_v63 = vrot.slane %v481_v55, 1  ;;  %v489_v10 = vrot.slane %v488_v56, 1  ;;  %v571_v11 = vrot.slane %v570_v57, 1  ;;  %v577_v15 = vmax.f32 %v575_v51, %v576_v59 }
  0x64   : > { %v491_v12 = vmax.f32 %v469_v58, 0.0  ;;  %v582_v19 = vmax.f32 %v580_v52, %v581_v60  ;;  %v589_v20 = vmax.f32 %v587_v53, %v588_v61  ;;  %v492_v24 = vmax.f32 %v476_v62, 0.0 }
  0x65   : > { %v483_v21 = vmax.f32 %v481_v55, %v482_v63  ;;  %v490_v23 = vmax.f32 %v488_v56, %v489_v10  ;;  %v578_v5 = vrot.slane %v577_v15, 1  ;;  %v572_v29 = vmax.f32 %v570_v57, %v571_v11 }
  0x66   : > { %v583_v16 = vrot.slane %v582_v19, 2  ;;  %v590_v17 = vrot.slane %v589_v20, 2  ;;  %v499_v28 = vsel %vm186_vm1, %v492_v24, %v491_v12  ;;  %vm2772_vm15 = vcmask 60448  }
  0x67   : > { %v493_v26 = vmax.f32 %v483_v21, 0.0  ;;  %v494_v27 = vmax.f32 %v490_v23, 0.0  ;;  %v579_v31 = vmax.f32 %v577_v15, %v578_v5  ;;  %vm2773_vm0 = vcmask 93248  }
  0x68   : > { %v584_v6 = vmax.f32 %v582_v19, %v583_v16  ;;  %v591_v33 = vmax.f32 %v589_v20, %v590_v17  ;;  %vm621_vm4 = vcmask 130052   ;;  %vm261_vm5 = vcmask 7168  }
  0x69   : > { %v500_v34 = vsel %vm188_vm2, %v493_v26, %v499_v28  ;;  %v598_v42 = vsel %vm186_vm1, %v579_v31, %v572_v29  ;;  %v622_v50 = vsel %vm621_vm4, %v1958_v0, -inf  ;;  %v629_v51 = vsel %vm621_vm4, %v1961_v1, -inf }
  0x6a   : > { %v501_v35 = vsel %vm190_vm3, %v494_v27, %v500_v34  ;;  %v585_v9 = vrot.slane %v584_v6, 1  ;;  %v592_v22 = vrot.slane %v591_v33, 1  ;;  %v623_v52 = vrot.slane %v622_v50, 4 }
  0x6b   : > { %v503_v37 = vsel %vm387_vm10, %v501_v35, -inf  ;;  %v510_v39 = vsel %vm396_vm11, %v501_v35, -inf  ;;  %v507_v40 = vsel %vm392_vm12, %v501_v35, -inf  ;;  %v630_v53 = vrot.slane %v629_v51, 4 }
  0x6c   : > { %504 = vmax.xlane.f32.xlu2 %v503_v37  ;;  %511 = vmax.xlane.f32.xlu0 %v510_v39  ;;  %v586_v43 = vmax.f32 %v584_v6, %v585_v9  ;;  %v593_v44 = vmax.f32 %v591_v33, %v592_v22  ;;  %v636_v54 = vsel %vm621_vm4, %v1964_v2, -inf  ;;  %v643_v56 = vsel %vm621_vm4, %v1967_v3, -inf }
  0x6d   : > { %508 = vmax.xlane.f32.xlu1 %v507_v40  ;;  %v637_v55 = vrot.slane %v636_v54, 4  ;;  %v624_v57 = vmax.f32 %v622_v50, %v623_v52  ;;  %v631_v58 = vmax.f32 %v629_v51, %v630_v53  ;;  %v644_v59 = vrot.slane %v643_v56, 4 }
  0x6e   : > { %v599_v45 = vsel %vm188_vm2, %v586_v43, %v598_v42  ;;  %v197_v40 = vlaneseq }
  0x6f   : > { %v2117_v46 = vsel %vm190_vm3, %v593_v44, %v599_v45  ;;  %v638_v60 = vmax.f32 %v636_v54, %v637_v55  ;;  %v625_v61 = vrot.slane %v624_v57, 2  ;;  %v632_v62 = vrot.slane %v631_v58, 2 }
  0x70   : > { %v603_v47 = vsel %vm2771_vm14, %v2117_v46, -inf  ;;  %v607_v48 = vsel %vm2772_vm15, %v2117_v46, -inf  ;;  %v611_v49 = vsel %vm2773_vm0, %v2117_v46, -inf  ;;  %v645_v63 = vmax.f32 %v643_v56, %v644_v59 }
  0x71   : > { %v639_v10 = vrot.slane %v638_v60, 2  ;;  %v626_v11 = vmax.f32 %v624_v57, %v625_v61  ;;  %v633_v12 = vmax.f32 %v631_v58, %v632_v62  ;;  %vm2148_vm6 = vcmp.ge.s32.totalorder %v197_v40, 1 }
  0x72   : > { %v646_v15 = vrot.slane %v645_v63, 2  ;;  %vm206_vm7 = vcmp.lt.s32.totalorder %v197_v40, 2  ;;  %vm199_vm8 = vcmp.lt.s32.totalorder %v197_v40, 1  ;;  %vm211_vm10 = vcmp.ge.s32.totalorder %v197_v40, 2 }
  0x73   : > { %v640_v19 = vmax.f32 %v638_v60, %v639_v10  ;;  %v627_v20 = vrot.slane %v626_v11, 1  ;;  %v634_v21 = vrot.slane %v633_v12, 1  ;;  %vm212_vm11 = vcmp.lt.s32.totalorder %v197_v40, 3 }
  0x74   : > { %604 = vmax.xlane.f32.xlu2 %v603_v47  ;;  %608 = vmax.xlane.f32.xlu0 %v607_v48  ;;  %v647_v23 = vmax.f32 %v645_v63, %v646_v15  ;;  %vm217_vm12 = vcmp.ge.s32.totalorder %v197_v40, 3  ;;  %vm218_vm13 = vcmp.lt.s32.totalorder %v197_v40, 4  ;;  %v673_v62 = vsel %vm193_vm9, %v1982_v7, -inf }
  0x75   : > { %612 = vmax.xlane.f32.xlu1 %v611_v49  ;;  %v641_v24 = vrot.slane %v640_v19, 1  ;;  %v628_v5 = vmax.f32 %v626_v11, %v627_v20  ;;  %v635_v16 = vmax.f32 %v633_v12, %v634_v21  ;;  %vm219_vm0 = vmand %vm217_vm12, %vm218_vm13  ;;  %v680_v63 = vsel %vm193_vm9, %v1985_v8, -inf }
  0x76   : > { %v648_v17 = vrot.slane %v647_v23, 1  ;;  %v674_v12 = vrot.slane %v673_v62, 4  ;;  %v681_v15 = vrot.slane %v680_v63, 4  ;;  %vm2774_vm12 = vcmask 48128  }
  0x77   : > { %v642_v26 = vmax.f32 %v640_v19, %v641_v24  ;;  %v654_v28 = vsel %vm186_vm1, %v635_v16, %v628_v5  ;;  %v687_v19 = vsel %vm193_vm9, %v1995_v13, -inf  ;;  %vm831_vm13 = vcmask 123904  }
  0x78   : > { %v649_v27 = vmax.f32 %v647_v23, %v648_v17  ;;  %v688_v24 = vrot.slane %v687_v19, 4  ;;  %v675_v5 = vmax.f32 %v673_v62, %v674_v12  ;;  %v682_v16 = vmax.f32 %v680_v63, %v681_v15 }
  0x79   : > { %v655_v29 = vsel %vm188_vm2, %v642_v26, %v654_v28  ;;  %v694_v17 = vsel %vm193_vm9, %v1998_v14, -inf  ;;  %v745_v63 = vsel %vm621_vm4, %v1998_v14, -inf  ;;  %vm2788_vm9 = vcmask 93248  }
  0x7a   : > { %v2136_v31 = vsel %vm190_vm3, %v649_v27, %v655_v29  ;;  %v689_v27 = vmax.f32 %v687_v19, %v688_v24  ;;  %v695_v28 = vrot.slane %v694_v17, 4 }
  0x7b   : > { %v661_v6 = vsel %vm2772_vm15, %v2136_v31, -inf  ;;  %v658_v33 = vsel %vm2771_vm14, %v2136_v31, -inf  ;;  %vm207_vm14 = vmand %vm2148_vm6, %vm206_vm7  ;;  %vm2780_vm6 = vcmask 15360  }
  0x7c   : > { %659 = vmax.xlane.f32.xlu0 %v658_v33  ;;  %vm213_vm15 = vmand %vm211_vm10, %vm212_vm11  ;;  %v683_v33 = vrot.slane %v682_v16, 2  ;;  %vm2777_vm11 = vcmask 23552  }
  0x7d   : > { %662 = vmax.xlane.f32.xlu1 %v661_v6  ;;  %v676_v6 = vrot.slane %v675_v5, 2 }
  0xaf   : > { %v260_v34 = vpop.xlane.xlu1 %259  ;;  %v256_v35 = vpop.xlane.xlu0 %255 }
  0xb0   : > { %v2143_v9 = vsel %vm261_vm5, %v256_v35, %v260_v34  ;;  %v690_v34 = vrot.slane %v689_v27, 2  ;;  %v696_v35 = vmax.f32 %v694_v17, %v695_v28 }
  0xb2   : > { %v300_v22 = vpop.xlane.xlu2 %299  ;;  %v697_v42 = vrot.slane %v696_v35, 2 }
  0xb7   : > { %v297_v37 = vpop.xlane.xlu1 %296 }
  0xb8   : > { %v301_v39 = vsel %vm261_vm5, %v297_v37, %v300_v22  ;;  %v677_v22 = vmax.f32 %v675_v5, %v676_v6  ;;  %v684_v37 = vmax.f32 %v682_v16, %v683_v33 }
  0xb9   : > { %303 = vrot.lane.b32.xlu2 %v301_v39, %s1824_s17  ;;  %v691_v39 = vmax.f32 %v689_v27, %v690_v34  ;;  %s1841_s17 = smov 15  }
  0xc0   : > { %v196_v43 = vpop.xlane.xlu0 %195 }
  0xc1   : > { %201 = vst.msk [vmem:[%s2160_s26] sm:$0x1] %vm199_vm8, %v196_v43  ;;  %v203_v44 = vperm.slane %v196_v43, 1  ;;  %v209_v45 = vperm.slane %v196_v43, 2  ;;  %v215_v47 = vperm.slane %v196_v43, 3  ;;  %v678_v43 = vrot.slane %v677_v22, 1 }
  0xc3   : > { %208 = vst.msk [vmem:[%s2160_s26] sm:$0x1] %vm207_vm14, %v203_v44  ;;  %vm614_vm14 = vcmask 126048   ;;  %v685_v44 = vrot.slane %v684_v37, 1 }
  0xc4   : > { %214 = vst.msk [vmem:[%s2160_s26] sm:$0x1] %vm213_vm15, %v209_v45  ;;  %v667_v45 = vsel %vm614_vm14, %v2136_v31, -inf  ;;  %vm2789_vm15 = vcmask 60448  }
  0xc5   : > { %220 = vst.msk [vmem:[%s2160_s26] sm:$0x1] %vm219_vm0, %v215_v47  ;;  %v692_v47 = vrot.slane %v691_v39, 1  ;;  %668 = vmax.xlane.f32.xlu0 %v667_v45  ;;  %vm2790_vm0 = vmmov %vm2788_vm9 }
  0xc6   : > { %vm2792_vm7 = vmmov %vm2789_vm15 }
  0xc7   : > { %vm2794_vm10 = vmmov %vm2790_vm0 }
  0xc8   : > { %v390_v48 = vpop.xlane.xlu2 %389  ;;  %v395_v49 = vpop.xlane.xlu1 %394 }
  0xc9   : > { %v391_v50 = vmax.f32 %v390_v48, 0.0  ;;  %v399_v51 = vpop.xlane.xlu0 %398  ;;  %v698_v48 = vmax.f32 %v696_v35, %v697_v42 }
  0xca   : > { %v400_v52 = vmax.f32 %v399_v51, 0.0  ;;  %v693_v51 = vmax.f32 %v691_v39, %v692_v47  ;;  %v615_v39 = vsel %vm614_vm14, %v2117_v46, -inf }
  0xcb   : > { %v401_v53 = vsel %vm261_vm5, %v391_v50, %v395_v49  ;;  %v679_v49 = vmax.f32 %v677_v22, %v678_v43  ;;  %v686_v50 = vmax.f32 %v684_v37, %v685_v44  ;;  %v664_v43 = vsel %vm2790_vm0, %v2136_v31, -inf }
  0xcc   : > { %v2168_v54 = vsel %vm2780_vm6, %v401_v53, %v400_v52  ;;  %v699_v52 = vrot.slane %v698_v48, 1  ;;  %vm872_vm0 = vcmask 11264  }
  0xcd   : > { %v705_v53 = vsel %vm186_vm1, %v686_v50, %v679_v49 }
  0xd4   : > { %v451_v55 = vpop.xlane.xlu2 %450  ;;  %v458_v56 = vpop.xlane.xlu0 %457 }
  0xd5   : > { %v452_v57 = vmax.f32 %v451_v55, 0.0  ;;  %v459_v58 = vmax.f32 %v458_v56, 0.0  ;;  %v455_v59 = vpop.xlane.xlu1 %454  ;;  %v700_v55 = vmax.f32 %v698_v48, %v699_v52  ;;  %v706_v56 = vsel %vm188_vm2, %v693_v51, %v705_v53 }
  0xd7   : > { %v460_v60 = vsel %vm261_vm5, %v452_v57, %v455_v59  ;;  %v724_v57 = vsel %vm621_vm4, %v1982_v7, -inf  ;;  %v746_v7 = vrot.slane %v745_v63, 4 }
  0xd8   : > { %v461_v61 = vsel %vm2780_vm6, %v460_v60, %v459_v58  ;;  %v731_v58 = vsel %vm621_vm4, %v1985_v8, -inf  ;;  %v725_v59 = vrot.slane %v724_v57, 4 }
  0xd9   : > { %517 = vrot.lane.b32.xlu2 %v461_v61, %s1825_s27  ;;  %v732_v60 = vrot.slane %v731_v58, 4  ;;  %v738_v61 = vsel %vm621_vm4, %v1995_v13, -inf  ;;  %vm2791_vm4 = vcmask 27648   ;;  %s1843_s27 = smov 24  }
  0xda   : > { %v739_v62 = vrot.slane %v738_v61, 4  ;;  %vm2793_vm8 = vmmov %vm2791_vm4 }
  0xdb   : > { %v733_v12 = vmax.f32 %v731_v58, %v732_v60 }
  0xdc   : > { %v740_v19 = vmax.f32 %v738_v61, %v739_v62 }
  0xdd   : > { %v734_v8 = vrot.slane %v733_v12, 2 }
  0xdf   : > { %v505_v10 = vpop.xlane.xlu2 %504  ;;  %v512_v11 = vpop.xlane.xlu0 %511  ;;  %v735_v5 = vmax.f32 %v733_v12, %v734_v8 }
  0xe0   : > { %v506_v20 = vmax.f32 %v505_v10, 0.0  ;;  %v513_v21 = vmax.f32 %v512_v11, 0.0  ;;  %v509_v23 = vpop.xlane.xlu1 %508  ;;  %v707_v10 = vsel %vm190_vm3, %v700_v55, %v706_v56  ;;  %v726_v11 = vmax.f32 %v724_v57, %v725_v59 }
  0xe1   : > { %v715_v15 = vsel %vm2788_vm9, %v707_v10, -inf  ;;  %v709_v49 = vsel %vm2791_vm4, %v707_v10, -inf  ;;  %v712_v51 = vsel %vm2792_vm7, %v707_v10, -inf  ;;  %v718_v31 = vsel %vm614_vm14, %v707_v10, -inf }
  0xe2   : > { %v514_v26 = vsel %vm261_vm5, %v506_v20, %v509_v23  ;;  %716 = vmax.xlane.f32.xlu0 %v715_v15  ;;  %v727_v20 = vrot.slane %v726_v11, 2  ;;  %v747_v23 = vmax.f32 %v745_v63, %v746_v7  ;;  %vm877_vm9 = vcmask 44048  }
  0xe3   : > { %v515_v29 = vsel %vm2780_vm6, %v514_v26, %v513_v21  ;;  %v741_v21 = vrot.slane %v740_v19, 2  ;;  %v736_v26 = vrot.slane %v735_v5, 1  ;;  %vm885_vm4 = vcmask 109648  }
  0xe4   : > { %521 = vrot.lane.b32.xlu1 %v515_v29, %s1826_s28  ;;  %v728_v24 = vmax.f32 %v726_v11, %v727_v20  ;;  %v748_v16 = vrot.slane %v747_v23, 2  ;;  %vm881_vm7 = vcmask 76848  }
  0xe5   : > { %v742_v13 = vmax.f32 %v740_v19, %v741_v21  ;;  %v737_v29 = vmax.f32 %v735_v5, %v736_v26 }
  0xe6   : > { %v729_v17 = vrot.slane %v728_v24, 1  ;;  %v749_v27 = vmax.f32 %v747_v23, %v748_v16  ;;  %v832_v23 = vsel %vm831_vm13, %v1958_v0, -inf  ;;  %v846_v16 = vsel %vm831_vm13, %v1964_v2, -inf }
  0xe7   : > { %v743_v14 = vrot.slane %v742_v13, 1  ;;  %v605_v44 = vpop.xlane.xlu2 %604  ;;  %v609_v45 = vpop.xlane.xlu0 %608  ;;  %v833_v5 = vrot.slane %v832_v23, 4 }
  0xe8   : > { %v730_v28 = vmax.f32 %v728_v24, %v729_v17  ;;  %v750_v33 = vrot.slane %v749_v27, 1  ;;  %v613_v47 = vpop.xlane.xlu1 %612  ;;  %v618_v48 = vsel %vm261_vm5, %v605_v44, %v609_v45  ;;  %v839_v24 = vsel %vm831_vm13, %v1961_v1, -inf }
  0xe9   : > { %v744_v6 = vmax.f32 %v742_v13, %v743_v14  ;;  %v619_v50 = vsel %vm2780_vm6, %v618_v48, %v613_v47  ;;  %v840_v13 = vrot.slane %v839_v24, 4  ;;  %v847_v14 = vrot.slane %v846_v16, 4 }
  0xea   : > { %v756_v34 = vsel %vm186_vm1, %v737_v29, %v730_v28  ;;  %v751_v35 = vmax.f32 %v749_v27, %v750_v33  ;;  %v853_v27 = vsel %vm831_vm13, %v1967_v3, -inf  ;;  %v834_v29 = vmax.f32 %v832_v23, %v833_v5 }
  0xeb   : > { %v757_v22 = vsel %vm188_vm2, %v744_v6, %v756_v34  ;;  %v841_v6 = vmax.f32 %v839_v24, %v840_v13  ;;  %v854_v1 = vrot.slane %v853_v27, 4  ;;  %v848_v34 = vmax.f32 %v846_v16, %v847_v14  ;;  %v2264_v24 = vld [vmem:[%s1951_s24] sm:$0xff]  ;;  %v2269_v13 = vld [vmem:[%s1951_s24 + $0x10] sm:$0xff] }
  0xec   : > { %v758_v37 = vsel %vm190_vm3, %v751_v35, %v757_v22  ;;  %v835_v35 = vrot.slane %v834_v29, 2 }
  0xed   : > { %v763_v42 = vsel %vm2789_vm15, %v758_v37, -inf  ;;  %v760_v53 = vsel %vm2793_vm8, %v758_v37, -inf  ;;  %v766_v56 = vsel %vm2794_vm10, %v758_v37, -inf  ;;  %v769_v57 = vsel %vm614_vm14, %v758_v37, -inf }
  0xee   : > { %764 = vmax.xlane.f32.xlu0 %v763_v42  ;;  %v842_v22 = vrot.slane %v841_v6, 2  ;;  %v849_v3 = vrot.slane %v848_v34, 2  ;;  %v836_v44 = vmax.f32 %v834_v29, %v835_v35  ;;  %vm898_vm14 = vcmask 128002  }
  0xef   : > { %v660_v12 = vpop.xlane.xlu0 %659  ;;  %v899_v5 = vsel %vm898_vm14, %v2264_v24, -inf  ;;  %v906_v16 = vsel %vm898_vm14, %v2269_v13, -inf  ;;  %vm2778_vm15 = vcmask 126064   ;;  %vm956_vm8 = vcmask 130054  }
  0xf0   : > { %v663_v58 = vpop.xlane.xlu1 %662  ;;  %v843_v45 = vmax.f32 %v841_v6, %v842_v22  ;;  %v907_v14 = vrot.slane %v906_v16, 4  ;;  %v2284_v6 = vld [vmem:[%s1951_s24 + $0x30] sm:$0xff]  ;;  %vm2776_vm10 = vcmask 31744  }
  0xf1   : > { %v670_v7 = vsel %vm261_vm5, %v660_v12, %v663_v58 }
 0x102   : > { %616 = vmax.xlane.f32.xlu2 %v615_v39  ;;  %v855_v39 = vmax.f32 %v853_v27, %v854_v1  ;;  %v2277_v27 = vld [vmem:[%s1951_s24 + $0x20] sm:$0xff]  ;;  %v920_v1 = vsel %vm898_vm14, %v2284_v6, -inf }
 0x103   : > { %v921_v35 = vrot.slane %v920_v1, 4 }
 0x104   : > { %v856_v47 = vrot.slane %v855_v39, 2 }
 0x10a   : > { %665 = vmax.xlane.f32.xlu2 %v664_v43 }
 0x10e   : > { %710 = vmax.xlane.f32.xlu1 %v709_v49  ;;  %v850_v49 = vmax.f32 %v848_v34, %v849_v3  ;;  %v908_v34 = vmax.f32 %v906_v16, %v907_v14  ;;  %v2326_v16 = vld [vmem:[%s1951_s24 + $0x28] sm:$0xff] }
 0x112   : > { %713 = vmax.xlane.f32.xlu2 %v712_v51  ;;  %v844_v51 = vrot.slane %v843_v45, 1 }
 0x113   : > { %v304_v46 = vpop.permute.xlu2 %303 }
 0x114   : > { %v2211_v52 = vsel %vm2780_vm6, %v2143_v9, %v304_v46 }
 0x115   : > { %316 = vst [vmem:[#allocation1] sm:$0xff] %v2211_v52 }
 0x116   : > { %719 = vmax.xlane.f32.xlu1 %v718_v31 }
 0x11a   : > { %761 = vmax.xlane.f32.xlu2 %v760_v53  ;;  %v857_v53 = vmax.f32 %v855_v39, %v856_v47  ;;  %v922_v39 = vmax.f32 %v920_v1, %v921_v35 }
 0x11c   : > { %v2216_v55 = vld [vmem:[#allocation1 + $0x1] ss:$9 sm:$0xff] }
 0x11d   : > { %326 = vst [vmem:[#allocation1] sm:$0xff] %v2211_v52 }
 0x11e   : > { %767 = vmax.xlane.f32.xlu1 %v766_v56 }
 0x122   : > { %770 = vmax.xlane.f32.xlu2 %v769_v57  ;;  %v851_v57 = vrot.slane %v850_v49, 1 }
 0x124   : > { %v2221_v9 = vld [vmem:[#allocation1 + $0x2] ss:$9 sm:$0xff]  ;;  %v852_v12 = vmax.f32 %v850_v49, %v851_v57 }
 0x125   : > { %336 = vst [vmem:[#allocation1] sm:$0xff] %v2211_v52 }
 0x12c   : > { %v2226_v62 = vld [vmem:[#allocation1 + $0x3] ss:$9 sm:$0xff] }
 0x133   : > { %v518_v59 = vpop.permute.xlu2 %517 }
 0x134   : > { %v525_v60 = vsel %vm2777_vm11, %v2168_v54, %v518_v59 }
 0x138   : > { %v669_v19 = vpop.xlane.xlu0 %668 }
 0x155   : > { %v717_v0 = vpop.xlane.xlu0 %716 }
 0x156   : > { %v522_v61 = vpop.permute.xlu1 %521 }
 0x157   : > { %v2229_v63 = vsel %vm2774_vm12, %v525_v60, %v522_v61  ;;  %v845_v60 = vmax.f32 %v843_v45, %v844_v51  ;;  %v858_v61 = vrot.slane %v857_v53, 1  ;;  %v923_v45 = vrot.slane %v922_v39, 2 }
 0x158   : > { %536 = vst [vmem:[#allocation1] sm:$0xff] %v2229_v63  ;;  %vm2775_vm12 = vcmask 97280  }
 0x159   : > { %v924_v51 = vmax.f32 %v922_v39, %v923_v45 }
 0x15f   : > { %v2232_v10 = vld [vmem:[#allocation1 + $0x1] ss:$9 sm:$0xff] }
 0x160   : > { %546 = vst [vmem:[#allocation1] sm:$0xff] %v2229_v63 }
 0x161   : > { %v765_v43 = vpop.xlane.xlu0 %764 }
 0x167   : > { %v2235_v11 = vld [vmem:[#allocation1 + $0x2] ss:$9 sm:$0xff] }
 0x168   : > { %556 = vst [vmem:[#allocation1] sm:$0xff] %v2229_v63 }
 0x175   : > { %v617_v15 = vpop.xlane.xlu2 %616 }
 0x176   : > { %v2239_v54 = vsel %vm2777_vm11, %v619_v50, %v617_v15  ;;  %v837_v50 = vrot.slane %v836_v44, 1 }
 0x178   : > { %v838_v59 = vmax.f32 %v836_v44, %v837_v50 }
 0x17a   : > { %v860_v15 = vmax.f32 %v838_v59, 0.0 }
 0x17d   : > { %v666_v20 = vpop.xlane.xlu2 %665 }
 0x17e   : > { %v671_v8 = vsel %vm2780_vm6, %v670_v7, %v666_v20  ;;  %v859_v7 = vmax.f32 %v857_v53, %v858_v61  ;;  %v862_v20 = vmax.f32 %v852_v12, 0.0 }
 0x17f   : > { %v672_v21 = vsel %vm2777_vm11, %v671_v8, %v669_v19  ;;  %v861_v19 = vmax.f32 %v845_v60, 0.0 }
 0x180   : > { %776 = vrot.lane.b32.xlu0 %v672_v21, %s1827_s29  ;;  %v863_v21 = vmax.f32 %v859_v7, 0.0  ;;  %v957_v7 = vsel %vm956_vm8, %v2264_v24, -inf }
 0x181   : > { %v711_v17 = vpop.xlane.xlu1 %710  ;;  %v868_v8 = vsel %vm186_vm1, %v861_v19, %v860_v15 }
 0x182   : > { %v869_v23 = vsel %vm188_vm2, %v862_v20, %v868_v8  ;;  %v2312_v20 = vld [vmem:[%s1951_s24 + $0x8] sm:$0xff] }
 0x183   : > { %v958_v8 = vsel %vm831_vm13, %v2312_v20, -inf }
 0x185   : > { %v714_v26 = vpop.xlane.xlu2 %713 }
 0x186   : > { %v721_v28 = vsel %vm261_vm5, %v711_v17, %v714_v26  ;;  %v2274_v17 = vsel %vm190_vm3, %v863_v21, %v869_v23  ;;  %v900_v26 = vrot.slane %v899_v5, 4  ;;  %v2319_v21 = vld [vmem:[%s1951_s24 + $0x18] sm:$0xff]  ;;  %v959_v23 = vmax.f32 %v957_v7, %v958_v8 }
 0x187   : > { %v722_v33 = vsel %vm2780_vm6, %v721_v28, %v717_v0  ;;  %v913_v28 = vsel %vm898_vm14, %v2277_v27, -inf  ;;  %v878_v0 = vsel %vm877_vm9, %v2274_v17, -inf  ;;  %v882_v60 = vsel %vm881_vm7, %v2274_v17, -inf }
 0x188   : > { %v914_v29 = vrot.slane %v913_v28, 4  ;;  %v960_v14 = vrot.slane %v959_v23, 4  ;;  %v1029_v39 = vsel %vm898_vm14, %v2319_v21, -inf }
 0x189   : > { %v720_v37 = vpop.xlane.xlu1 %719 }
 0x18a   : > { %v723_v2 = vsel %vm2777_vm11, %v722_v33, %v720_v37  ;;  %v901_v33 = vmax.f32 %v899_v5, %v900_v26  ;;  %v915_v22 = vmax.f32 %v913_v28, %v914_v29  ;;  %v975_v5 = vsel %vm956_vm8, %v2277_v27, -inf  ;;  %v2333_v29 = vld [vmem:[%s1951_s24 + $0x38] sm:$0xff]  ;;  %s1840_s24 = smov 5  }
 0x18b   : > { %780 = vrot.lane.b32.xlu1 %v723_v2, %s1828_s30  ;;  %v909_v2 = vrot.slane %v908_v34, 2  ;;  %v976_v26 = vsel %vm831_vm13, %v2326_v16, -inf  ;;  %v985_v1 = vsel %vm831_vm13, %v2333_v29, -inf  ;;  %v961_v35 = vmax.f32 %v959_v23, %v960_v14 }
 0x18c   : > { %v902_v37 = vrot.slane %v901_v33, 2  ;;  %v916_v3 = vrot.slane %v915_v22, 2  ;;  %v977_v28 = vmax.f32 %v975_v5, %v976_v26 }
 0x18d   : > { %v762_v42 = vpop.xlane.xlu2 %761  ;;  %v910_v44 = vmax.f32 %v908_v34, %v909_v2  ;;  %v1022_v2 = vsel %vm898_vm14, %v2312_v20, -inf }
 0x18e   : > { %v772_v48 = vsel %vm261_vm5, %v762_v42, %v765_v43  ;;  %v890_v42 = vsel %vm2778_vm15, %v2274_v17, -inf  ;;  %v903_v43 = vmax.f32 %v901_v33, %v902_v37  ;;  %v917_v47 = vmax.f32 %v915_v22, %v916_v3 }
 0x18f   : > { %v911_v50 = vrot.slane %v910_v44, 1  ;;  %v978_v22 = vrot.slane %v977_v28, 4  ;;  %v962_v3 = vrot.slane %v961_v35, 2  ;;  %v1023_v45 = vrot.slane %v1022_v2, 4 }
 0x190   : > { %v904_v49 = vrot.slane %v903_v43, 1 }
 0x191   : > { %v768_v46 = vpop.xlane.xlu1 %767  ;;  %v912_v53 = vmax.f32 %v910_v44, %v911_v50  ;;  %v963_v50 = vmax.f32 %v961_v35, %v962_v3 }
 0x192   : > { %v773_v31 = vsel %vm2780_vm6, %v772_v48, %v768_v46  ;;  %v873_v48 = vsel %vm872_vm0, %v2274_v17, -inf  ;;  %v918_v46 = vrot.slane %v917_v47, 1 }
 0x194   : > { %v919_v57 = vmax.f32 %v917_v47, %v918_v46  ;;  %v1030_v47 = vrot.slane %v1029_v39, 4 }
 0x195   : > { %v771_v56 = vpop.xlane.xlu2 %770 }
 0x196   : > { %v774_v58 = vsel %vm2777_vm11, %v773_v31, %v771_v56  ;;  %v905_v31 = vmax.f32 %v903_v43, %v904_v49  ;;  %v925_v56 = vrot.slane %v924_v51, 1  ;;  %v979_v43 = vmax.f32 %v977_v28, %v978_v22 }
 0x197   : > { %784 = vrot.lane.b32.xlu2 %v774_v58, %s1829_s2  ;;  %v886_v58 = vsel %vm885_vm4, %v2274_v17, -inf }
 0x198   : > { %v931_v59 = vsel %vm186_vm1, %v912_v53, %v905_v31  ;;  %v926_v61 = vmax.f32 %v924_v51, %v925_v56  ;;  %v980_v51 = vrot.slane %v979_v43, 2  ;;  %v1043_v31 = vsel %vm898_vm14, %v2333_v29, -inf }
 0x199   : > { %v932_v12 = vsel %vm188_vm2, %v919_v57, %v931_v59  ;;  %v1024_v56 = vmax.f32 %v1022_v2, %v1023_v45  ;;  %v1031_v57 = vmax.f32 %v1029_v39, %v1030_v47 }
 0x19a   : > { %v2299_v15 = vsel %vm190_vm3, %v926_v61, %v932_v12  ;;  %v964_v61 = vrot.slane %v963_v50, 1  ;;  %v981_v12 = vmax.f32 %v979_v43, %v980_v51 }
 0x19b   : > { %v935_v19 = vsel %vm872_vm0, %v2299_v15, -inf  ;;  %v1025_v8 = vrot.slane %v1024_v56, 2  ;;  %v945_v43 = vsel %vm885_vm4, %v2299_v15, -inf }
 0x1aa   : > { %879 = vmax.xlane.f32.xlu0 %v878_v0  ;;  %v984_v0 = vsel %vm956_vm8, %v2284_v6, -inf }
 0x1ab   : > { %v986_v34 = vmax.f32 %v984_v0, %v985_v1  ;;  %v558_v0 = vld [vmem:[#allocation1 + $0x3] ss:$9 sm:$0xff] }
 0x1b2   : > { %891 = vmax.xlane.f32.xlu0 %v890_v42  ;;  %v987_v42 = vrot.slane %v986_v34, 4 }
 0x1b4   : > { %v988_v49 = vmax.f32 %v986_v34, %v987_v42  ;;  %v982_v34 = vrot.slane %v981_v12, 1 }
 0x1b5   : > { %874 = vmax.xlane.f32.xlu1 %v873_v48  ;;  %v1036_v48 = vsel %vm898_vm14, %v2326_v16, -inf  ;;  %vm312_vm14 = vcmp.ge.s32.totalorder %v197_v40, 4 }
 0x1b6   : > { %v1037_v46 = vrot.slane %v1036_v48, 4  ;;  %v989_v59 = vrot.slane %v988_v49, 2  ;;  %v983_v42 = vmax.f32 %v981_v12, %v982_v34 }
 0x1b8   : > { %v990_v14 = vmax.f32 %v988_v49, %v989_v59 }
 0x1ba   : > { %v991_v2 = vrot.slane %v990_v14, 1 }
 0x1bc   : > { %v992_v49 = vmax.f32 %v990_v14, %v991_v2  ;;  %v1100_v2 = vsel %vm956_vm8, %v2333_v29, -inf }
 0x1bd   : > { %887 = vmax.xlane.f32.xlu1 %v886_v58 }
 0x1c0   : > { %883 = vmax.xlane.f32.xlu2 %v882_v60  ;;  %v1044_v60 = vrot.slane %v1043_v31, 4 }
 0x1c2   : > { %v1045_v28 = vmax.f32 %v1043_v31, %v1044_v60 }
 0x1c4   : > { %v1046_v39 = vrot.slane %v1045_v28, 2 }
 0x1c6   : > { %309 = vrot.lane.b32.xlu0 %v2211_v52, %s1827_s29  ;;  %v966_v52 = vsel %vm956_vm8, %v2269_v13, -inf  ;;  %s1845_s29 = smov 30  }
 0x1c8   : > { %936 = vmax.xlane.f32.xlu2 %v935_v19  ;;  %v1038_v19 = vmax.f32 %v1036_v48, %v1037_v46  ;;  %v948_v48 = vsel %vm2778_vm15, %v2299_v15, -inf }
 0x1ca   : > { %v1039_v35 = vrot.slane %v1038_v19, 2 }
 0x1cc   : > { %v1040_v3 = vmax.f32 %v1038_v19, %v1039_v35 }
 0x1ce   : > { %v1041_v46 = vrot.slane %v1040_v3, 1 }
 0x1d0   : > { %v1042_v59 = vmax.f32 %v1040_v3, %v1041_v46  ;;  %v1101_v3 = vrot.slane %v1100_v2, 4 }
 0x1d6   : > { %319 = vrot.lane.b32.xlu1 %v2216_v55, %s1828_s30  ;;  %v967_v55 = vsel %vm831_vm13, %v2319_v21, -inf  ;;  %vm789_vm13 = vcmask 64512   ;;  %s1846_s30 = smov 42  }
 0x1e0   : > { %329 = vrot.lane.b32.xlu2 %v2221_v9, %s1829_s2  ;;  %v968_v9 = vmax.f32 %v966_v52, %v967_v55  ;;  %v1032_v52 = vrot.slane %v1031_v57, 2 }
 0x1e2   : > { %v969_v33 = vrot.slane %v968_v9, 4 }
 0x1e4   : > { %v970_v37 = vmax.f32 %v968_v9, %v969_v33  ;;  %v939_v9 = vsel %vm877_vm9, %v2299_v15, -inf  ;;  %v965_v33 = vmax.f32 %v963_v50, %v964_v61  ;;  %v1047_v50 = vmax.f32 %v1045_v28, %v1046_v39 }
 0x1e6   : > { %v971_v44 = vrot.slane %v970_v37, 2 }
 0x1e8   : > { %v972_v53 = vmax.f32 %v970_v37, %v971_v44  ;;  %v1033_v37 = vmax.f32 %v1031_v57, %v1032_v52 }
 0x1ea   : > { %v973_v7 = vrot.slane %v972_v53, 1  ;;  %v1034_v47 = vrot.slane %v1033_v37, 1 }
 0x1ec   : > { %v974_v22 = vmax.f32 %v972_v53, %v973_v7 }
 0x1ee   : > { %v997_v44 = vsel %vm186_vm1, %v974_v22, %v965_v33  ;;  %v1086_v33 = vsel %vm956_vm8, %v2319_v21, -inf }
 0x1ef   : > { %v998_v51 = vsel %vm188_vm2, %v983_v42, %v997_v44  ;;  %v1087_v22 = vrot.slane %v1086_v33, 4 }
 0x1f0   : > { %v2359_v57 = vsel %vm190_vm3, %v992_v49, %v998_v51 }
 0x1f1   : > { %v785_v5 = vpop.permute.xlu2 %784  ;;  %v1008_v61 = vsel %vm881_vm7, %v2359_v57, -inf  ;;  %v1001_v34 = vsel %vm872_vm0, %v2359_v57, -inf  ;;  %v1088_v42 = vmax.f32 %v1086_v33, %v1087_v22 }
 0x1f2   : > { %v777_v58 = vpop.permute.xlu0 %776 }
 0x1f3   : > { %v788_v55 = vsel %vm2776_vm10, %v2239_v54, %v777_v58  ;;  %v1026_v54 = vmax.f32 %v1024_v56, %v1025_v8  ;;  %v1035_v56 = vmax.f32 %v1033_v37, %v1034_v47  ;;  %v1048_v58 = vrot.slane %v1047_v50, 1 }
 0x1f4   : > { %v1089_v47 = vrot.slane %v1088_v42, 2 }
 0x1f5   : > { %v1027_v45 = vrot.slane %v1026_v54, 1  ;;  %v1049_v12 = vmax.f32 %v1047_v50, %v1048_v58 }
 0x1f7   : > { %v1028_v53 = vmax.f32 %v1026_v54, %v1027_v45  ;;  %v1093_v54 = vsel %vm956_vm8, %v2326_v16, -inf }
 0x1f8   : > { %v1094_v37 = vrot.slane %v1093_v54, 4 }
 0x1f9   : > { %v1054_v60 = vsel %vm186_vm1, %v1035_v56, %v1028_v53  ;;  %v1005_v53 = vsel %vm877_vm9, %v2359_v57, -inf }
 0x1fa   : > { %v1055_v19 = vsel %vm188_vm2, %v1042_v59, %v1054_v60  ;;  %v1095_v44 = vmax.f32 %v1093_v54, %v1094_v37 }
 0x1fc   : > { %v1096_v51 = vrot.slane %v1095_v44, 2 }
 0x1fd   : > { %v781_v23 = vpop.permute.xlu1 %780 }
 0x1fe   : > { %v790_v26 = vsel %vm789_vm13, %v788_v55, %v781_v23  ;;  %vm313_vm13 = vcmp.lt.s32.totalorder %v197_v40, 8  ;;  %v1097_v58 = vmax.f32 %v1095_v44, %v1096_v51 }
 0x1ff   : > { %v792_v1 = vsel %vm2775_vm12, %v790_v26, %v785_v5  ;;  %v942_v5 = vsel %vm881_vm7, %v2299_v15, -inf  ;;  %vm314_vm12 = vmand %vm312_vm14, %vm313_vm13  ;;  %v1079_v15 = vsel %vm956_vm8, %v2312_v20, -inf  ;;  %vm2409_vm14 = vcmp.lt.s32.totalorder %v197_v40, 12 }
 0x200   : > { %940 = vmax.xlane.f32.xlu1 %v939_v9  ;;  %794 = vrot.lane.b32.xlu0 %v792_v1, %s1830_s3  ;;  %801 = vst [vmem:[#allocation1] sm:$0xff] %v792_v1  ;;  %v1080_v35 = vrot.slane %v1079_v15, 4  ;;  %vm332_vm8 = vcmp.ge.s32.totalorder %v197_v40, 12  ;;  %vm333_vm13 = vcmp.lt.s32.totalorder %v197_v40, 16  ;;  %s1848_s3 = smov 67  }
 0x202   : > { %v1081_v39 = vmax.f32 %v1079_v15, %v1080_v35 }
 0x204   : > { %v1082_v45 = vrot.slane %v1081_v39, 2 }
 0x206   : > { %v1083_v46 = vmax.f32 %v1081_v39, %v1082_v45 }
 0x207   : > { %v803_v31 = vld [vmem:[#allocation1 + $0x1] ss:$9 sm:$0xff] }
 0x208   : > { %949 = vmax.xlane.f32.xlu1 %v948_v48  ;;  %529 = vrot.lane.b32.xlu0 %v2229_v63, %s1831_s4  ;;  %811 = vst [vmem:[#allocation1] sm:$0xff] %v792_v1  ;;  %v2368_v63 = vsel %vm190_vm3, %v1049_v12, %v1055_v19  ;;  %v1102_v48 = vmax.f32 %v1100_v2, %v1101_v3  ;;  %v1084_v60 = vrot.slane %v1083_v46, 1  ;;  %v1011_v2 = vsel %vm885_vm4, %v2359_v57, -inf }
 0x209   : > { %946 = vmax.xlane.f32.xlu2 %v945_v43  ;;  %v1058_v8 = vsel %vm872_vm0, %v2368_v63, -inf  ;;  %v1065_v35 = vsel %vm881_vm7, %v2368_v63, -inf }
 0x20a   : > { %v1103_v56 = vrot.slane %v1102_v48, 2 }
 0x20c   : > { %v1104_v19 = vmax.f32 %v1102_v48, %v1103_v56  ;;  %v1294_v56 = vrot.slane %v2056_v30, 4 }
 0x20f   : > { %v2365_v7 = vld [vmem:[#allocation1 + $0x2] ss:$9 sm:$0xff] }
 0x210   : > { %1009 = vmax.xlane.f32.xlu1 %v1008_v61  ;;  %821 = vst [vmem:[#allocation1] sm:$0xff] %v792_v1 }
 0x217   : > { %v823_v39 = vld [vmem:[#allocation1 + $0x3] ss:$9 sm:$0xff] }
 0x218   : > { %1059 = vmax.xlane.f32.xlu1 %v1058_v8  ;;  %v1098_v8 = vrot.slane %v1097_v58, 1 }
 0x21d   : > { %v880_v52 = vpop.xlane.xlu0 %879 }
 0x221   : > { %539 = vrot.lane.b32.xlu2 %v2232_v10, %s1832_s5  ;;  %s1850_s5 = smov 36  }
 0x225   : > { %v2376_v9 = vpop.xlane.xlu0 %891 }
 0x228   : > { %v2373_v55 = vpop.xlane.xlu1 %874 }
 0x229   : > { %v876_v23 = vmax.f32 %v2373_v55, 0.0 }
 0x22b   : > { %v894_v26 = vsel %vm261_vm5, %v876_v23, %v880_v52  ;;  %v1085_v52 = vmax.f32 %v1083_v46, %v1084_v60  ;;  %v1300_v60 = vrot.slane %v2064_v32, 4 }
 0x230   : > { %v888_v10 = vpop.xlane.xlu1 %887 }
 0x231   : > { %559 = vrot.lane.b32.xlu1 %v558_v0, %s1833_s11  ;;  %s1640_s11 = smul.u32 3, %s1882_s10  ;;  %s1543_s10 = scalar_lea.sflag [#allocation4], %s1947_s21 }
 0x232   : > { %943 = vmax.xlane.f32.xlu0 %v942_v5 }
 0x233   : > { %v884_v14 = vpop.xlane.xlu2 %883 }
 0x234   : > { %v895_v28 = vsel %vm2780_vm6, %v894_v26, %v884_v14  ;;  %v1014_v26 = vsel %vm2778_vm15, %v2359_v57, -inf  ;;  %v1105_v14 = vrot.slane %v1104_v19, 1 }
 0x235   : > { %v2387_v1 = vsel %vm2777_vm11, %v895_v28, %v888_v10  ;;  %vm334_vm11 = vmand %vm332_vm8, %vm333_vm13  ;;  %v1099_v10 = vmax.f32 %v1097_v58, %v1098_v8  ;;  %v1107_v28 = vmax.f32 %v1085_v52, 0.0  ;;  %vm532_vm8 = vcmp.ge.s32.totalorder %v197_v40, 20 }
 0x236   : > { %v1106_v33 = vmax.f32 %v1104_v19, %v1105_v14  ;;  %vm543_vm13 = vcmp.lt.s32.totalorder %v197_v40, 38 }
 0x238   : > { %v310_v0 = vpop.permute.xlu0 %309  ;;  %v1110_v22 = vmax.f32 %v1106_v33, 0.0 }
 0x239   : > { %315 = vst.msk [vmem:[%s2160_s26] sm:$0x1] %vm314_vm12, %v310_v0  ;;  %804 = vrot.lane.b32.xlu1 %v803_v31, %s1834_s13  ;;  %vm2404_vm12 = vcmp.ge.s32.totalorder %v197_v40, 8  ;;  %v1090_v31 = vmax.f32 %v1088_v42, %v1089_v47  ;;  %v1109_v0 = vmax.f32 %v1099_v10, 0.0  ;;  %v1068_v42 = vsel %vm885_vm4, %v2368_v63, -inf }
 0x23a   : > { %1002 = vmax.xlane.f32.xlu0 %v1001_v34  ;;  %vm324_vm10 = vmand %vm2404_vm12, %vm2409_vm14  ;;  %vm2779_vm12 = vcmask 35856   ;;  %vm343_vm14 = vcmp.lt.s32.totalorder %v197_v40, 20 }
 0x23b   : > { %v2401_v43 = vpop.xlane.xlu2 %936  ;;  %v1091_v61 = vrot.slane %v1090_v31, 1 }
 0x23d   : > { %v1092_v5 = vmax.f32 %v1090_v31, %v1091_v61  ;;  %v1306_v61 = vrot.slane %v2078_v38, 4 }
 0x23f   : > { %v1108_v15 = vmax.f32 %v1092_v5, 0.0 }
 0x241   : > { %v1115_v34 = vsel %vm186_vm1, %v1108_v15, %v1107_v28  ;;  %v1301_v15 = vmax.f32 %v2064_v32, %v1300_v60  ;;  %v1363_v32 = vrot.slane %v2082_v41, 4 }
 0x242   : > { %v1116_v54 = vsel %vm188_vm2, %v1109_v0, %v1115_v34  ;;  %v1307_v0 = vmax.f32 %v2078_v38, %v1306_v61  ;;  %v938_v61 = vmax.f32 %v2401_v43, 0.0 }
 0x243   : > { %v330_v12 = vpop.permute.xlu2 %329  ;;  %v2431_v37 = vsel %vm190_vm3, %v1110_v22, %v1116_v54  ;;  %v1345_v54 = vrot.slane %v2048_v4, 4  ;;  %v1302_v38 = vrot.slane %v1301_v15, 2 }
 0x244   : > { %v1123_v3 = vsel %vm877_vm9, %v2431_v37, -inf  ;;  %v1132_v43 = vsel %vm2778_vm15, %v2431_v37, -inf }
 0x248   : > { %v320_v59 = vpop.permute.xlu1 %319 }
 0x249   : > { %325 = vst.msk [vmem:[%s2160_s26] sm:$0x1] %vm324_vm10, %v320_v59  ;;  %vm1402_vm10 = vcmask 128003  }
 0x24a   : > { %1006 = vmax.xlane.f32.xlu2 %v1005_v53  ;;  %335 = vst.msk [vmem:[%s2160_s26] sm:$0x1] %vm334_vm11, %v330_v12  ;;  %vm1226_vm11 = vcmask 126978   ;;  %v1288_v53 = vrot.slane %v2044_v25, 4 }
 0x24b   : > { %v1227_v44 = vsel %vm1226_vm11, %v2264_v24, -inf  ;;  %v1234_v57 = vsel %vm1226_vm11, %v2269_v13, -inf  ;;  %v1241_v48 = vsel %vm1226_vm11, %v2277_v27, -inf  ;;  %v1248_v50 = vsel %vm1226_vm11, %v2284_v6, -inf }
 0x24c   : > { %v1228_v45 = vrot.slane %v1227_v44, 4  ;;  %v1235_v47 = vrot.slane %v1234_v57, 4  ;;  %v1242_v49 = vrot.slane %v1241_v48, 4  ;;  %v1249_v31 = vrot.slane %v1248_v50, 4 }
 0x24d   : > { %v1129_v24 = vsel %vm885_vm4, %v2431_v37, -inf  ;;  %v1289_v52 = vmax.f32 %v2044_v25, %v1288_v53  ;;  %vm2799_vm4 = vcmask 23552  }
 0x24e   : > { %339 = vrot.lane.b32.xlu0 %v2226_v62, %s1835_s14  ;;  %v1119_v62 = vsel %vm872_vm0, %v2431_v37, -inf  ;;  %v1229_v51 = vmax.f32 %v1227_v44, %v1228_v45  ;;  %v1236_v46 = vmax.f32 %v1234_v57, %v1235_v47  ;;  %v1250_v59 = vmax.f32 %v1248_v50, %v1249_v31 }
 0x24f   : > { %v1303_v50 = vmax.f32 %v1301_v15, %v1302_v38 }
 0x250   : > { %v1230_v58 = vrot.slane %v1229_v51, 2  ;;  %v1237_v13 = vrot.slane %v1236_v46, 2  ;;  %v1251_v8 = vrot.slane %v1250_v59, 2 }
 0x251   : > { %v1304_v60 = vrot.slane %v1303_v50, 1 }
 0x252   : > { %1015 = vmax.xlane.f32.xlu2 %v1014_v26  ;;  %v1231_v12 = vmax.f32 %v1229_v51, %v1230_v58  ;;  %v1238_v19 = vmax.f32 %v1236_v46, %v1237_v13  ;;  %v1295_v26 = vmax.f32 %v2056_v30, %v1294_v56  ;;  %v1252_v28 = vmax.f32 %v1250_v59, %v1251_v8 }
 0x253   : > { %v1290_v30 = vrot.slane %v1289_v52, 2  ;;  %v1346_v51 = vmax.f32 %v2048_v4, %v1345_v54  ;;  %v1364_v58 = vmax.f32 %v2082_v41, %v1363_v32 }
 0x254   : > { %v1232_v14 = vrot.slane %v1231_v12, 1  ;;  %v1239_v10 = vrot.slane %v1238_v19, 1  ;;  %v1253_v22 = vrot.slane %v1252_v28, 1 }
 0x255   : > { %v1291_v45 = vmax.f32 %v1289_v52, %v1290_v30  ;;  %v1347_v8 = vrot.slane %v1346_v51, 2 }
 0x256   : > { %v1233_v34 = vmax.f32 %v1231_v12, %v1232_v14  ;;  %v1305_v12 = vmax.f32 %v1303_v50, %v1304_v60  ;;  %v1365_v14 = vrot.slane %v1364_v58, 2 }
 0x257   : > { %v1292_v31 = vrot.slane %v1291_v45, 1 }
 0x259   : > { %v1293_v13 = vmax.f32 %v1291_v45, %v1292_v31  ;;  %v1417_v31 = vsel %vm1402_vm10, %v2326_v16, -inf }
 0x25a   : > { %1066 = vmax.xlane.f32.xlu2 %v1065_v35  ;;  %v1240_v35 = vmax.f32 %v1238_v19, %v1239_v10 }
 0x262   : > { %1120 = vmax.xlane.f32.xlu2 %v1119_v62  ;;  %v1351_v62 = vrot.slane %v2060_v18, 4 }
 0x263   : > { %1069 = vmax.xlane.f32.xlu1 %v1068_v42  ;;  %v1296_v42 = vrot.slane %v1295_v26, 2 }
 0x265   : > { %v1297_v47 = vmax.f32 %v1295_v26, %v1296_v42 }
 0x267   : > { %v1298_v53 = vrot.slane %v1297_v47, 1 }
 0x269   : > { %v1299_v59 = vmax.f32 %v1297_v47, %v1298_v53  ;;  %v1403_v47 = vsel %vm1402_vm10, %v2312_v20, -inf  ;;  %v1418_v53 = vrot.slane %v1417_v31, 4 }
 0x26a   : > { %v1404_v50 = vrot.slane %v1403_v47, 4 }
 0x26b   : > { %1124 = vmax.xlane.f32.xlu1 %v1123_v3  ;;  %v1357_v3 = vrot.slane %v2071_v36, 4  ;;  %v1316_v19 = vsel %vm186_vm1, %v1299_v59, %v1293_v13  ;;  %v1419_v13 = vmax.f32 %v1417_v31, %v1418_v53 }
 0x26c   : > { %v1317_v26 = vsel %vm188_vm2, %v1305_v12, %v1316_v19 }
 0x272   : > { %v2452_v6 = vpop.permute.xlu0 %794 }
 0x273   : > { %1130 = vmax.xlane.f32.xlu1 %v1129_v24  ;;  %v1358_v24 = vmax.f32 %v2071_v36, %v1357_v3  ;;  %v941_v36 = vpop.xlane.xlu1 %940 }
 0x274   : > { %v952_v15 = vsel %vm261_vm5, %v938_v61, %v941_v36 }
 0x278   : > { %1012 = vmax.xlane.f32.xlu0 %v1011_v2  ;;  %v1254_v2 = vmax.f32 %v1252_v28, %v1253_v22 }
 0x27a   : > { %824 = vrot.lane.b32.xlu2 %v823_v39, %s1836_s16  ;;  %v1259_v39 = vsel %vm186_vm1, %v1240_v35, %v1233_v34  ;;  %v2470_v46 = vpop.permute.xlu0 %529  ;;  %v1366_v35 = vmax.f32 %v1364_v58, %v1365_v14  ;;  %s1553_s16 = scalar_lea.hbm %s2770_s1, %s1640_s11 }
 0x27c   : > { %v947_v22 = vpop.xlane.xlu2 %946 }
 0x28c   : > { %549 = vrot.lane.b32.xlu0 %v2235_v11, %s1837_s20  ;;  %v1243_v11 = vmax.f32 %v1241_v48, %v1242_v49  ;;  %v1308_v48 = vrot.slane %v1307_v0, 2  ;;  %s1555_s20 = sshll.u32 %s2160_s26, 4  ;;  %s1556_s20 = int_to_ptr.vmem [resolvable:$true] %s1555_s20 }
 0x28e   : > { %v1244_v27 = vrot.slane %v1243_v11, 2  ;;  %v1309_v56 = vmax.f32 %v1307_v0, %v1308_v48  ;;  %v1410_v48 = vsel %vm1402_vm10, %v2319_v21, -inf  ;;  %v1062_v21 = vsel %vm877_vm9, %v2368_v63, -inf }
 0x28f   : > { %vm2510_vm9 = vcmp.ge.s32.totalorder %v197_v40, 16 }
 0x290   : > { %v1245_v5 = vmax.f32 %v1243_v11, %v1244_v27  ;;  %v1352_v11 = vmax.f32 %v2060_v18, %v1351_v62  ;;  %v1310_v27 = vrot.slane %v1309_v56, 1  ;;  %v1348_v18 = vmax.f32 %v1346_v51, %v1347_v8  ;;  %vm344_vm11 = vmand %vm2510_vm9, %vm343_vm14 }
 0x291   : > { %v1411_v51 = vrot.slane %v1410_v48, 4  ;;  %vm1209_vm9 = vcmask 60456   ;;  %vm2802_vm14 = vcmask 23552  }
 0x292   : > { %v1246_v33 = vrot.slane %v1245_v5, 1  ;;  %v1311_v4 = vmax.f32 %v1309_v56, %v1310_v27  ;;  %v1353_v52 = vrot.slane %v1352_v11, 2  ;;  %v1349_v34 = vrot.slane %v1348_v18, 1 }
 0x293   : > { %v1424_v56 = vsel %vm1402_vm10, %v2333_v29, -inf  ;;  %v1420_v27 = vrot.slane %v1419_v13, 2 }
 0x294   : > { %v1247_v25 = vmax.f32 %v1245_v5, %v1246_v33  ;;  %v1359_v5 = vrot.slane %v1358_v24, 2  ;;  %v2479_v41 = vsel %vm190_vm3, %v1311_v4, %v1317_v26  ;;  %v1354_v10 = vmax.f32 %v1352_v11, %v1353_v52 }
 0x295   : > { %v1320_v0 = vsel %vm872_vm0, %v2479_v41, -inf  ;;  %v1405_v11 = vmax.f32 %v1403_v47, %v1404_v50  ;;  %v1425_v58 = vrot.slane %v1424_v56, 4  ;;  %v1324_v61 = vsel %vm2779_vm12, %v2479_v41, -inf }
 0x296   : > { %v1260_v44 = vsel %vm188_vm2, %v1247_v25, %v1259_v39  ;;  %v1360_v28 = vmax.f32 %v1358_v24, %v1359_v5  ;;  %v1355_v62 = vrot.slane %v1354_v10, 1  ;;  %v1367_v39 = vrot.slane %v1366_v35, 1 }
 0x297   : > { %v2465_v57 = vsel %vm190_vm3, %v1254_v2, %v1260_v44  ;;  %v1350_v2 = vmax.f32 %v1348_v18, %v1349_v34  ;;  %v1412_v24 = vmax.f32 %v1410_v48, %v1411_v51  ;;  %v1406_v59 = vrot.slane %v1405_v11, 2 }
 0x298   : > { %v1263_v49 = vsel %vm872_vm0, %v2465_v57, -inf  ;;  %v1361_v25 = vrot.slane %v1360_v28, 1  ;;  %v1356_v42 = vmax.f32 %v1354_v10, %v1355_v62  ;;  %v1368_v32 = vmax.f32 %v1366_v35, %v1367_v39 }
 0x299   : > { %1264 = vmax.xlane.f32.xlu1 %v1263_v49  ;;  %v1413_v60 = vrot.slane %v1412_v24, 2  ;;  %v1426_v20 = vmax.f32 %v1424_v56, %v1425_v58  ;;  %v1407_v16 = vmax.f32 %v1405_v11, %v1406_v59  ;;  %v1421_v19 = vmax.f32 %v1419_v13, %v1420_v27 }
 0x29a   : > { %v1362_v3 = vmax.f32 %v1360_v28, %v1361_v25  ;;  %v1373_v44 = vsel %vm186_vm1, %v1356_v42, %v1350_v2  ;;  %v1279_v62 = vsel %vm2778_vm15, %v2465_v57, -inf  ;;  %v950_v2 = vpop.xlane.xlu1 %949  ;;  %v1126_v11 = vsel %vm881_vm7, %v2431_v37, -inf }
 0x29b   : > { %v1414_v12 = vmax.f32 %v1412_v24, %v1413_v60  ;;  %v1427_v4 = vrot.slane %v1426_v20, 2  ;;  %v1408_v29 = vrot.slane %v1407_v16, 1  ;;  %v1422_v5 = vrot.slane %v1421_v19, 1 }
 0x29c   : > { %v1374_v38 = vsel %vm188_vm2, %v1362_v3, %v1373_v44  ;;  %vm797_vm7 = vcmp.ge.s32.totalorder %v197_v40, 56  ;;  %v951_v27 = vmax.f32 %v950_v2, 0.0 }
 0x29d   : > { %v2493_v45 = vsel %vm190_vm3, %v1368_v32, %v1374_v38  ;;  %v1415_v8 = vrot.slane %v1414_v12, 1  ;;  %v1428_v52 = vmax.f32 %v1426_v20, %v1427_v4  ;;  %v1409_v26 = vmax.f32 %v1407_v16, %v1408_v29 }
 0x29e   : > { %v1377_v49 = vsel %vm872_vm0, %v2493_v45, -inf  ;;  %v1423_v10 = vmax.f32 %v1421_v19, %v1422_v5  ;;  %v1381_v25 = vsel %vm2779_vm12, %v2493_v45, -inf  ;;  %v1270_v16 = vsel %vm1209_vm9, %v2465_v57, -inf }
 0x29f   : > { %v1416_v18 = vmax.f32 %v1414_v12, %v1415_v8  ;;  %v1429_v14 = vrot.slane %v1428_v52, 1  ;;  %v1384_v4 = vsel %vm1209_vm9, %v2493_v45, -inf }
 0x2a1   : > { %1321 = vmax.xlane.f32.xlu1 %v1320_v0  ;;  %v1430_v28 = vmax.f32 %v1428_v52, %v1429_v14 }
 0x2a2   : > { %v1010_v42 = vpop.xlane.xlu1 %1009 }
 0x2a3   : > { %1133 = vmax.xlane.f32.xlu2 %v1132_v43  ;;  %v1435_v43 = vsel %vm186_vm1, %v1416_v18, %v1409_v26  ;;  %vm533_vm1 = vcmp.lt.s32.totalorder %v197_v40, 29 }
 0x2a5   : > { %v944_v33 = vpop.xlane.xlu0 %943 }
 0x2a6   : > { %v953_v54 = vsel %vm2780_vm6, %v952_v15, %v944_v33  ;;  %v1436_v15 = vsel %vm188_vm2, %v1423_v10, %v1435_v43  ;;  %v1071_v33 = vsel %vm2778_vm15, %v2368_v63, -inf  ;;  %vm542_vm2 = vcmp.ge.s32.totalorder %v197_v40, 29 }
 0x2a7   : > { %v2488_v30 = vsel %vm2799_vm4, %v953_v54, %v947_v22  ;;  %v2516_v34 = vsel %vm190_vm3, %v1430_v28, %v1436_v15  ;;  %vm534_vm4 = vmand %vm532_vm8, %vm533_vm1  ;;  %vm1213_vm3 = vcmask 85056   ;;  %v540_v22 = vpop.permute.xlu2 %539  ;;  %vm2803_vm8 = vcmask 31744  }
 0x2a8   : > { %v1439_v63 = vsel %vm872_vm0, %v2516_v34, -inf  ;;  %vm544_vm10 = vmand %vm542_vm2, %vm543_vm13  ;;  %v1273_v54 = vsel %vm1213_vm3, %v2465_v57, -inf  ;;  %vm1217_vm0 = vcmask 109656   ;;  %v1449_v53 = vsel %vm1213_vm3, %v2516_v34, -inf }
 0x2a9   : > { %1378 = vmax.xlane.f32.xlu1 %v1377_v49  ;;  %v1333_v3 = vsel %vm1217_vm0, %v2479_v41, -inf  ;;  %v1446_v49 = vsel %vm1209_vm9, %v2516_v34, -inf  ;;  %vm2552_vm1 = vcmp.ge.s32.totalorder %v197_v40, 38  ;;  %vm553_vm2 = vcmp.lt.s32.totalorder %v197_v40, 47 }
 0x2aa   : > { %v1060_v51 = vpop.xlane.xlu1 %1059  ;;  %vm2558_vm13 = vcmp.ge.s32.totalorder %v197_v40, 47  ;;  %v1452_v13 = vsel %vm1217_vm0, %v2516_v34, -inf  ;;  %v1276_v12 = vsel %vm1217_vm0, %v2465_v57, -inf  ;;  %v1214_v24 = vsel %vm1213_vm3, %v2274_v17, -inf }
 0x2ad   : > { %v1003_v36 = vpop.xlane.xlu0 %1002 }
 0x2ae   : > { %v1004_v32 = vmax.f32 %v1003_v36, 0.0 }
 0x2b1   : > { %1325 = vmax.xlane.f32.xlu1 %v1324_v61 }
 0x2b2   : > { %v560_v56 = vpop.permute.xlu1 %559 }
 0x2b6   : > { %1063 = vmax.xlane.f32.xlu0 %v1062_v21 }
 0x2b9   : > { %1440 = vmax.xlane.f32.xlu1 %v1439_v63  ;;  %v1327_v63 = vsel %vm1209_vm9, %v2479_v41, -inf }
 0x2ba   : > { %v805_v21 = vpop.permute.xlu1 %804 }
 0x2bd   : > { %v1007_v39 = vpop.xlane.xlu2 %1006 }
 0x2be   : > { %1072 = vmax.xlane.f32.xlu0 %v1071_v33  ;;  %v1018_v44 = vsel %vm261_vm5, %v1004_v32, %v1007_v39 }
 0x2bf   : > { %v1019_v47 = vsel %vm2780_vm6, %v1018_v44, %v1010_v42  ;;  %v1390_v42 = vsel %vm1217_vm0, %v2493_v45, -inf }
 0x2c0   : > { %v340_v35 = vpop.permute.xlu0 %339 }
 0x2c1   : > { %345 = vst.msk [vmem:[%s2160_s26] sm:$0x1] %vm344_vm11, %v340_v35  ;;  %1274 = vmax.xlane.f32.xlu1 %v1273_v54  ;;  %vm563_vm11 = vcmp.lt.s32.totalorder %v197_v40, 56  ;;  %v1470_v35 = vsel %vm1213_vm3, %v2431_v37, -inf  ;;  %v1330_v54 = vsel %vm1213_vm3, %v2479_v41, -inf }
 0x2c2   : > { %535 = vst.msk [vmem:[%s2160_s26] sm:$0x1] %vm534_vm4, %v2470_v46  ;;  %v1336_v46 = vsel %vm2778_vm15, %v2479_v41, -inf  ;;  %vm2567_vm4 = vcmp.lt.s32.totalorder %v197_v40, 72  ;;  %vm564_vm15 = vmand %vm2558_vm13, %vm563_vm11  ;;  %vm2818_vm11 = vcmask 126064   ;;  %v1467_v41 = vsel %vm1209_vm9, %v2431_v37, -inf }
 0x2c3   : > { %545 = vst.msk [vmem:[%s2160_s26] sm:$0x1] %vm544_vm10, %v540_v22  ;;  %vm554_vm10 = vmand %vm2552_vm1, %vm553_vm2  ;;  %vm2812_vm1 = vcmask 31744   ;;  %vm2816_vm2 = vcmask 35856   ;;  %v1455_v33 = vsel %vm2818_vm11, %v2516_v34, -inf }
 0x2c4   : > { %vm799_vm12 = vmand %vm797_vm7, %vm2567_vm4  ;;  %v955_v61 = vsel %vm2812_vm1, %v2488_v30, %v951_v27  ;;  %v1387_v30 = vsel %vm1213_vm3, %v2493_v45, -inf  ;;  %v1464_v28 = vsel %vm2816_vm2, %v2431_v37, -inf  ;;  %vm817_vm7 = vcmp.ge.s32.totalorder %v197_v40, 88 }
 0x2c5   : > { %vm2817_vm13 = vmmov %vm2816_vm2  ;;  %vm1156_vm3 = vcmask 39936  }
 0x2c6   : > { %v1267_v43 = vsel %vm2817_vm13, %v2465_v57, -inf  ;;  %vm2821_vm13 = vcmask 15360  }
 0x2c9   : > { %1280 = vmax.xlane.f32.xlu1 %v1279_v62 }
 0x2d1   : > { %1382 = vmax.xlane.f32.xlu1 %v1381_v25 }
 0x2d2   : > { %814 = vrot.lane.b32.xlu0 %v2365_v7, %s1838_s22  ;;  %v1016_v7 = vpop.xlane.xlu2 %1015  ;;  %s1557_s22 = sshll.u32 %s1553_s16, 4  ;;  %s1558_s22 = int_to_ptr.hbm [resolvable:$true] %s1557_s22 }
 0x2d3   : > { %v1017_v38 = vmax.f32 %v1016_v7, 0.0 }
 0x2d6   : > { %v1070_v29 = vpop.xlane.xlu1 %1069 }
 0x2d9   : > { %1337 = vmax.xlane.f32.xlu1 %v1336_v46 }
 0x2da   : > { %v1067_v52 = vpop.xlane.xlu2 %1066 }
 0x2de   : > { %v1125_v36 = vpop.xlane.xlu1 %1124 }
 0x2e1   : > { %1334 = vmax.xlane.f32.xlu1 %v1333_v3 }
 0x2e2   : > { %v2608_v15 = vpop.xlane.xlu2 %1120 }
 0x2e3   : > { %v1122_v32 = vmax.f32 %v2608_v15, 0.0 }
 0x2e6   : > { %v1131_v0 = vpop.xlane.xlu1 %1130 }
 0x2e9   : > { %1447 = vmax.xlane.f32.xlu1 %v1446_v49 }
 0x2ea   : > { %v825_v22 = vpop.permute.xlu2 %824 }
 0x2eb   : > { %v1013_v48 = vpop.xlane.xlu0 %1012 }
 0x2ec   : > { %v1020_v50 = vsel %vm2802_vm14, %v1019_v47, %v1013_v48  ;;  %vm2574_vm14 = vcmp.ge.s32.totalorder %v197_v40, 72  ;;  %v1473_v47 = vsel %vm1217_vm0, %v2431_v37, -inf  ;;  %v1210_v37 = vsel %vm1209_vm9, %v2274_v17, -inf }
 0x2ed   : > { %v1021_v31 = vsel %vm2803_vm8, %v1020_v50, %v1017_v38  ;;  %vm808_vm8 = vcmp.lt.s32.totalorder %v197_v40, 88 }
 0x2ee   : > { %1145 = vrot.lane.b32.xlu2 %v1021_v31, %s1839_s23  ;;  %vm809_vm6 = vmand %vm2574_vm14, %vm808_vm8  ;;  %vm827_vm8 = vcmp.ge.s32.totalorder %v197_v40, 104  ;;  %s1768_s23 = sshra.s32 %s1558_s22, 4  ;;  %s1769_s23 = int_to_ptr.hbm [resolvable:$true] %s1768_s23 }
 0x2ef   : > { %p1775_p0 = scmp.lt.s32.totalorder %s1769_s23, %s2770_s1 }
 0x2f1   : > { %1450 = vmax.xlane.f32.xlu1 %v1449_v53 }
 0x2f9   : > { %1453 = vmax.xlane.f32.xlu1 %v1452_v13 }
 0x2fc   : > { %1127 = vmax.xlane.f32.xlu0 %v1126_v11 }
 0x2fe   : > { %v550_v20 = vpop.permute.xlu0 %549 }
 0x2ff   : > { %555 = vst.msk [vmem:[%s2160_s26] sm:$0x1] %vm554_vm10, %v550_v20  ;;  %vm818_vm10 = vcmp.lt.s32.totalorder %v197_v40, 104 }
 0x300   : > { %565 = vst.msk [vmem:[%s2160_s26] sm:$0x1] %vm564_vm15, %v560_v56  ;;  %vm2814_vm15 = vcmask 23552  }
 0x301   : > { %800 = vst.msk [vmem:[%s2160_s26] sm:$0x1] %vm799_vm12, %v2452_v6  ;;  %v1061_v6 = vmax.f32 %v1060_v51, 0.0  ;;  %vm2815_vm12 = vmmov %vm2812_vm1  ;;  %vm828_vm1 = vcmp.lt.s32.totalorder %v197_v40, 120 }
 0x302   : > { %810 = vst.msk [vmem:[%s2160_s26] sm:$0x1] %vm809_vm6, %v805_v21  ;;  %vm2813_vm6 = vcmask 15360  }
 0x30c   : > { %v1265_v62 = vpop.xlane.xlu1 %1264 }
 0x310   : > { %1141 = vrot.lane.b32.xlu0 %v955_v61, %s1840_s24  ;;  %s1770_s24 = scalar_lea.hbm %s1769_s23, 3 }
 0x311   : > { %p1771_p6 = scmp.ne.s32.totalorder %s1769_s23, %s1770_s24 }
 0x313   : > { %p1772_p9 = pnand %p1771_p6, %p1911_p11 }
 0x314   : > { %v1322_v2 = vpop.xlane.xlu1 %1321 }
 0x315   : > { %p1773_p13 = pneg %p1772_p9 }
 0x316   : > { %v2637_v44 = vpop.xlane.xlu2 %1133 }
 0x317   : > { %1271 = vmax.xlane.f32.xlu2 %v1270_v16  ;;  %v1135_v7 = vmax.f32 %v2637_v44, 0.0 }
 0x31c   : > { %v2628_v39 = vpop.xlane.xlu1 %1378 }
 0x31f   : > { %1277 = vmax.xlane.f32.xlu2 %v1276_v12 }
 0x324   : > { %v1326_v3 = vpop.xlane.xlu1 %1325 }
 0x327   : > { %1385 = vmax.xlane.f32.xlu2 %v1384_v4  ;;  %v1266_v4 = vmax.f32 %v1265_v62, 0.0  ;;  %v893_v62 = vmax.f32 %v2376_v9, 0.0 }
 0x329   : > { %v1064_v19 = vpop.xlane.xlu0 %1063 }
 0x32a   : > { %v1075_v8 = vsel %vm261_vm5, %v1061_v6, %v1064_v19 }
 0x32b   : > { %v1076_v5 = vsel %vm2813_vm6, %v1075_v8, %v1067_v52  ;;  %vm819_vm6 = vmand %vm817_vm7, %vm818_vm10  ;;  %vm2823_vm7 = vcmask 31744  }
 0x32c   : > { %v1077_v14 = vsel %vm2814_vm15, %v1076_v5, %v1070_v29  ;;  %vm829_vm15 = vmand %vm827_vm8, %vm828_vm1  ;;  %v2645_v48 = vpop.xlane.xlu1 %1440 }
 0x32d   : > { %vm2827_vm8 = vmmov %vm2823_vm7 }
 0x32f   : > { %1388 = vmax.xlane.f32.xlu2 %v1387_v30 }
 0x331   : > { %v1073_v26 = vpop.xlane.xlu0 %1072 }
 0x332   : > { %v1074_v18 = vmax.f32 %v1073_v26, 0.0 }
 0x334   : > { %v1078_v10 = vsel %vm2815_vm12, %v1077_v14, %v1074_v18  ;;  %vm2819_vm12 = vmmov %vm2816_vm2  ;;  %v1275_v53 = vpop.xlane.xlu1 %1274 }
 0x335   : > { %1149 = vrot.lane.b32.xlu1 %v1078_v10, %s1841_s17  ;;  %v1443_v25 = vsel %vm2819_vm12, %v2516_v34, -inf  ;;  %vm2820_vm2 = vmmov %vm2818_vm11  ;;  %v1218_v34 = vsel %vm1217_vm0, %v2274_v17, -inf  ;;  %vm2822_vm11 = vcmask 23552  }
 0x336   : > { %v1393_v46 = vsel %vm2820_vm2, %v2493_v45, -inf  ;;  %v1136_v45 = vsel %vm261_vm5, %v1122_v32, %v1125_v36  ;;  %vm2824_vm10 = vmmov %vm2819_vm12  ;;  %v1323_v36 = vmax.f32 %v1322_v2, 0.0  ;;  %vm1158_vm2 = vcmask 80896  }
 0x337   : > { %1465 = vmax.xlane.f32.xlu2 %v1464_v28  ;;  %v1206_v31 = vsel %vm2824_vm10, %v2274_v17, -inf  ;;  %vm2825_vm0 = vmmov %vm2821_vm13 }
 0x338   : > { %vm2826_vm9 = vmmov %vm2822_vm11  ;;  %v1340_v28 = vsel %vm261_vm5, %v1323_v36, %v1326_v3  ;;  %v1380_v3 = vmax.f32 %v2628_v39, 0.0 }
 0x339   : > { %vm2828_vm1 = vmmov %vm2825_vm0 }
 0x33a   : > { %1268 = vmax.xlane.f32.xlu0 %v1267_v43  ;;  %vm2831_vm12 = vmmov %vm2823_vm7 }
 0x33b   : > { %v897_v2 = vsel %vm2831_vm12, %v2387_v1, %v893_v62 }
 0x33c   : > { %v1281_v11 = vpop.xlane.xlu1 %1280 }
 0x33d   : > { %v1282_v29 = vmax.f32 %v1281_v11, 0.0 }
 0x33f   : > { %1456 = vmax.xlane.f32.xlu2 %v1455_v33 }
 0x342   : > { %1328 = vmax.xlane.f32.xlu0 %v1327_v63 }
 0x344   : > { %v815_v57 = vpop.permute.xlu0 %814  ;;  %v1383_v13 = vpop.xlane.xlu1 %1382 }
 0x345   : > { %820 = vst.msk [vmem:[%s2160_s26] sm:$0x1] %vm819_vm6, %v815_v57  ;;  %vm2829_vm6 = vmmov %vm2826_vm9 }
 0x346   : > { %830 = vst.msk [vmem:[%s2160_s26] sm:$0x1] %vm829_vm15, %v825_v22  ;;  %vm2830_vm15 = vmmov %vm2823_vm7 }
 0x347   : > { %1471 = vmax.xlane.f32.xlu2 %v1470_v35  ;;  %vm2833_vm10 = vmmov %vm2829_vm6 }
 0x348   : > { %v1146_v56 = vpop.permute.xlu2 %1145 }
 0x34a   : > { %1331 = vmax.xlane.f32.xlu0 %v1330_v54 }
 0x34c   : > { %v1338_v21 = vpop.xlane.xlu1 %1337 }
 0x34d   : > { %v1339_v43 = vmax.f32 %v1338_v21, 0.0 }
 0x352   : > { %1444 = vmax.xlane.f32.xlu0 %v1443_v25 }
 0x354   : > { %v1335_v61 = vpop.xlane.xlu1 %1334 }
 0x35a   : > { %1394 = vmax.xlane.f32.xlu0 %v1393_v46 }
 0x35c   : > { %v1448_v6 = vpop.xlane.xlu1 %1447 }
 0x35f   : > { %1219 = vmax.xlane.f32.xlu1 %v1218_v34 }
 0x362   : > { %1391 = vmax.xlane.f32.xlu0 %v1390_v42 }
 0x364   : > { %v1451_v14 = vpop.xlane.xlu1 %1450 }
 0x36a   : > { %1468 = vmax.xlane.f32.xlu0 %v1467_v41 }
 0x36c   : > { %v1454_v35 = vpop.xlane.xlu1 %1453 }
 0x36f   : > { %v1128_v38 = vpop.xlane.xlu0 %1127 }
 0x370   : > { %v1137_v49 = vsel %vm2821_vm13, %v1136_v45, %v1128_v38  ;;  %vm1160_vm13 = vcmask 121856  }
 0x371   : > { %v1138_v50 = vsel %vm2822_vm11, %v1137_v49, %v1131_v0  ;;  %vm1162_vm11 = vcmask 162816   ;;  %v1397_v49 = vsel %vm261_vm5, %v1380_v3, %v1383_v13 }
 0x372   : > { %1474 = vmax.xlane.f32.xlu0 %v1473_v47  ;;  %v1139_v51 = vsel %vm2823_vm7, %v1138_v50, %v1135_v7  ;;  %v1442_v50 = vmax.f32 %v2645_v48, 0.0  ;;  %vm2832_vm7 = vmmov %vm2825_vm0 }
 0x373   : > { %1153 = vrot.lane.b32.xlu2 %v1139_v51, %s1831_s4  ;;  %s1849_s4 = smov 92  }
 0x37a   : > { %1207 = vmax.xlane.f32.xlu0 %v1206_v31 }
 0x382   : > { %1211 = vmax.xlane.f32.xlu0 %v1210_v37  ;;  %v1142_v16 = vpop.permute.xlu0 %1141 }
 0x383   : > { %v1157_v46 = vsel %vm1156_vm3, %v897_v2, %v1142_v16 }
 0x384   : > { %v1159_v41 = vsel %vm1158_vm2, %v1157_v46, %v1146_v56  ;;  %vm1171_vm2 = vcmp.ge.s32.totalorder %v197_v40, 120 }
 0x38a   : > { %1215 = vmax.xlane.f32.xlu0 %v1214_v24  ;;  %v1272_v58 = vpop.xlane.xlu2 %1271 }
 0x392   : > { %v1278_v20 = vpop.xlane.xlu2 %1277 }
 0x39a   : > { %v1386_v27 = vpop.xlane.xlu2 %1385 }
 0x39b   : > { %v1398_v1 = vsel %vm2832_vm7, %v1397_v49, %v1386_v27 }
 0x3a2   : > { %v1389_v12 = vpop.xlane.xlu2 %1388 }
 0x3a3   : > { %v1399_v31 = vsel %vm2833_vm10, %v1398_v1, %v1389_v12  ;;  %vm2840_vm10 = vmmov %vm2825_vm0 }
 0x3a7   : > { %v1150_v42 = vpop.permute.xlu1 %1149 }
 0x3a8   : > { %v1161_v34 = vsel %vm1160_vm13, %v1159_v41, %v1150_v42  ;;  %vm1172_vm13 = vcmp.lt.s32.totalorder %v197_v40, 145 }
 0x3a9   : > { %vm1173_vm7 = vmand %vm1171_vm2, %vm1172_vm13  ;;  %vm1191_vm2 = vcmp.ge.s32.totalorder %v197_v40, 42  ;;  %vm1192_vm13 = vcmp.lt.s32.totalorder %v197_v40, 67 }
 0x3aa   : > { %v1466_v17 = vpop.xlane.xlu2 %1465 }
 0x3ad   : > { %v1269_v19 = vpop.xlane.xlu0 %1268 }
 0x3ae   : > { %v1283_v30 = vsel %vm261_vm5, %v1266_v4, %v1269_v19 }
 0x3af   : > { %v1284_v8 = vsel %vm2825_vm0, %v1283_v30, %v1272_v58 }
 0x3b0   : > { %v1285_v52 = vsel %vm2826_vm9, %v1284_v8, %v1275_v53  ;;  %vm2834_vm9 = vmmov %vm2827_vm8 }
 0x3b1   : > { %v1286_v5 = vsel %vm2827_vm8, %v1285_v52, %v1278_v20  ;;  %vm2835_vm8 = vmmov %vm2829_vm6 }
 0x3b2   : > { %v1287_v26 = vsel %vm1156_vm3, %v1286_v5, %v1282_v29  ;;  %v1457_v10 = vpop.xlane.xlu2 %1456 }
 0x3b3   : > { %1482 = vrot.lane.b32.xlu2 %v1287_v26, %s1826_s28  ;;  %v1458_v58 = vmax.f32 %v1457_v10, 0.0  ;;  %s1844_s28 = smov 120  }
 0x3b5   : > { %v1329_v18 = vpop.xlane.xlu0 %1328 }
 0x3b6   : > { %v1341_v33 = vsel %vm2828_vm1, %v1340_v28, %v1329_v18  ;;  %vm2836_vm1 = vmmov %vm2834_vm9 }
 0x3b7   : > { %vm2839_vm12 = vmmov %vm2836_vm1 }
 0x3ba   : > { %v1472_v54 = vpop.xlane.xlu2 %1471 }
 0x3bd   : > { %v1332_v0 = vpop.xlane.xlu0 %1331 }
 0x3be   : > { %v1342_v63 = vsel %vm2829_vm6, %v1341_v33, %v1332_v0  ;;  %vm2837_vm6 = vmmov %vm2825_vm0 }
 0x3bf   : > { %v1343_v57 = vsel %vm2830_vm15, %v1342_v63, %v1335_v61  ;;  %v1476_v61 = vsel %vm261_vm5, %v1122_v32, %v1466_v17  ;;  %vm2838_vm15 = vmmov %vm2835_vm8 }
 0x3c0   : > { %v1344_v22 = vsel %vm1156_vm3, %v1343_v57, %v1339_v43 }
 0x3c1   : > { %1486 = vrot.lane.b32.xlu0 %v1344_v22, %s1829_s2  ;;  %s1847_s2 = smov 17  }
 0x3c5   : > { %v1445_v25 = vpop.xlane.xlu0 %1444 }
 0x3c6   : > { %v1459_v51 = vsel %vm261_vm5, %v1442_v50, %v1445_v25 }
 0x3c7   : > { %v1460_v39 = vsel %vm2825_vm0, %v1459_v51, %v1448_v6  ;;  %vm2841_vm0 = vmmov %vm2835_vm8 }
 0x3c8   : > { %v1461_v48 = vsel %vm2835_vm8, %v1460_v39, %v1451_v14  ;;  %vm2843_vm8 = vcmask 48128  }
 0x3c9   : > { %v1462_v13 = vsel %vm2836_vm1, %v1461_v48, %v1454_v35 }
 0x3ca   : > { %v1463_v27 = vsel %vm1156_vm3, %v1462_v13, %v1458_v58 }
 0x3cd   : > { %v1154_v45 = vpop.permute.xlu2 %1153  ;;  %v1395_v38 = vpop.xlane.xlu0 %1394 }
 0x3ce   : > { %v1163_v47 = vsel %vm1162_vm11, %v1161_v34, %v1154_v45  ;;  %v1396_v53 = vmax.f32 %v1395_v38, 0.0  ;;  %vm1168_vm11 = vcmask 982016  }
 0x3cf   : > { %1175 = vst [vmem:[#allocation1] sm:$0xff] %v1163_v47 }
 0x3d2   : > { %v1220_v36 = vpop.xlane.xlu1 %1219 }
 0x3d5   : > { %v1392_v37 = vpop.xlane.xlu0 %1391 }
 0x3d6   : > { %v1177_v56 = vld [vmem:[#allocation1 + $0x1] ss:$9 sm:$0xff]  ;;  %v1400_v11 = vsel %vm2834_vm9, %v1399_v31, %v1392_v37  ;;  %vm2842_vm9 = vmmov %vm2836_vm1  ;;  %vm2844_vm1 = vcmask 97280  }
 0x3d7   : > { %1185 = vst [vmem:[#allocation1] sm:$0xff] %v1163_v47  ;;  %v1401_v24 = vsel %vm1156_vm3, %v1400_v11, %v1396_v53 }
 0x3d8   : > { %1490 = vrot.lane.b32.xlu2 %v1401_v24, %s1842_s25 }
 0x3dd   : > { %v1469_v20 = vpop.xlane.xlu0 %1468 }
 0x3de   : > { %v1187_v21 = vld [vmem:[#allocation1 + $0x2] ss:$9 sm:$0xff]  ;;  %v1477_v16 = vsel %vm2837_vm6, %v1476_v61, %v1469_v20  ;;  %vm1503_vm6 = vcmask 146432  }
 0x3df   : > { %1195 = vst [vmem:[#allocation1] sm:$0xff] %v1163_v47  ;;  %v1478_v12 = vsel %vm2838_vm15, %v1477_v16, %v1472_v54  ;;  %vm1505_vm15 = vcmask 195584  }
 0x3e0   : > { %1494 = vrot.lane.b32.xlu2 %v1463_v27, %s1843_s27  ;;  %s1774_s27 = scalar_lea.hbm %s2770_s1, 6 }
 0x3e1   : > { %p1776_p1 = scmp.lt.s32.totalorder %s1774_s27, %s1770_s24 }
 0x3e3   : > { %p1777_p3 = por %p1776_p1, %p1775_p0 }
 0x3e5   : > { %v1475_v4 = vpop.xlane.xlu0 %1474  ;;  %p1778_p4 = pnand %p1777_p3, %p1773_p13 }
 0x3e6   : > { %v1479_v6 = vsel %vm2839_vm12, %v1478_v12, %v1475_v4  ;;  %v1197_v15 = vld [vmem:[#allocation1 + $0x3] ss:$9 sm:$0xff]  ;;  %vm1507_vm12 = vcmask 244736  }
 0x3e7   : > { %v1480_v19 = vsel %vm1156_vm3, %v1479_v6, %v1135_v7 }
 0x3e8   : > { %1165 = vrot.lane.b32.xlu2 %v1163_v47, %s1844_s28  ;;  %1498 = vrot.lane.b32.xlu0 %v1480_v19, %s1845_s29 }
 0x3ed   : > { %v1208_v30 = vpop.xlane.xlu0 %1207 }
 0x3ee   : > { %v1221_v26 = vsel %vm261_vm5, %v876_v23, %v1208_v30  ;;  %vm1181_vm5 = vcmp.ge.s32.totalorder %v197_v40, 17 }
 0x3f0   : > { %1188 = vrot.lane.b32.xlu2 %v1187_v21, %s1846_s30  ;;  %1178 = vrot.lane.b32.xlu0 %v1177_v56, %s1847_s2 }
 0x3f5   : > { %v1212_v52 = vpop.xlane.xlu0 %1211 }
 0x3f6   : > { %v1222_v18 = vsel %vm2840_vm10, %v1221_v26, %v1212_v52  ;;  %vm1521_vm10 = vcmp.lt.s32.totalorder %v197_v40, 36 }
 0x3f8   : > { %1198 = vrot.lane.b32.xlu0 %v1197_v15, %s1848_s3 }
 0x3fd   : > { %v1216_v5 = vpop.xlane.xlu0 %1215 }
 0x3fe   : > { %v1223_v14 = vsel %vm2841_vm0, %v1222_v18, %v1216_v5  ;;  %vm1201_vm0 = vcmp.ge.s32.totalorder %v197_v40, 67 }
 0x3ff   : > { %v1224_v10 = vsel %vm2842_vm9, %v1223_v14, %v1220_v36  ;;  %vm1202_vm9 = vcmp.lt.s32.totalorder %v197_v40, 92 }
 0x400   : > { %v1225_v43 = vsel %vm1156_vm3, %v1224_v10, %v893_v62  ;;  %vm1182_vm3 = vcmp.lt.s32.totalorder %v197_v40, 42 }
 0x40d   : > { %v1483_v32 = vpop.permute.xlu2 %1482 }
 0x40e   : > { %v1501_v33 = vsel %vm2843_vm8, %v1225_v43, %v1483_v32  ;;  %vm1203_vm8 = vmand %vm1201_vm0, %vm1202_vm9 }
 0x432   : > { %v1491_v29 = vpop.permute.xlu2 %1490 }
 0x433   : > { %v1487_v28 = vpop.permute.xlu0 %1486 }
 0x434   : > { %v1502_v0 = vsel %vm2844_vm1, %v1501_v33, %v1487_v28  ;;  %vm1513_vm1 = vcmp.ge.s32.totalorder %v197_v40, 92 }
 0x435   : > { %v1504_v55 = vsel %vm1503_vm6, %v1502_v0, %v1491_v29  ;;  %vm1514_vm6 = vcmp.lt.s32.totalorder %v197_v40, 128 }
 0x43a   : > { %v1495_v8 = vpop.permute.xlu2 %1494 }
 0x43b   : > { %v1506_v23 = vsel %vm1505_vm15, %v1504_v55, %v1495_v8  ;;  %vm1515_vm15 = vmand %vm1513_vm1, %vm1514_vm6 }
 0x442   : > { %v1166_v44 = vpop.permute.xlu2 %1165 }
 0x443   : > { %v1167_v7 = vrot.slane %v1166_v44, 7 }
 0x445   : > { %v1169_v17 = vsel %vm1168_vm11, %v1167_v7, %v1166_v44  ;;  %vm1183_vm11 = vmand %vm1181_vm5, %vm1182_vm3  ;;  %vm1539_vm3 = vcmp.lt.s32.totalorder %v197_v40, 108 }
 0x446   : > { %1174 = vst.msk [vmem:[%s2160_s26] sm:$0x3] %vm1173_vm7, %v1169_v17  ;;  %vm1193_vm7 = vmand %vm1191_vm2, %vm1192_vm13 }
 0x447   : > { %vm1540_vm2 = vmand %vm2574_vm14, %vm1539_vm3 }
 0x44a   : > { %v1189_v22 = vpop.permute.xlu2 %1188 }
 0x45a   : > { %v1499_v63 = vpop.permute.xlu0 %1498 }
 0x45b   : > { %v1508_v57 = vsel %vm1507_vm12, %v1506_v23, %v1499_v63  ;;  %vm1530_vm12 = vcmp.ge.s32.totalorder %v197_v40, 36 }
 0x45c   : > { %1517 = vst [vmem:[#allocation1] sm:$0xff] %v1508_v57  ;;  %1510 = vrot.lane.b32.xlu2 %v1508_v57, %s1849_s4  ;;  %vm1531_vm5 = vmand %vm1530_vm12, %vm2567_vm4 }
 0x462   : > { %v1179_v9 = vpop.permute.xlu0 %1178 }
 0x463   : > { %v1519_v35 = vld [vmem:[#allocation1 + $0x1] ss:$9 sm:$0xff]  ;;  %1184 = vst.msk [vmem:[%s2160_s26 + $0x1] sm:$0x1] %vm1183_vm11, %v1179_v9 }
 0x464   : > { %1524 = vst [vmem:[#allocation1] sm:$0xff] %v1508_v57 }
 0x465   : > { %1194 = vst.msk [vmem:[%s2160_s26 + $0x1] sm:$0x1] %vm1193_vm7, %v1189_v22 }
 0x466   : > { %1523 = vst.msk [vmem:[%s2160_s26 + $0x2] sm:$0x1] %vm1521_vm10, %v1519_v35 }
 0x46a   : > { %v1199_v54 = vpop.permute.xlu0 %1198 }
 0x46b   : > { %1204 = vst.msk [vmem:[%s2160_s26 + $0x1] sm:$0x1] %vm1203_vm8, %v1199_v54  ;;  %v1526_v62 = vld [vmem:[#allocation1 + $0x2] ss:$9 sm:$0xff] }
 0x46c   : > { %1527 = vrot.lane.b32.xlu1 %v1526_v62, %s1850_s5  ;;  %1533 = vst [vmem:[#allocation1] sm:$0xff] %v1508_v57 }
 0x473   : > { %v1535_v25 = vld [vmem:[#allocation1 + $0x3] ss:$9 sm:$0xff] }
 0x474   : > { %1536 = vrot.lane.b32.xlu0 %v1535_v25, %s1834_s13 }
 0x4b6   : > { %v1511_v2 = vpop.permute.xlu2 %1510 }
 0x4b7   : > { %1516 = vst.msk [vmem:[%s2160_s26 + $0x1] sm:$0x1] %vm1515_vm15, %v1511_v2 }
 0x4de   : > { %v1528_v46 = vpop.permute.xlu1 %1527 }
 0x4df   : > { %1532 = vst.msk [vmem:[%s2160_s26 + $0x2] sm:$0x1] %vm1531_vm5, %v1528_v46 }
 0x4e6   : > { %v1537_v42 = vpop.permute.xlu0 %1536 }
 0x4e7   : > { %1541 = vst.msk [vmem:[%s2160_s26 + $0x2] sm:$0x1] %vm1540_vm2, %v1537_v42 }
 0x4e8   : > { %1781 = shalt.err (!%p1778_p4)
}
 0x4e9   : > { %1643 = dma.vmem_to_hbm [thread:$0]  (%p1911_p11), %s1556_s20, 48, %s1558_s22, %s1543_s10  }
 0x4ea PF: > { %s1569_s21 = sand.u32 1, %s1808_s6   ;;  %p2845_p7 = scmp.ge.s32.totalorder %s1820_s9, 2 }
 0x4eb   : > { %s1570_s26 = scalar_lea.sflag [#allocation4], %s1569_s21 }
 0x4ec   : > { %p1650_p5 = pnand %p2845_p7, %p1915_p12 }
 0x4ee   : > { %p1651_p8 = pneg %p1650_p5 }
 0x4f0   : > { %1803 = dma.done.wait (%p1651_p8), %s1570_s26, 48  }
 0x4f1   : > { %1805 = vsyncadd (%p1651_p8), %s1570_s26, 4294967248  ;;  %p14_p10 = scmp.ge.s32.totalorder %s1886_s12, 4   ;;  %s2846_s6 = smov %s1812_s7 }
 0x4f2   : > { %s2847_s7 = smov %s1816_s8  ;;  %s2848_s8 = smov %s1898_s15 }
 0x4f3   : > { %s2849_s9 = smov %s1886_s12  ;;  %16 = sbr.rel (!%p14_p10) target bundleno = 5 (0x5), region = 84 }
 0x4f8   :  { %1576 = vsyncpa [#allocation3], 1 }
 0x4f9   :  { %1578 = vsyncpa [#allocation3 + $0x1], 1 }
 0x4fa   :  { %1579 = vsyncpa [#allocation4], 1 }
 0x4fb   :  { %1581 = vsyncpa [#allocation4 + $0x1], 1 }

</bundles_post_ra>
